<compile_context>
chip_gen: v7x
topology: tpu7x:2x2x1
jax: 0.10.0
libtpu: 0.0.40
codegen_flags: <defaults>
</compile_context>

<pallas_src>
import functools

import jax
import jax.numpy as jnp
from jax.experimental import pallas as pl
from jax.experimental.pallas import tpu as pltpu


# --------------------------------------------------------------------------- kernel ----
def _sepconv_kernel(x_ref, dw_ref, pw_ref, pb_ref, o_ref, *,
                    tile_h, dilation, wo, compute_dtype):
    # x_ref : (1, Hp, W16, C) bf16   whole (padded) image of one batch element, VMEM resident
    # dw_ref: (3, 3, C)       f32    depthwise weights, channels last
    # pw_ref: (C, C)          bf16   pointwise weight, (C_in, C_out)
    # pb_ref: (1, C)          f32    fused bias: pw @ db + pb
    # o_ref : (1, tile_h, wo, C) f32 output row band
    w16 = x_ref.shape[2]
    c = x_ref.shape[3]
    band_h = tile_h + 2 * dilation
    m = tile_h * w16           # rows entering the depthwise FMAs
    big = band_h * w16         # rows in the flattened band

    t = pl.program_id(1)
    row0 = pl.multiple_of(t * tile_h, tile_h)   # first input row needed by this band (kh=0)

    # Single aligned load of the band, upcast once, flattened to a 2-D (rows, C) slab.
    band = x_ref[0, pl.ds(row0, band_h), :, :].astype(jnp.float32).reshape(big, c)

    # kw taps via 2 XLU rolls on the f32 slab: tap_s[j] = band[(j + s) mod big].  The
    # wrap-around only pollutes columns >= W16 - s >= Wo, which are cropped before the
    # matmul, so it never reaches the output.
    taps = [band,
            pltpu.roll(band, shift=big - dilation, axis=0),
            pltpu.roll(band, shift=big - 2 * dilation, axis=0)]
    if compute_dtype != jnp.float32:
        taps = [tp.astype(compute_dtype) for tp in taps]   # bf16 VPU path (v6e / v7x)

    # Depthwise 3x3: 3 aligned kh slices per kw tap -> 9 VPU FMAs total.
    acc = None
    for kh in range(3):
        r0 = kh * dilation * w16          # multiple of 16 -> aligned slice start
        for kw in range(3):
            rows = jax.lax.slice_in_dim(taps[kw], r0, r0 + m, axis=0)
            term = rows * dw_ref[kh, kw, :].astype(compute_dtype)
            acc = term if acc is None else acc + term

    # Crop W16 -> Wo *before* the pointwise matmul, then 1x1 conv on the MXU
    # (bf16 in, f32 accumulate) plus the fused bias.
    acc = acc.astype(jnp.bfloat16).reshape(tile_h, w16, c)[:, :wo, :].reshape(tile_h * wo, c)
    out = jnp.dot(acc, pw_ref[...], preferred_element_type=jnp.float32)
    out = out + pb_ref[0, :]
    o_ref[0] = out.reshape(tile_h, wo, c).astype(o_ref.dtype)


# ------------------------------------------------------------------ generation params ----
def _tpu_kind():
    try:
        return jax.devices()[0].device_kind.lower()
    except Exception:
        return ""


def _gen_params():
    """(compute_dtype, min_total_grid_steps, vmem_limit_bytes) for the current TPU gen."""
    kind = _tpu_kind()
    legacy_vpu = any(t in kind for t in ("v2", "v3", "v4", "v5"))   # no bf16 VALU -> f32 FMAs
    is_v7 = "7" in kind                                             # 64 MiB VMEM, 2 TCs
    dual_core = is_v7 or ("v4" in kind) or ("v5p" in kind)          # >=2 grid steps needed
    compute_dtype = jnp.float32 if legacy_vpu else jnp.bfloat16
    min_steps = 2 if dual_core else 1
    vmem_cap = (48 if is_v7 else 96) * (1 << 20)                    # vs 64 / 128 MiB physical
    return compute_dtype, min_steps, vmem_cap


def _vmem_estimate_bytes(hp, w16, wo, c, tile_h, dilation, comp_bytes):
    """Conservative per-step VMEM footprint for the resident-image design."""
    band_h = tile_h + 2 * dilation
    big = band_h * w16
    m = tile_h * w16
    resident = 2 * hp * w16 * c * 2                 # double-buffered bf16 input image block
    out_blk = 2 * tile_h * wo * c * 4               # double-buffered f32 output band
    weights = 2 * (9 * c * 4 + c * c * 2 + c * 4)   # dw (f32) + pw (bf16) + fused bias
    temps = 3 * big * c * 4                         # f32 band + 2 rolled slabs
    temps += (3 * big + m) * c * comp_bytes         # downcast taps + depthwise accumulator
    temps += tile_h * wo * c * (2 + 4)              # cropped bf16 slab + f32 matmul result
    return resident + out_blk + weights + temps


def _choose_tile_h(ho, wo, n_batch, hp, w16, c, dilation, *,
                   min_total_steps, vmem_budget, comp_bytes):
    """Largest divisor of Ho whose band fits the VMEM budget and keeps enough grid steps."""
    divisors = sorted((d for d in range(1, ho + 1) if ho % d == 0), reverse=True)
    ok = [d for d in divisors if n_batch * (ho // d) >= min_total_steps] or divisors
    for th in ok:
        if _vmem_estimate_bytes(hp, w16, wo, c, th, dilation, comp_bytes) <= vmem_budget:
            return th
    # TODO(synk): for images too large to keep VMEM-resident, switch in_specs[0] to halo'd
    # row-band blocks via manual DMA; never triggered at these sizes.
    return ok[-1]


# ------------------------------------------------------------------------- wrappers ----
def separable_conv2d_nhwc(x, dw_hwc, pw_t, fused_pb, *, dilation=1, padding=0,
                          out_dtype=jnp.float32):
    """Core NHWC separable conv.

    x        : (N, H, W, C) float      (streamed to the kernel as bf16)
    dw_hwc   : (3, 3, C)    float32    depthwise weights, channels last
    pw_t     : (C, C)       float      pointwise weight, (C_in, C_out)
    fused_pb : (1, C)       float32    pw @ db + pb
    Returns (N, Ho, Wo, C) with Ho = H + 2*padding - 2*dilation, Wo likewise.
    """
    n, h, w, c = x.shape
    hp = h + 2 * padding
    wp = w + 2 * padding
    ho = hp - 2 * dilation
    wo = wp - 2 * dilation
    assert ho > 0 and wo > 0, "spatial dims too small for a dilated 3x3 valid conv"

    compute_dtype, min_steps, vmem_cap = _gen_params()
    comp_bytes = jnp.dtype(compute_dtype).itemsize

    # Single fused pad: user zero-padding plus right-padding of W up to a multiple of 16 so
    # every bf16 sublane slice / reshape in the kernel stays aligned to the (16, 128) tiling.
    w16 = ((wp + 15) // 16) * 16
    assert w16 - wo >= 2 * dilation  # roll wrap-around only ever touches cropped columns
    x = x.astype(jnp.bfloat16)
    if padding > 0 or w16 != w:
        x = jnp.pad(x, ((0, 0), (padding, padding), (padding, w16 - w - padding), (0, 0)))

    tile_h = _choose_tile_h(ho, wo, n, hp, w16, c, dilation,
                            min_total_steps=min_steps,
                            vmem_budget=int(0.7 * vmem_cap),
                            comp_bytes=comp_bytes)
    n_bands = ho // tile_h

    kernel = functools.partial(_sepconv_kernel, tile_h=tile_h, dilation=dilation, wo=wo,
                               compute_dtype=compute_dtype)

    return pl.pallas_call(
        kernel,
        out_shape=jax.ShapeDtypeStruct((n, ho, wo, c), out_dtype),
        grid_spec=pltpu.PrefetchScalarGridSpec(
            num_scalar_prefetch=0,
            grid=(n, n_bands),
            in_specs=[
                # Whole image per batch element: the block index ignores the band axis, so the
                # image is DMA'd once per batch element and reused across its row bands.
                pl.BlockSpec((1, hp, w16, c), lambda b, t: (b, 0, 0, 0)),
                pl.BlockSpec((3, 3, c), lambda b, t: (0, 0, 0)),
                pl.BlockSpec((c, c), lambda b, t: (0, 0)),
                pl.BlockSpec((1, c), lambda b, t: (0, 0)),
            ],
            out_specs=pl.BlockSpec((1, tile_h, wo, c), lambda b, t: (b, t, 0, 0)),
        ),
        compiler_params=pltpu.CompilerParams(
            dimension_semantics=("parallel", "parallel"),
            vmem_limit_bytes=vmem_cap,
        ),
    )(x, dw_hwc.astype(jnp.float32), pw_t.astype(jnp.bfloat16), fused_pb.astype(jnp.float32))


def separable_conv2d(x_nchw, dw, db, pw, pb, *, dilation=1, padding=0):
    """PyTorch-compatible SeparableConv2D forward (NCHW in / NCHW f32 out).

    x_nchw: (N, C, H, W) float32
    dw    : (C, 1, 3, 3) depthwise conv weight   db: (C,) depthwise bias
    pw    : (C, C, 1, 1) pointwise conv weight   pb: (C,) pointwise bias
    """
    _, c, _, _ = x_nchw.shape
    # NCHW -> NHWC once at the boundary (channels onto the lane axis).  If the surrounding
    # model is already NHWC, call separable_conv2d_nhwc directly and skip both transposes.
    x = jnp.transpose(x_nchw, (0, 2, 3, 1))
    dw_hwc = jnp.transpose(dw[:, 0, :, :], (1, 2, 0)).astype(jnp.float32)   # (3, 3, C)
    pw2d = pw[:, :, 0, 0].astype(jnp.float32)                               # (C_out, C_in)
    pw_t = jnp.transpose(pw2d, (1, 0))                                      # (C_in, C_out)
    # Pointwise conv is linear, so the depthwise bias folds into the pointwise bias.
    fused_pb = (pw2d @ db.astype(jnp.float32) + pb.astype(jnp.float32)).reshape(1, c)

    out_nhwc = separable_conv2d_nhwc(x, dw_hwc, pw_t, fused_pb,
                                     dilation=dilation, padding=padding,
                                     out_dtype=jnp.float32)
    return jnp.transpose(out_nhwc, (0, 3, 1, 2))


# ------------------------------------------------------------------------- testbench ----
def _reference(x, dw, db, pw, pb, *, dilation=1, padding=0):
    """Pure-JAX f32 reference using lax.conv_general_dilated (matches PyTorch Conv2d)."""
    c = x.shape[1]
    out = jax.lax.conv_general_dilated(
        x, dw, window_strides=(1, 1),
        padding=[(padding, padding), (padding, padding)],
        rhs_dilation=(dilation, dilation),
        feature_group_count=c,
        dimension_numbers=("NCHW", "OIHW", "NCHW"))
    out = out + db.reshape(1, c, 1, 1)
    out = jax.lax.conv_general_dilated(
        out, pw, window_strides=(1, 1), padding=[(0, 0), (0, 0)],
        dimension_numbers=("NCHW", "OIHW", "NCHW"))
    return out + pb.reshape(1, c, 1, 1)


def _make_inputs(key, n, c, h, w):
    kx, k1, k2, k3, k4 = jax.random.split(key, 5)
    x = jax.random.normal(kx, (n, c, h, w), dtype=jnp.float32)
    dw = jax.random.normal(k1, (c, 1, 3, 3), dtype=jnp.float32) * 0.1
    db = jax.random.normal(k2, (c,), dtype=jnp.float32) * 0.1
    pw = jax.random.normal(k3, (c, c, 1, 1), dtype=jnp.float32) * 0.05
    pb = jax.random.normal(k4, (c,), dtype=jnp.float32) * 0.1
    return x, dw, db, pw, pb


if __name__ == "__main__":
    key = jax.random.PRNGKey(0)
    ka, kb = jax.random.split(key)

    # Tolerance: bf16 input / bf16 depthwise on the VPU and a bf16 MXU pointwise (f32 acc).
    TOL = dict(atol=1e-2, rtol=1e-2)

    # Config 1: module defaults (dilation=1, padding=0); 34x34 -> 32x32, whole-image bands.
    x, dw, db, pw, pb = _make_inputs(ka, 2, 128, 34, 34)
    fn1 = jax.jit(functools.partial(separable_conv2d, dilation=1, padding=0))
    out1 = jax.block_until_ready(fn1(x, dw, db, pw, pb))
    ref1 = _reference(x, dw, db, pw, pb, dilation=1, padding=0)
    assert out1.shape == (2, 128, 32, 32), out1.shape
    assert jnp.allclose(out1, ref1, **TOL), float(jnp.max(jnp.abs(out1 - ref1)))

    # Config 2: dilation=2, padding=2 (exercises dilation / padding / crop / min-step paths).
    x, dw, db, pw, pb = _make_inputs(kb, 1, 128, 16, 16)
    fn2 = jax.jit(functools.partial(separable_conv2d, dilation=2, padding=2))
    out2 = jax.block_until_ready(fn2(x, dw, db, pw, pb))
    ref2 = _reference(x, dw, db, pw, pb, dilation=2, padding=2)
    assert out2.shape == (1, 128, 16, 16), out2.shape
    assert jnp.allclose(out2, ref2, **TOL), float(jnp.max(jnp.abs(out2 - ref2)))

    print("KERNEL_OK")
</pallas_src>

<mosaic_0001>
module attributes {stable_mosaic.version = 11 : i64} {
  func.func @_sepconv_kernel(%arg0: i32, %arg1: i32, %arg2: memref<1x34x48x128xbf16, #tpu.memory_space<vmem>>, %arg3: memref<3x3x128xf32, #tpu.memory_space<vmem>>, %arg4: memref<128x128xbf16, #tpu.memory_space<vmem>>, %arg5: memref<1x128xf32, #tpu.memory_space<vmem>>, %arg6: memref<1x32x32x128xf32, #tpu.memory_space<vmem>>) attributes {dimension_semantics = [#tpu.dimension_semantics<parallel>, #tpu.dimension_semantics<parallel>], iteration_bounds = array<i64: 2, 1>, scalar_prefetch = 0 : i64, scratch_operands = 0 : i64, tpu.core_type = #tpu.core_type<tc>, window_params = [{transform_indices = @transform_0, window_bounds = array<i64: 1, 34, 48, 128>}, {pipeline_mode = #tpu.pipeline_mode<synchronous>, transform_indices = @transform_1, window_bounds = array<i64: 3, 3, 128>}, {pipeline_mode = #tpu.pipeline_mode<synchronous>, transform_indices = @transform_2, window_bounds = array<i64: 128, 128>}, {pipeline_mode = #tpu.pipeline_mode<synchronous>, transform_indices = @transform_3, window_bounds = array<i64: 1, 128>}, {transform_indices = @transform_4, window_bounds = array<i64: 1, 32, 32, 128>}]} {
    %c32_i32 = arith.constant 32 : i32
    %0 = arith.muli %arg1, %c32_i32 : i32
    %1 = tpu.assume_multiple %0, 32 : i32
    %c0 = arith.constant 0 : index
    %2 = arith.index_cast %1 : i32 to index
    %c0_0 = arith.constant 0 : index
    %c0_1 = arith.constant 0 : index
    %3 = vector.load %arg2[%c0, %2, %c0_0, %c0_1] : memref<1x34x48x128xbf16, #tpu.memory_space<vmem>>, vector<1x34x48x128xbf16>
    %4 = vector.shape_cast %3 : vector<1x34x48x128xbf16> to vector<34x48x128xbf16>
    %5 = arith.extf %4 : vector<34x48x128xbf16> to vector<34x48x128xf32>
    %6 = vector.shape_cast %5 : vector<34x48x128xf32> to vector<1632x128xf32>
    %c1631_i32 = arith.constant 1631 : i32
    %7 = tpu.dynamic_rotate %6 by %c1631_i32 dim 0 : vector<1632x128xf32>, i32 -> vector<1632x128xf32>
    %c1630_i32 = arith.constant 1630 : i32
    %8 = tpu.dynamic_rotate %6 by %c1630_i32 dim 0 : vector<1632x128xf32>, i32 -> vector<1632x128xf32>
    %9 = arith.truncf %6 : vector<1632x128xf32> to vector<1632x128xbf16>
    %10 = arith.truncf %7 : vector<1632x128xf32> to vector<1632x128xbf16>
    %11 = arith.truncf %8 : vector<1632x128xf32> to vector<1632x128xbf16>
    %12 = vector.extract_strided_slice %9 {offsets = [0, 0], sizes = [1536, 128], strides = [1, 1]} : vector<1632x128xbf16> to vector<1536x128xbf16>
    %c0_2 = arith.constant 0 : index
    %c0_3 = arith.constant 0 : index
    %c0_4 = arith.constant 0 : index
    %13 = vector.load %arg3[%c0_2, %c0_3, %c0_4] : memref<3x3x128xf32, #tpu.memory_space<vmem>>, vector<1x1x128xf32>
    %14 = vector.shape_cast %13 : vector<1x1x128xf32> to vector<128xf32>
    %15 = arith.truncf %14 : vector<128xf32> to vector<128xbf16>
    %16 = vector.shape_cast %15 : vector<128xbf16> to vector<1x128xbf16>
    %17 = vector.broadcast %16 : vector<1x128xbf16> to vector<1536x128xbf16>
    %18 = arith.mulf %12, %17 : vector<1536x128xbf16>
    %19 = vector.extract_strided_slice %10 {offsets = [0, 0], sizes = [1536, 128], strides = [1, 1]} : vector<1632x128xbf16> to vector<1536x128xbf16>
    %c0_5 = arith.constant 0 : index
    %c1 = arith.constant 1 : index
    %c0_6 = arith.constant 0 : index
    %20 = vector.load %arg3[%c0_5, %c1, %c0_6] : memref<3x3x128xf32, #tpu.memory_space<vmem>>, vector<1x1x128xf32>
    %21 = vector.shape_cast %20 : vector<1x1x128xf32> to vector<128xf32>
    %22 = arith.truncf %21 : vector<128xf32> to vector<128xbf16>
    %23 = vector.shape_cast %22 : vector<128xbf16> to vector<1x128xbf16>
    %24 = vector.broadcast %23 : vector<1x128xbf16> to vector<1536x128xbf16>
    %25 = arith.mulf %19, %24 : vector<1536x128xbf16>
    %26 = arith.addf %18, %25 : vector<1536x128xbf16>
    %27 = vector.extract_strided_slice %11 {offsets = [0, 0], sizes = [1536, 128], strides = [1, 1]} : vector<1632x128xbf16> to vector<1536x128xbf16>
    %c0_7 = arith.constant 0 : index
    %c2 = arith.constant 2 : index
    %c0_8 = arith.constant 0 : index
    %28 = vector.load %arg3[%c0_7, %c2, %c0_8] : memref<3x3x128xf32, #tpu.memory_space<vmem>>, vector<1x1x128xf32>
    %29 = vector.shape_cast %28 : vector<1x1x128xf32> to vector<128xf32>
    %30 = arith.truncf %29 : vector<128xf32> to vector<128xbf16>
    %31 = vector.shape_cast %30 : vector<128xbf16> to vector<1x128xbf16>
    %32 = vector.broadcast %31 : vector<1x128xbf16> to vector<1536x128xbf16>
    %33 = arith.mulf %27, %32 : vector<1536x128xbf16>
    %34 = arith.addf %26, %33 : vector<1536x128xbf16>
    %35 = vector.extract_strided_slice %9 {offsets = [48, 0], sizes = [1536, 128], strides = [1, 1]} : vector<1632x128xbf16> to vector<1536x128xbf16>
    %c1_9 = arith.constant 1 : index
    %c0_10 = arith.constant 0 : index
    %c0_11 = arith.constant 0 : index
    %36 = vector.load %arg3[%c1_9, %c0_10, %c0_11] : memref<3x3x128xf32, #tpu.memory_space<vmem>>, vector<1x1x128xf32>
    %37 = vector.shape_cast %36 : vector<1x1x128xf32> to vector<128xf32>
    %38 = arith.truncf %37 : vector<128xf32> to vector<128xbf16>
    %39 = vector.shape_cast %38 : vector<128xbf16> to vector<1x128xbf16>
    %40 = vector.broadcast %39 : vector<1x128xbf16> to vector<1536x128xbf16>
    %41 = arith.mulf %35, %40 : vector<1536x128xbf16>
    %42 = arith.addf %34, %41 : vector<1536x128xbf16>
    %43 = vector.extract_strided_slice %10 {offsets = [48, 0], sizes = [1536, 128], strides = [1, 1]} : vector<1632x128xbf16> to vector<1536x128xbf16>
    %c1_12 = arith.constant 1 : index
    %c1_13 = arith.constant 1 : index
    %c0_14 = arith.constant 0 : index
    %44 = vector.load %arg3[%c1_12, %c1_13, %c0_14] : memref<3x3x128xf32, #tpu.memory_space<vmem>>, vector<1x1x128xf32>
    %45 = vector.shape_cast %44 : vector<1x1x128xf32> to vector<128xf32>
    %46 = arith.truncf %45 : vector<128xf32> to vector<128xbf16>
    %47 = vector.shape_cast %46 : vector<128xbf16> to vector<1x128xbf16>
    %48 = vector.broadcast %47 : vector<1x128xbf16> to vector<1536x128xbf16>
    %49 = arith.mulf %43, %48 : vector<1536x128xbf16>
    %50 = arith.addf %42, %49 : vector<1536x128xbf16>
    %51 = vector.extract_strided_slice %11 {offsets = [48, 0], sizes = [1536, 128], strides = [1, 1]} : vector<1632x128xbf16> to vector<1536x128xbf16>
    %c1_15 = arith.constant 1 : index
    %c2_16 = arith.constant 2 : index
    %c0_17 = arith.constant 0 : index
    %52 = vector.load %arg3[%c1_15, %c2_16, %c0_17] : memref<3x3x128xf32, #tpu.memory_space<vmem>>, vector<1x1x128xf32>
    %53 = vector.shape_cast %52 : vector<1x1x128xf32> to vector<128xf32>
    %54 = arith.truncf %53 : vector<128xf32> to vector<128xbf16>
    %55 = vector.shape_cast %54 : vector<128xbf16> to vector<1x128xbf16>
    %56 = vector.broadcast %55 : vector<1x128xbf16> to vector<1536x128xbf16>
    %57 = arith.mulf %51, %56 : vector<1536x128xbf16>
    %58 = arith.addf %50, %57 : vector<1536x128xbf16>
    %59 = vector.extract_strided_slice %9 {offsets = [96, 0], sizes = [1536, 128], strides = [1, 1]} : vector<1632x128xbf16> to vector<1536x128xbf16>
    %c2_18 = arith.constant 2 : index
    %c0_19 = arith.constant 0 : index
    %c0_20 = arith.constant 0 : index
    %60 = vector.load %arg3[%c2_18, %c0_19, %c0_20] : memref<3x3x128xf32, #tpu.memory_space<vmem>>, vector<1x1x128xf32>
    %61 = vector.shape_cast %60 : vector<1x1x128xf32> to vector<128xf32>
    %62 = arith.truncf %61 : vector<128xf32> to vector<128xbf16>
    %63 = vector.shape_cast %62 : vector<128xbf16> to vector<1x128xbf16>
    %64 = vector.broadcast %63 : vector<1x128xbf16> to vector<1536x128xbf16>
    %65 = arith.mulf %59, %64 : vector<1536x128xbf16>
    %66 = arith.addf %58, %65 : vector<1536x128xbf16>
    %67 = vector.extract_strided_slice %10 {offsets = [96, 0], sizes = [1536, 128], strides = [1, 1]} : vector<1632x128xbf16> to vector<1536x128xbf16>
    %c2_21 = arith.constant 2 : index
    %c1_22 = arith.constant 1 : index
    %c0_23 = arith.constant 0 : index
    %68 = vector.load %arg3[%c2_21, %c1_22, %c0_23] : memref<3x3x128xf32, #tpu.memory_space<vmem>>, vector<1x1x128xf32>
    %69 = vector.shape_cast %68 : vector<1x1x128xf32> to vector<128xf32>
    %70 = arith.truncf %69 : vector<128xf32> to vector<128xbf16>
    %71 = vector.shape_cast %70 : vector<128xbf16> to vector<1x128xbf16>
    %72 = vector.broadcast %71 : vector<1x128xbf16> to vector<1536x128xbf16>
    %73 = arith.mulf %67, %72 : vector<1536x128xbf16>
    %74 = arith.addf %66, %73 : vector<1536x128xbf16>
    %75 = vector.extract_strided_slice %11 {offsets = [96, 0], sizes = [1536, 128], strides = [1, 1]} : vector<1632x128xbf16> to vector<1536x128xbf16>
    %c2_24 = arith.constant 2 : index
    %c2_25 = arith.constant 2 : index
    %c0_26 = arith.constant 0 : index
    %76 = vector.load %arg3[%c2_24, %c2_25, %c0_26] : memref<3x3x128xf32, #tpu.memory_space<vmem>>, vector<1x1x128xf32>
    %77 = vector.shape_cast %76 : vector<1x1x128xf32> to vector<128xf32>
    %78 = arith.truncf %77 : vector<128xf32> to vector<128xbf16>
    %79 = vector.shape_cast %78 : vector<128xbf16> to vector<1x128xbf16>
    %80 = vector.broadcast %79 : vector<1x128xbf16> to vector<1536x128xbf16>
    %81 = arith.mulf %75, %80 : vector<1536x128xbf16>
    %82 = arith.addf %74, %81 : vector<1536x128xbf16>
    %83 = vector.shape_cast %82 : vector<1536x128xbf16> to vector<32x48x128xbf16>
    %84 = vector.extract_strided_slice %83 {offsets = [0, 0, 0], sizes = [32, 32, 128], strides = [1, 1, 1]} : vector<32x48x128xbf16> to vector<32x32x128xbf16>
    %85 = vector.shape_cast %84 : vector<32x32x128xbf16> to vector<1024x128xbf16>
    %c0_27 = arith.constant 0 : index
    %c0_28 = arith.constant 0 : index
    %86 = vector.load %arg4[%c0_27, %c0_28] : memref<128x128xbf16, #tpu.memory_space<vmem>>, vector<128x128xbf16>
    %cst = arith.constant dense<0.000000e+00> : vector<1024x128xf32>
    %87 = tpu.matmul %85, %86, %cst {dimension_numbers = #tpu.dot_dimension_numbers<[1], [0], [0], [1], [0, 0, 1, 1], [], []>} : vector<1024x128xbf16>, vector<128x128xbf16>, vector<1024x128xf32> -> vector<1024x128xf32>
    %c0_29 = arith.constant 0 : index
    %c0_30 = arith.constant 0 : index
    %88 = vector.load %arg5[%c0_29, %c0_30] : memref<1x128xf32, #tpu.memory_space<vmem>>, vector<1x128xf32>
    %89 = vector.shape_cast %88 : vector<1x128xf32> to vector<128xf32>
    %90 = vector.shape_cast %89 : vector<128xf32> to vector<1x128xf32>
    %91 = vector.broadcast %90 : vector<1x128xf32> to vector<1024x128xf32>
    %92 = arith.addf %87, %91 : vector<1024x128xf32>
    %93 = vector.shape_cast %92 : vector<1024x128xf32> to vector<32x32x128xf32>
    %c0_31 = arith.constant 0 : index
    %c0_32 = arith.constant 0 : index
    %c0_33 = arith.constant 0 : index
    %c0_34 = arith.constant 0 : index
    %94 = vector.load %arg6[%c0_31, %c0_32, %c0_33, %c0_34] : memref<1x32x32x128xf32, #tpu.memory_space<vmem>>, vector<1x32x32x128xf32>
    %95 = vector.shape_cast %94 : vector<1x32x32x128xf32> to vector<32x32x128xf32>
    %96 = vector.shape_cast %93 : vector<32x32x128xf32> to vector<1x32x32x128xf32>
    tpu.vector_store %arg6[%c0_31, %c0_32, %c0_33, %c0_34], %96 {strides = array<i32>} : memref<1x32x32x128xf32, #tpu.memory_space<vmem>>, vector<1x32x32x128xf32>,
    return
  }
  func.func @transform_0(%arg0: i32, %arg1: i32) -> (i32, i32, i32, i32) {
    %c0_i32 = arith.constant 0 : i32
    %c0_i32_0 = arith.constant 0 : i32
    %c0_i32_1 = arith.constant 0 : i32
    %c0_i32_2 = arith.constant 0 : i32
    return %arg0, %c0_i32, %c0_i32_0, %c0_i32_1 : i32, i32, i32, i32
  }
  func.func @transform_1(%arg0: i32, %arg1: i32) -> (i32, i32, i32) {
    %c0_i32 = arith.constant 0 : i32
    %c0_i32_0 = arith.constant 0 : i32
    %c0_i32_1 = arith.constant 0 : i32
    %c0_i32_2 = arith.constant 0 : i32
    return %c0_i32, %c0_i32_0, %c0_i32_1 : i32, i32, i32
  }
  func.func @transform_2(%arg0: i32, %arg1: i32) -> (i32, i32) {
    %c0_i32 = arith.constant 0 : i32
    %c0_i32_0 = arith.constant 0 : i32
    %c0_i32_1 = arith.constant 0 : i32
    return %c0_i32, %c0_i32_0 : i32, i32
  }
  func.func @transform_3(%arg0: i32, %arg1: i32) -> (i32, i32) {
    %c0_i32 = arith.constant 0 : i32
    %c0_i32_0 = arith.constant 0 : i32
    %c0_i32_1 = arith.constant 0 : i32
    return %c0_i32, %c0_i32_0 : i32, i32
  }
  func.func @transform_4(%arg0: i32, %arg1: i32) -> (i32, i32, i32, i32) {
    %c0_i32 = arith.constant 0 : i32
    %c0_i32_0 = arith.constant 0 : i32
    %c0_i32_1 = arith.constant 0 : i32
    return %arg0, %arg1, %c0_i32, %c0_i32_0 : i32, i32, i32, i32
  }
}

</mosaic_0001>

<bundles_post_ra>
// kernel: separable_conv2d.1
= control target key start
LH: loop header
LB: loop body
LE: loop exit
PB: predicated region body
PF: predicated region fallthrough
CT: control target
= control target key end

     0   :  { %9 = vsyncpa [#allocation3], 0  ;;  %s8246_s0 = inlined_call_operand.hbm [shape: bf16[2,34,48,128], index: 0, kind: input, shape index: {}]   ;;  %s8247_s1 = inlined_call_operand.hbm [shape: f32[3,3,128], index: 1, kind: input, shape index: {}]   ;;  %s8248_s2 = inlined_call_operand.hbm [shape: bf16[128,128], index: 2, kind: input, shape index: {}]   ;;  %s8249_s3 = inlined_call_operand.hbm [shape: f32[1,128], index: 3, kind: input, shape index: {}]   ;;  %s8250_s4 = inlined_call_operand.hbm [shape: f32[2,32,32,128], index: 4, kind: output, shape index: {}]  }
   0x1   :  { %11 = vsyncpa [#allocation3 + $0x1], 0 }
   0x2   :  { %12 = vsyncpa [#allocation6], 0 }
   0x3   :  { %13 = vsyncpa [#allocation9], 0 }
   0x4   :  { %14 = vsyncpa [#allocation4], 0 }
   0x5   :  { %16 = vsyncpa [#allocation4 + $0x1], 0  ;;  %s4297_s15 = smov 0   ;;  %s4299_s16 = smov 0  }
   0x6   :  { %s4301_s17 = smov 0   ;;  %s4303_s18 = smov 0  }
   0x7   :  { %s4305_s19 = smov 0   ;;  %s4307_s20 = smov 0  }
   0x8 LB: > { %s3485_s21 = sadd.s32 4294967295, %s4261_s20   ;;  %s3486_s22 = sadd.s32 4294967294, %s4261_s20   ;;  %s4261_s20 = sphi %s4307_s20, %s22_s20   ;;  %s4257_s19 = sphi %s4305_s19, %s8611_s19   ;;  %s4253_s18 = sphi %s4303_s18, %s8610_s18   ;;  %s4249_s17 = sphi %s4301_s17, %s8609_s17   ;;  %s4245_s16 = sphi %s4299_s16, %s8608_s16   ;;  %s4241_s15 = sphi %s4297_s15, %s8607_s15  }
   0x9   : > { %p54_p0 = scmp.ne.s32.totalorder %s4245_s16, %s4241_s15  ;;  %p4331_p1 = scmp.eq.s32.totalorder %s3485_s21, 0 }
   0xa   : > { %p4335_p2 = scmp.eq.s32.totalorder %s3485_s21, 1  ;;  %p149_p3 = scmp.eq.s32.totalorder %s3486_s22, 1 }
   0xb   : > { %s8275_s23 = scalar_select %p4331_p1, 1, 0 }
   0xc   : > { %s8276_s24 = scalar_select %p4335_p2, 1, 0 }
   0xd   : > { %p4341_p4 = por %p4331_p1, %p54_p0  ;;  %p3487_p5 = scmp.ge.s32.totalorder %s4261_s20, 1 }
   0xe   : > { %p4346_p6 = por %p149_p3, %p54_p0  ;;  %p156_p7 = scmp.lt.s32.totalorder %s4261_s20, 3 }
   0xf   : > { %s8277_s25 = scalar_select %p4341_p4, 1, 0 }
  0x10   : > { %s8278_s26 = scalar_select %p4346_p6, 1, 0 }
  0x11   : > { %p4351_p8 = pnand %p3487_p5, %p156_p7  ;;  %s4263_s28 = smov [#allocation5]  }
  0x12   : > { %8279 = sst [smem:[#allocation15_spill]] %s8278_s26  ;;  %s168_s29 = sshll.u32 %s4263_s28, 4  ;;  %s4355_s29 = int_to_ptr.vmem [resolvable:$true] %s168_s29 }
  0x13   : > { %s8280_s27 = scalar_select %p4351_p8, 1, 0 }
  0x14   : > { %p3832_p9 = pneg %p4351_p8  ;;  %s4264_s5 = smov [#allocation7]  }
  0x15   : > { %s181_s6 = sshll.u32 %s4264_s5, 4  ;;  %s4265_s7 = smov [#allocation8]   ;;  %s4366_s6 = int_to_ptr.vmem [resolvable:$true] %s181_s6 }
  0x16   : > { %p4362_p11 = pnand %p3832_p9, %p4331_p1  ;;  %s4368_s8 = sshll.u32 %s4265_s7, 4  ;;  %s196_s8 = int_to_ptr.vmem [resolvable:$true] %s4368_s8 }
  0x17   : > { %s4057_s11 = scalar_lea.hbm %s8247_s1, 192 }
  0x18   : > { %p4058_p12 = scmp.ne.s32.totalorder %s8247_s1, %s4057_s11  ;;  %p4378_p13 = pneg %p4362_p11 }
  0x19   : > { %p4064_p5 = scmp.lt.u32.totalorder %s4057_s11, %s8247_s1 }
  0x1a   : > { %p4060_p0 = pnand %p4378_p13, %p4058_p12 }
  0x1c   : > { %p4061_p3 = pneg %p4060_p0 }
  0x1e   : > { %p4066_p7 = pnand %p4064_p5, %p4061_p3 }
  0x20   : > { %4069 = shalt.err (!%p4066_p7)
}
  0x21   : > { %s4070_s28 = scalar_lea.vmem %s4355_s29, 192  ;;  %p4078_p1 = scmp.lt.s32.totalorder %s4355_s29, %s4355_s29 }
  0x22   : > { %p4071_p9 = scmp.ne.s32.totalorder %s4355_s29, %s4070_s28  ;;  %p4079_p4 = scmp.lt.s32.totalorder %s4070_s28, %s4070_s28 }
  0x24   : > { %p4073_p10 = pnand %p4071_p9, %p4378_p13  ;;  %p4080_p12 = por %p4079_p4, %p4078_p1 }
  0x26   : > { %p4074_p6 = pneg %p4073_p10 }
  0x28   : > { %p4081_p0 = pnand %p4080_p12, %p4074_p6 }
  0x2a   : > { %4084 = shalt.err (!%p4081_p0)
}
  0x2b   : > { %s8256_s5 = smov 64   ;;  %s4267_s7 = smov 4  }
  0x2c   : > { %3835 = dma.hbm_to_vmem [thread:$0]  (!%p4362_p11), %s8247_s1, 192, %s4355_s29, [#allocation6], %s8256_s5, %s8256_s5, %s4267_s7  }
  0x2d   : > { %s4085_s13 = scalar_lea.hbm %s8248_s2, 1024 }
  0x2e   : > { %p4086_p1 = scmp.ne.s32.totalorder %s8248_s2, %s4085_s13  ;;  %p4092_p10 = scmp.lt.u32.totalorder %s4085_s13, %s8248_s2 }
  0x30   : > { %p4088_p4 = pnand %p4086_p1, %p4378_p13 }
  0x32   : > { %p4089_p6 = pneg %p4088_p4 }
  0x34   : > { %p4094_p3 = pnand %p4092_p10, %p4089_p6 }
  0x36   : > { %4097 = shalt.err (!%p4094_p3)
}
  0x37   : > { %s4098_s29 = scalar_lea.vmem %s4366_s6, 1024  ;;  %p4106_p12 = scmp.lt.s32.totalorder %s4366_s6, %s4366_s6 }
  0x38   : > { %p4099_p5 = scmp.ne.s32.totalorder %s4366_s6, %s4098_s29  ;;  %p4107_p0 = scmp.lt.s32.totalorder %s4098_s29, %s4098_s29 }
  0x3a   : > { %p4101_p7 = pnand %p4099_p5, %p4378_p13  ;;  %p4108_p1 = por %p4107_p0, %p4106_p12 }
  0x3c   : > { %p4102_p9 = pneg %p4101_p7 }
  0x3e   : > { %p4109_p4 = pnand %p4108_p1, %p4102_p9 }
  0x40   : > { %4112 = shalt.err (!%p4109_p4)
}
  0x41   : > { %3838 = dma.hbm_to_vmem [thread:$0]  (!%p4362_p11), %s8248_s2, 1024, %s4366_s6, [#allocation6], %s8256_s5, %s8256_s5, %s4267_s7  }
  0x42   : > { %s4113_s12 = scalar_lea.hbm %s8249_s3, 16 }
  0x43   : > { %p4114_p6 = scmp.ne.s32.totalorder %s8249_s3, %s4113_s12  ;;  %p4120_p5 = scmp.lt.u32.totalorder %s4113_s12, %s8249_s3 }
  0x45   : > { %p4116_p10 = pnand %p4114_p6, %p4378_p13 }
  0x47   : > { %p4117_p3 = pneg %p4116_p10 }
  0x49   : > { %p4122_p7 = pnand %p4120_p5, %p4117_p3 }
  0x4b   : > { %4125 = shalt.err (!%p4122_p7)
}
  0x4c   : > { %s4126_s29 = scalar_lea.vmem %s196_s8, 16  ;;  %s4133_s6 = scalar_lea.vmem %s196_s8, 32 }
  0x4d   : > { %p4127_p9 = scmp.ne.s32.totalorder %s196_s8, %s4126_s29  ;;  %p4134_p1 = scmp.lt.s32.totalorder %s196_s8, %s196_s8 }
  0x4e   : > { %p4135_p4 = scmp.lt.s32.totalorder %s4133_s6, %s4126_s29 }
  0x4f   : > { %p4129_p12 = pnand %p4127_p9, %p4378_p13 }
  0x50   : > { %p4136_p8 = por %p4135_p4, %p4134_p1 }
  0x51   : > { %p4130_p0 = pneg %p4129_p12 }
  0x53   : > { %p4137_p2 = pnand %p4136_p8, %p4130_p0 }
  0x55   : > { %4140 = shalt.err (!%p4137_p2)
}
  0x56   : > { %3841 = dma.hbm_to_vmem [thread:$0]  (!%p4362_p11), %s8249_s3, 16, %s196_s8, [#allocation9]  }
  0x57   : > { %s41_s14 = sadd.s32 1, %s4249_s17  ;;  %s34_s10 = sadd.s32 1, %s4257_s19 }
  0x58   : > { %p48_p2 = scmp.ne.s32.totalorder %s4249_s17, %s4245_s16  ;;  %p36_p8 = scmp.ge.s32.totalorder %s34_s10, 2 }
  0x59   : > { %p49_p13 = scmp.eq.s32.totalorder %s4261_s20, 0  ;;  %p8283_p6 = scmp.ne.s32.totalorder %s8276_s24, 0 }
  0x5a   : > { %p3853_p3 = scmp.lt.s32.totalorder %s4261_s20, 2  ;;  %s8613_s10 = smov (%p36_p8, %s34_s10), 0 }
  0x5b   : > { %p4454_p10 = por %p8283_p6, %p48_p2  ;;  %p50_p5 = por %p49_p13, %p48_p2 }
  0x5c   : > { %s206_s11 = sand.u32 1, %s4249_s17   ;;  %s38_s12 = ssub.s32 %s4257_s19, %s8613_s10 }
  0x5d   : > { %p39_p7 = scmp.eq.s32.totalorder %s38_s12, 0  ;;  %s3813_s8 = smul.u32 816, %s206_s11 }
  0x5e   : > { %s3814_s13 = smul.u32 13056, %s4257_s19  ;;  %p4465_p11 = pnand %p3853_p3, %p50_p5 }
  0x5f   : > { %s4470_s24 = scalar_select %p39_p7, %s4249_s17, %s41_s14  }
  0x60   : > { %s4475_s29 = scalar_lea.hbm %s8246_s0, %s3814_s13  ;;  %s210_s6 = scalar_lea.vmem [#allocation2], %s3813_s8 }
  0x61   : > { %s217_s26 = sshll.u32 %s210_s6, 4  ;;  %s4479_s9 = scalar_lea.sflag [#allocation3], %s206_s11  ;;  %s4477_s26 = int_to_ptr.vmem [resolvable:$true] %s217_s26 }
  0x62   : > { %s4141_s12 = scalar_lea.hbm %s4475_s29, 13056  ;;  %p4143_p12 = pneg %p4465_p11 }
  0x63   : > { %p4142_p9 = scmp.ne.s32.totalorder %s4475_s29, %s4141_s12  ;;  %s4146_s22 = scalar_lea.hbm %s8246_s0, 26112 }
  0x64   : > { %p4147_p4 = scmp.lt.u32.totalorder %s4475_s29, %s8246_s0  ;;  %p4148_p2 = scmp.lt.u32.totalorder %s4146_s22, %s4141_s12 }
  0x65   : > { %p4144_p0 = pnand %p4143_p12, %p4142_p9  ;;  %p4150_p13 = scmp.lt.u32.totalorder %s4141_s12, %s4475_s29 }
  0x66   : > { %p4149_p8 = por %p4148_p2, %p4147_p4 }
  0x67   : > { %p4145_p1 = pneg %p4144_p0 }
  0x68   : > { %p4151_p6 = por %p4150_p13, %p4149_p8 }
  0x6a   : > { %p4152_p3 = pnand %p4151_p6, %p4145_p1 }
  0x6c   : > { %4155 = shalt.err (!%p4152_p3)
}
  0x6d   : > { %s4156_s11 = scalar_lea.vmem %s4477_s26, 13056  ;;  %s4268_s8 = smov [#allocation2]  }
  0x6e   : > { %p4157_p5 = scmp.ne.s32.totalorder %s4477_s26, %s4156_s11  ;;  %s4161_s6 = sshll.u32 %s4268_s8, 4  ;;  %s4162_s6 = int_to_ptr.vmem [resolvable:$false] %s4161_s6 }
  0x6f   : > { %s4163_s5 = scalar_lea.vmem %s4162_s6, 26112  ;;  %p4164_p0 = scmp.lt.s32.totalorder %s4477_s26, %s4162_s6 }
  0x70   : > { %p4159_p7 = pnand %p4157_p5, %p4143_p12  ;;  %p4165_p4 = scmp.lt.s32.totalorder %s4163_s5, %s4156_s11 }
  0x72   : > { %p4160_p9 = pneg %p4159_p7  ;;  %p4166_p2 = por %p4165_p4, %p4164_p0 }
  0x74   : > { %p4167_p8 = pnand %p4166_p2, %p4160_p9 }
  0x76   : > { %4170 = shalt.err (!%p4167_p8)
}
  0x77   : > { %s8286_s12 = smov 64   ;;  %p8287_p12 = scmp.ne.s32.totalorder %s8280_s27, 0 }
  0x78   : > { %3845 = dma.hbm_to_vmem [thread:$0]  (!%p4465_p11), %s4475_s29, 13056, %s4477_s26, %s4479_s9, %s8286_s12, %s8286_s12, %s4267_s7  }
  0x79   : > { %229 = sbr.rel (%p8287_p12) target bundleno = 913 (0x391), region = 36 }
  0x80   : > { %s4513_s14 = sand.u32 1, %s4245_s16   ;;  %p8288_p1 = scmp.ne.s32.totalorder %s8277_s25, 0 }
  0x81   : > { %s3815_s13 = smul.u32 816, %s4513_s14  ;;  %s232_s22 = scalar_lea.sflag [#allocation3], %s4513_s14 }
  0x83   : > { %s4517_s28 = scalar_lea.vmem [#allocation2], %s3815_s13 }
  0x84   : > { %4224 = dma.done.wait (%p8288_p1), %s232_s22, 13056  }
  0x85   : > { %4226 = vsyncadd (%p8288_p1), %s232_s22, 4294954240  ;;  %p8289_p11 = scmp.ne.s32.totalorder %s8275_s23, 0 }
  0x87   : > { %4228 = dma.done.wait (%p8289_p11), [#allocation6], 1216  }
  0x88   : > { %4230 = vsyncadd (%p8289_p11), [#allocation6], 4294966080 }
  0x89   : > { %4232 = dma.done.wait (%p8289_p11), [#allocation9], 16  }
  0x8a   : > { %4234 = vsyncadd (%p8289_p11), [#allocation9], 4294967280  ;;  %v3913_v0 = vld [vmem:[#allocation7] sm:$0xff]   ;;  %v788_v1 = vlaneseq  ;;  %v3914_v2 = vld [vmem:[#allocation7 + $0x8] sm:$0xff]   ;;  %s3497_s23 = sshll.u32 %s4513_s14, 10  ;;  %s3580_s27 = sshll.u32 %s4253_s18, 14 }
  0x8b   : > { %3653 = vmatprep.subr.bf16.mxu0 %v3913_v0  ;;  %3797 = vmatprep.subr.bf16.mxu1 %v3913_v0  ;;  %v3915_v3 = vld [vmem:[#allocation7 + $0x10] sm:$0xff]   ;;  %v3916_v5 = vld [vmem:[#allocation7 + $0x18] sm:$0xff]   ;;  %v3917_v25 = vld [vmem:[#allocation7 + $0x20] sm:$0xff]   ;;  %s7855_s25 = scalar_lea.vmem [#allocation10], %s3497_s23  ;;  %s8191_s18 = scalar_lea.hbm %s8250_s4, %s3580_s27 }
  0x8c   : > { %3654 = vmatpush3.bf16.msra.mxu0 %v3913_v0  ;;  %3805 = vmatpush3.bf16.msra.mxu1 %v3913_v0  ;;  %v4531_v4 = vshrl.u32 %v788_v1, 7  ;;  %v4534_v6 = vld [vmem:[%s4517_s28] sm:$0xff]   ;;  %v4537_v7 = vld [vmem:[%s4517_s28 + $0x8] sm:$0xff]   ;;  %v4540_v8 = vld [vmem:[%s4517_s28 + $0x18] sm:$0xff]   ;;  %s3370_s7 = sshll.u32 %s7855_s25, 4  ;;  %s3354_s26 = scalar_lea.sflag [#allocation4], %s4513_s14  ;;  %s8193_s7 = int_to_ptr.vmem [resolvable:$true] %s3370_s7 }
  0x8d   : > { %3655 = vmatprep.subr.bf16.mxu0 %v3914_v2  ;;  %3798 = vmatprep.subr.bf16.mxu1 %v3914_v2  ;;  %v4548_v10 = vld [vmem:[%s4517_s28 + $0x20] sm:$0xff]   ;;  %v4551_v11 = vld [vmem:[%s4517_s28 + $0x30] sm:$0xff]   ;;  %v4554_v12 = vld [vmem:[%s4517_s28 + $0x38] sm:$0xff]   ;;  %v448_v13 = vunpack.c.l.bf16 %v4534_v6  ;;  %v449_v14 = vunpack.c.h.bf16 %v4534_v6  ;;  %v450_v15 = vunpack.c.l.bf16 %v4537_v7  ;;  %v453_v16 = vunpack.c.l.bf16 %v4540_v8  ;;  %s4171_s9 = scalar_lea.vmem %s8193_s7, 16384  ;;  %s4269_s11 = smov [#allocation10]  }
  0x8e   : > { %vm790_vm0 = vcmp.lt.s32.totalorder %v4531_v4, 7  ;;  %vm1097_vm1 = vcmp.lt.s32.totalorder %v4531_v4, 6  ;;  %v4545_v9 = vsub.s32 0, %v4531_v4  ;;  %v454_v17 = vunpack.c.h.bf16 %v4540_v8  ;;  %v3918_v42 = vld [vmem:[#allocation7 + $0x28] sm:$0xff]   ;;  %v1438_v50 = vld [vmem:[#allocation5] sm:$0x1]  ;;  %p4172_p13 = scmp.ne.s32.totalorder %s8193_s7, %s4171_s9 }
  0x8f   : > { %v455_v18 = vunpack.c.l.bf16 %v4548_v10  ;;  %v458_v19 = vunpack.c.l.bf16 %v4551_v11  ;;  %v459_v20 = vunpack.c.h.bf16 %v4551_v11  ;;  %v460_v21 = vunpack.c.l.bf16 %v4554_v12  ;;  %v4606_v51 = vld [vmem:[%s4517_s28 + $0x180] sm:$0xff]   ;;  %v2198_v63 = vld [vmem:[#allocation5 + $0x8] sm:$0x1]  ;;  %s4175_s8 = sshll.u32 %s4269_s11, 4  ;;  %s4176_s8 = int_to_ptr.vmem [resolvable:$false] %s4175_s8 }
  0x90   : > { %3656 = vmatpush3.bf16.msra.mxu0 %v3914_v2  ;;  %3806 = vmatpush3.bf16.msra.mxu1 %v3914_v2  ;;  %v618_v22 = vrot.slane %v448_v13, 1  ;;  %v619_v23 = vrot.slane %v449_v14, 1  ;;  %v4565_v24 = vrot.slane %v450_v15, 1  ;;  %v623_v26 = vrot.slane %v453_v16, 1  ;;  %8290 = vst [vmem:[#allocation16_spill] sm:$0xff] %v4606_v51  ;;  %v3919_v0 = vld [vmem:[#allocation7 + $0x30] sm:$0xff]   ;;  %p4173_p6 = pnand %p4172_p13, %p4454_p10  ;;  %p4178_p5 = scmp.lt.s32.totalorder %s8193_s7, %s4176_s8 }
  0x91   : > { %3657 = vmatprep.subr.bf16.mxu0 %v3915_v3  ;;  %3799 = vmatprep.subr.bf16.mxu1 %v3915_v3  ;;  %v624_v27 = vrot.slane %v454_v17, 1  ;;  %v4567_v28 = vrot.slane %v455_v18, 1  ;;  %v628_v29 = vrot.slane %v458_v19, 1  ;;  %v629_v30 = vrot.slane %v459_v20, 1  ;;  %v1511_v55 = vld [vmem:[#allocation5 + $0x1] sm:$0x1] }
  0x92   : > { %v4569_v31 = vrot.slane %v460_v21, 1  ;;  %v4574_v32 = vsel %vm790_vm0, %v619_v23, %v4565_v24  ;;  %v4578_v33 = vsel %vm790_vm0, %v618_v22, %v619_v23  ;;  %v927_v36 = vrot.slane %v448_v13, 2  ;;  %v1648_v56 = vld [vmem:[#allocation5 + $0x2] sm:$0x1]  ;;  %v1786_v57 = vld [vmem:[#allocation5 + $0x4] sm:$0x1]  ;;  %p4174_p3 = pneg %p4173_p6 }
  0x93   : > { %v921_v34 = vsel %vm790_vm0, %v624_v27, %v4567_v28  ;;  %v922_v35 = vsel %vm790_vm0, %v623_v26, %v624_v27  ;;  %v928_v37 = vrot.slane %v449_v14, 2  ;;  %v918_v39 = vsel %vm790_vm0, %v628_v29, %v629_v30  ;;  %v1923_v61 = vld [vmem:[#allocation5 + $0x5] sm:$0x1]  ;;  %v2060_v62 = vld [vmem:[#allocation5 + $0x6] sm:$0x1]  ;;  %s4177_s6 = scalar_lea.vmem %s4176_s8, 32768 }
  0x94   : > { %3658 = vmatpush3.bf16.msra.mxu0 %v3915_v3  ;;  %3807 = vmatpush3.bf16.msra.mxu1 %v3915_v3  ;;  %v917_v38 = vsel %vm790_vm0, %v629_v30, %v4569_v31  ;;  %v4590_v40 = vrot.slane %v450_v15, 2  ;;  %v932_v41 = vrot.slane %v453_v16, 2  ;;  %v933_v43 = vrot.slane %v454_v17, 2  ;;  %v4632_v17 = vld [vmem:[%s4517_s28 + $0x188] sm:$0xff]   ;;  %p4179_p7 = scmp.lt.s32.totalorder %s4177_s6, %s4171_s9 }
  0x95   : > { %3659 = vmatprep.subr.bf16.mxu0 %v3916_v5  ;;  %3800 = vmatprep.subr.bf16.mxu1 %v3916_v5  ;;  %v4592_v44 = vrot.slane %v455_v18, 2  ;;  %v937_v45 = vrot.slane %v458_v19, 2  ;;  %v938_v46 = vrot.slane %v459_v20, 2  ;;  %v4594_v47 = vrot.slane %v460_v21, 2  ;;  %v2335_v26 = vld [vmem:[#allocation5 + $0x9] sm:$0x1] }
  0x96   : > { %v4599_v48 = vsel %vm1097_vm1, %v928_v37, %v4590_v40  ;;  %v4603_v49 = vsel %vm1097_vm1, %v927_v36, %v928_v37  ;;  %v1229_v54 = vsel %vm1097_vm1, %v932_v41, %v933_v43  ;;  %v1302_v59 = vpack.c.bf16 %v4574_v32, %v4578_v33  ;;  %v3920_v29 = vld [vmem:[#allocation7 + $0x38] sm:$0xff]   ;;  %p4180_p9 = por %p4179_p7, %p4178_p5 }
  0x97   : > { %v1225_v52 = vsel %vm1097_vm1, %v937_v45, %v938_v46  ;;  %v1228_v53 = vsel %vm1097_vm1, %v933_v43, %v4592_v44  ;;  %v1224_v58 = vsel %vm1097_vm1, %v938_v46, %v4594_v47  ;;  %v4620_v60 = vpack.c.bf16 %v921_v34, %v922_v35  ;;  %v4636_v34 = vld [vmem:[%s4517_s28 + $0x198] sm:$0xff]  }
  0x98   : > { %3660 = vmatpush3.bf16.msra.mxu0 %v3916_v5  ;;  %3808 = vmatpush3.bf16.msra.mxu1 %v3916_v5  ;;  %v4622_v1 = vpack.c.bf16 %v917_v38, %v918_v39  ;;  %v1370_v2 = vpack.c.bf16 %v4599_v48, %v4603_v49  ;;  %v4626_v3 = vpack.c.bf16 %v1228_v53, %v1229_v54  ;;  %v528_v5 = vunpack.c.l.bf16 %v4606_v51  ;;  %p4181_p0 = pnand %p4180_p9, %p4174_p3 }
  0x99   : > { %3661 = vmatprep.subr.bf16.mxu0 %v3917_v25  ;;  %3801 = vmatprep.subr.bf16.mxu1 %v3917_v25  ;;  %v4629_v13 = vpack.c.bf16 %v1224_v58, %v1225_v52  ;;  %v1439_v14 = vpack.c.bf16 %v1438_v50, %v1438_v50  ;;  %v1512_v15 = vpack.c.bf16 %v1511_v55, %v1511_v55  ;;  %v529_v27 = vunpack.c.h.bf16 %v4606_v51 }
  0x9a   : > { %v1649_v16 = vpack.c.bf16 %v1648_v56, %v1648_v56  ;;  %v1787_v18 = vpack.c.bf16 %v1786_v57, %v1786_v57  ;;  %v1924_v19 = vpack.c.bf16 %v1923_v61, %v1923_v61  ;;  %v2061_v20 = vpack.c.bf16 %v2060_v62, %v2060_v62  ;;  %8291 = vst [vmem:[#allocation17_spill] sm:$0xff] %v4636_v34 }
  0x9b   : > { %v2199_v21 = vpack.c.bf16 %v2198_v63, %v2198_v63  ;;  %v1441_v22 = vpack.i.b16 %v1439_v14, %v1439_v14  ;;  %v1514_v23 = vpack.i.b16 %v1512_v15, %v1512_v15  ;;  %v530_v35 = vunpack.c.l.bf16 %v4632_v17  ;;  %v2472_v14 = vld [vmem:[#allocation5 + $0xa] sm:$0x1]  ;;  %v4683_v15 = vld [vmem:[%s4517_s28 + $0x1b0] sm:$0xff]  }
  0x9c   : > { %3662 = vmatpush3.bf16.msra.mxu0 %v3917_v25  ;;  %3809 = vmatpush3.bf16.msra.mxu1 %v3917_v25  ;;  %v1651_v25 = vpack.i.b16 %v1649_v16, %v1649_v16  ;;  %v1789_v30 = vpack.i.b16 %v1787_v18, %v1787_v18  ;;  %v1926_v32 = vpack.i.b16 %v1924_v19, %v1924_v19  ;;  %v533_v50 = vunpack.c.l.bf16 %v4636_v34  ;;  %v4692_v18 = vld [vmem:[%s4517_s28 + $0x1b8] sm:$0xff]  }
  0x9d   : > { %3663 = vmatprep.subr.bf16.mxu0 %v3918_v42  ;;  %3802 = vmatprep.subr.bf16.mxu1 %v3918_v42  ;;  %v2063_v33 = vpack.i.b16 %v2061_v20, %v2061_v20  ;;  %v4640_v36 = vrot.slane %v1441_v22, %v4545_v9  ;;  %v4643_v37 = vrot.slane %v1514_v23, %v4545_v9  ;;  %v534_v55 = vunpack.c.h.bf16 %v4636_v34 }
  0x9e   : > { %v4646_v38 = vrot.slane %v1651_v25, %v4545_v9  ;;  %v2201_v39 = vpack.i.b16 %v2199_v21, %v2199_v21  ;;  %v4649_v41 = vrot.slane %v1789_v30, %v4545_v9  ;;  %v2336_v45 = vpack.c.bf16 %v2335_v26, %v2335_v26 }
  0x9f   : > { %v4655_v43 = vrot.slane %v2063_v33, %v4545_v9  ;;  %v1447_v46 = vmul.bf16 %v4640_v36, %v4534_v6  ;;  %v1449_v48 = vmul.bf16 %v4640_v36, %v4540_v8  ;;  %v1451_v49 = vmul.bf16 %v4640_v36, %v4551_v11  ;;  %v4670_v6 = vld [vmem:[%s4517_s28 + $0x1a0] sm:$0xff]  }
  0xa0   : > { %3664 = vmatpush3.bf16.msra.mxu0 %v3918_v42  ;;  %3810 = vmatpush3.bf16.msra.mxu1 %v3918_v42  ;;  %v4652_v42 = vrot.slane %v1926_v32, %v4545_v9  ;;  %v1520_v52 = vmul.bf16 %v4643_v37, %v1302_v59  ;;  %v1522_v53 = vmul.bf16 %v4643_v37, %v4620_v60  ;;  %v535_v19 = vunpack.c.l.bf16 %v4670_v6 }
  0xa1   : > { %3665 = vmatprep.subr.bf16.mxu0 %v3919_v0  ;;  %3803 = vmatprep.subr.bf16.mxu1 %v3919_v0  ;;  %v1524_v54 = vmul.bf16 %v4643_v37, %v4622_v1  ;;  %8292 = vst [vmem:[#allocation18_spill] sm:$0xff] %v4670_v6  ;;  %v1657_v56 = vmul.bf16 %v4646_v38, %v1370_v2  ;;  %v539_v30 = vunpack.c.h.bf16 %v4683_v15  ;;  %v540_v32 = vunpack.c.l.bf16 %v4692_v18 }
  0xa2   : > { %v1659_v57 = vmul.bf16 %v4646_v38, %v4626_v3  ;;  %v1661_v58 = vmul.bf16 %v4646_v38, %v4629_v13  ;;  %v1795_v59 = vmul.bf16 %v4649_v41, %v4540_v8  ;;  %v1584_v61 = vadd.bf16 %v1520_v52, %v1447_v46 }
  0xa3   : > { %v1586_v62 = vadd.bf16 %v1522_v53, %v1449_v48  ;;  %v1588_v63 = vadd.bf16 %v1524_v54, %v1451_v49  ;;  %v1932_v2 = vmul.bf16 %v4652_v42, %v4620_v60  ;;  %v2069_v8 = vmul.bf16 %v4655_v43, %v4626_v3 }
  0xa4   : > { %3666 = vmatpush3.bf16.msra.mxu0 %v3919_v0  ;;  %3811 = vmatpush3.bf16.msra.mxu1 %v3919_v0  ;;  %v1721_v20 = vadd.bf16 %v1657_v56, %v1584_v61  ;;  %v4702_v60 = vrot.slane %v2201_v39, %v4545_v9  ;;  %v2338_v25 = vpack.i.b16 %v2336_v45, %v2336_v45  ;;  %v698_v33 = vrot.slane %v528_v5, 1 }
  0xa5   : > { %3667 = vmatprep.subr.bf16.mxu0 %v3920_v29  ;;  %3804 = vmatprep.subr.bf16.mxu1 %v3920_v29  ;;  %v4695_v21 = vadd.bf16 %v1659_v57, %v1586_v62  ;;  %v4697_v22 = vadd.bf16 %v1661_v58, %v1588_v63  ;;  %v2473_v26 = vpack.c.bf16 %v2472_v14, %v2472_v14  ;;  %v699_v45 = vrot.slane %v529_v27, 1 }
  0xa6   : > { %v1859_v3 = vadd.bf16 %v1795_v59, %v1721_v20  ;;  %v2207_v46 = vmul.bf16 %v4702_v60, %v4551_v11  ;;  %v4712_v48 = vrot.slane %v2338_v25, %v4545_v9  ;;  %v4718_v52 = vrot.slane %v530_v35, 1 }
  0xa7   : > { %8293 = vst [vmem:[#allocation19_spill] sm:$0xff] %v4697_v22  ;;  %v2475_v39 = vpack.i.b16 %v2473_v26, %v2473_v26  ;;  %v703_v53 = vrot.slane %v533_v50, 1  ;;  %v704_v54 = vrot.slane %v534_v55, 1  ;;  %v4725_v58 = vrot.slane %v535_v19, 1 }
  0xa8   : > { %3668 = vmatpush3.bf16.msra.mxu0 %v3920_v29  ;;  %3812 = vmatpush3.bf16.msra.mxu1 %v3920_v29  ;;  %v538_v29 = vunpack.c.l.bf16 %v4683_v15  ;;  %v1996_v49 = vadd.bf16 %v1932_v2, %v1859_v3  ;;  %v2344_v56 = vmul.bf16 %v4712_v48, %v4622_v1  ;;  %v709_v62 = vrot.slane %v539_v30, 1 }
  0xa9   : > { %v4723_v57 = vrot.slane %v2475_v39, %v4545_v9  ;;  %v4727_v63 = vrot.slane %v540_v32, 1  ;;  %v858_v14 = vsel %vm790_vm0, %v703_v53, %v704_v54  ;;  %v857_v20 = vsel %vm790_vm0, %v704_v54, %v4725_v58 }
  0xaa   : > { %v708_v59 = vrot.slane %v538_v29, 1  ;;  %v2133_v61 = vadd.bf16 %v2069_v8, %v1996_v49  ;;  %v861_v9 = vsel %vm790_vm0, %v699_v45, %v4718_v52  ;;  %v862_v8 = vsel %vm790_vm0, %v698_v33, %v699_v45 }
  0xab   : > { %v2481_v2 = vmul.bf16 %v4723_v57, %v4629_v13  ;;  %v853_v26 = vsel %vm790_vm0, %v709_v62, %v4727_v63  ;;  %v1007_v39 = vrot.slane %v528_v5, 2  ;;  %v1008_v49 = vrot.slane %v529_v27, 2 }
  0xac   : > { %v2271_v25 = vadd.bf16 %v2207_v46, %v2133_v61  ;;  %v854_v3 = vsel %vm790_vm0, %v708_v59, %v709_v62  ;;  %v4752_v53 = vrot.slane %v530_v35, 2  ;;  %v1012_v54 = vrot.slane %v533_v50, 2 }
  0xad   : > { %v1013_v33 = vrot.slane %v534_v55, 2  ;;  %v4754_v45 = vrot.slane %v535_v19, 2  ;;  %v1017_v61 = vrot.slane %v538_v29, 2  ;;  %v1018_v23 = vrot.slane %v539_v30, 2 }
  0xae   : > { %v2408_v46 = vadd.bf16 %v2344_v56, %v2271_v25  ;;  %v4756_v16 = vrot.slane %v540_v32, 2  ;;  %v1168_v5 = vsel %vm1097_vm1, %v1008_v49, %v4752_v53  ;;  %v1169_v27 = vsel %vm1097_vm1, %v1007_v39, %v1008_v49 }
  0xaf   : > { %v1165_v59 = vsel %vm1097_vm1, %v1012_v54, %v1013_v33  ;;  %v1161_v50 = vsel %vm1097_vm1, %v1017_v61, %v1018_v23  ;;  %v1164_v55 = vsel %vm1097_vm1, %v1013_v33, %v4754_v45  ;;  %v4773_v29 = vpack.c.bf16 %v861_v9, %v862_v8  ;;  %v282_v33 = vld [vmem:[%s4517_s28 + $0x10] ss:$24 sps:$4 sm:$0xff]  }
  0xb0   : > { %v2545_v35 = vadd.bf16 %v2481_v2, %v2408_v46  ;;  %v1160_v19 = vsel %vm1097_vm1, %v1018_v23, %v4756_v16  ;;  %v4775_v30 = vpack.c.bf16 %v857_v20, %v858_v14  ;;  %v4777_v32 = vpack.c.bf16 %v853_v26, %v854_v3 }
  0xb1   : > { %8294 = vst [vmem:[#allocation20_spill] sm:$0xff] %v4773_v29  ;;  %v4779_v56 = vpack.c.bf16 %v1168_v5, %v1169_v27  ;;  %v4781_v62 = vpack.c.bf16 %v1164_v55, %v1165_v59  ;;  %v4783_v2 = vpack.c.bf16 %v1160_v19, %v1161_v50  ;;  %v1479_v25 = vmul.bf16 %v4640_v36, %v4606_v51  ;;  %v4824_v59 = vld [vmem:[%s4517_s28 + $0x40] ss:$336 sps:$4 sm:$0xff]  }
  0xb2   : > { %3669 = vmatprep.mubr.bf16.mxu0 %v2545_v35  ;;  %8295 = vst [vmem:[#allocation21_spill] sm:$0xff] %v4775_v30  ;;  %8296 = vst [vmem:[#allocation22_spill] sm:$0xff] %v4777_v32  ;;  %v1483_v23 = vmul.bf16 %v4640_v36, %v4683_v15  ;;  %v1552_v9 = vmul.bf16 %v4643_v37, %v4773_v29  ;;  %v1556_v20 = vmul.bf16 %v4643_v37, %v4777_v32 }
  0xb3   : > { %8297 = vst [vmem:[#allocation23_spill] sm:$0xff] %v4779_v56  ;;  %8298 = vst [vmem:[#allocation24_spill] sm:$0xff] %v4781_v62  ;;  %v1689_v8 = vmul.bf16 %v4646_v38, %v4779_v56  ;;  %v1693_v39 = vmul.bf16 %v4646_v38, %v4783_v2  ;;  %v1827_v49 = vmul.bf16 %v4649_v41, %v4636_v34  ;;  %v461_v35 = vunpack.c.h.bf16 %v4554_v12 }
  0xb4   : > { %8299 = vst [vmem:[#allocation25_spill] sm:$0xff] %v4783_v2  ;;  %v1616_v3 = vadd.bf16 %v1552_v9, %v1479_v25  ;;  %v1620_v46 = vadd.bf16 %v1556_v20, %v1483_v23  ;;  %v1964_v61 = vmul.bf16 %v4652_v42, %v4775_v30  ;;  %v2101_v5 = vmul.bf16 %v4655_v43, %v4781_v62 }
  0xb5   : > { %v2239_v50 = vmul.bf16 %v4702_v60, %v4683_v15  ;;  %v2376_v55 = vmul.bf16 %v4712_v48, %v4777_v32  ;;  %v2513_v25 = vmul.bf16 %v4723_v57, %v4783_v2  ;;  %v451_v23 = vunpack.c.h.bf16 %v4537_v7 }
  0xb6   : > { %v1753_v27 = vadd.bf16 %v1689_v8, %v1616_v3  ;;  %v4818_v19 = vadd.bf16 %v1693_v39, %v1620_v46  ;;  %v452_v9 = vunpack.c.l.bf16 %v282_v33  ;;  %v456_v8 = vunpack.c.h.bf16 %v4548_v10 }
  0xb7   : > { %v457_v3 = vunpack.c.h.bf16 %v282_v33  ;;  %v462_v54 = vunpack.c.l.bf16 %v4824_v59  ;;  %v621_v26 = vrot.slane %v451_v23, 1  ;;  %v930_v39 = vrot.slane %v451_v23, 2 }
  0xb8   : > { %8300 = vst [vmem:[#allocation26_spill] sm:$0xff] %v4818_v19  ;;  %v1891_v20 = vadd.bf16 %v1827_v49, %v1753_v27  ;;  %v622_v14 = vrot.slane %v452_v9, 1  ;;  %v626_v0 = vrot.slane %v456_v8, 1  ;;  %v631_v29 = vrot.slane %v461_v35, 1 }
  0xb9   : > { %v627_v56 = vrot.slane %v457_v3, 1  ;;  %v632_v51 = vrot.slane %v462_v54, 1  ;;  %v924_v27 = vsel %vm790_vm0, %v4565_v24, %v621_v26  ;;  %v931_v33 = vrot.slane %v452_v9, 2 }
  0xba   : > { %v2028_v46 = vadd.bf16 %v1964_v61, %v1891_v20  ;;  %v923_v49 = vsel %vm790_vm0, %v621_v26, %v622_v14  ;;  %v916_v22 = vsel %vm790_vm0, %v4569_v31, %v631_v29  ;;  %v920_v23 = vsel %vm790_vm0, %v4567_v28, %v626_v0 }
  0xbb   : > { %v919_v61 = vsel %vm790_vm0, %v626_v0, %v627_v56  ;;  %v915_v14 = vsel %vm790_vm0, %v631_v29, %v632_v51  ;;  %v935_v20 = vrot.slane %v456_v8, 2  ;;  %v936_v2 = vrot.slane %v457_v3, 2 }
  0xbc   : > { %v2165_v19 = vadd.bf16 %v2101_v5, %v2028_v46  ;;  %v940_v32 = vrot.slane %v461_v35, 2  ;;  %v941_v26 = vrot.slane %v462_v54, 2  ;;  %v1230_v5 = vsel %vm1097_vm1, %v930_v39, %v931_v33 }
  0xbd   : > { %v1231_v31 = vsel %vm1097_vm1, %v4590_v40, %v930_v39  ;;  %v1226_v28 = vsel %vm1097_vm1, %v935_v20, %v936_v2  ;;  %v1227_v51 = vsel %vm1097_vm1, %v4592_v44, %v935_v20  ;;  %v1303_v54 = vpack.c.bf16 %v923_v49, %v924_v27  ;;  %v367_v39 = vld [vmem:[%s4517_s28 + $0x1a8] ss:$24 sps:$4 sm:$0xff]  }
  0xbe   : > { %v2303_v24 = vadd.bf16 %v2239_v50, %v2165_v19  ;;  %v1223_v56 = vsel %vm1097_vm1, %v4594_v47, %v940_v32  ;;  %v1222_v29 = vsel %vm1097_vm1, %v940_v32, %v941_v26  ;;  %v4859_v35 = vpack.c.bf16 %v919_v61, %v920_v23 }
  0xbf   : > { %v4861_v40 = vpack.c.bf16 %v915_v14, %v916_v22  ;;  %v1371_v50 = vpack.c.bf16 %v1230_v5, %v1231_v31  ;;  %v4863_v47 = vpack.c.bf16 %v1226_v28, %v1227_v51  ;;  %v4865_v9 = vpack.c.bf16 %v1222_v29, %v1223_v56 }
  0xc0   : > { %v2440_v0 = vadd.bf16 %v2376_v55, %v2303_v24  ;;  %v1448_v2 = vmul.bf16 %v4640_v36, %v4537_v7  ;;  %v1521_v32 = vmul.bf16 %v4643_v37, %v1303_v54  ;;  %v1523_v55 = vmul.bf16 %v4643_v37, %v4859_v35 }
  0xc1   : > { %v1660_v8 = vmul.bf16 %v4646_v38, %v4863_v47  ;;  %v1796_v3 = vmul.bf16 %v4649_v41, %v4548_v10  ;;  %v1933_v49 = vmul.bf16 %v4652_v42, %v4859_v35  ;;  %v2070_v27 = vmul.bf16 %v4655_v43, %v4863_v47 }
  0xc2   : > { %v2577_v19 = vadd.bf16 %v2513_v25, %v2440_v0  ;;  %v1658_v25 = vmul.bf16 %v4646_v38, %v1371_v50  ;;  %v1585_v46 = vadd.bf16 %v1521_v32, %v1448_v2  ;;  %v2208_v33 = vmul.bf16 %v4702_v60, %v4554_v12 }
  0xc3   : > { %v2345_v61 = vmul.bf16 %v4712_v48, %v4861_v40  ;;  %v2482_v23 = vmul.bf16 %v4723_v57, %v4865_v9  ;;  %v531_v14 = vunpack.c.h.bf16 %v4632_v17  ;;  %v532_v20 = vunpack.c.h.bf16 %v4824_v59 }
  0xc4   : > { %3733 = vmatprep.mubr.bf16.mxu1 %v2577_v19  ;;  %v1722_v24 = vadd.bf16 %v1658_v25, %v1585_v46  ;;  %v536_v26 = vunpack.c.h.bf16 %v4670_v6  ;;  %v537_v5 = vunpack.c.l.bf16 %v367_v39  ;;  %v541_v31 = vunpack.c.h.bf16 %v4692_v18 }
  0xc5   : > { %v542_v56 = vunpack.c.h.bf16 %v367_v39  ;;  %v701_v28 = vrot.slane %v531_v14, 1  ;;  %v702_v51 = vrot.slane %v532_v20, 1  ;;  %v1010_v0 = vrot.slane %v531_v14, 2 }
  0xc6   : > { %v1860_v29 = vadd.bf16 %v1796_v3, %v1722_v24  ;;  %v706_v54 = vrot.slane %v536_v26, 1  ;;  %v707_v50 = vrot.slane %v537_v5, 1  ;;  %v711_v19 = vrot.slane %v541_v31, 1 }
  0xc7   : > { %v712_v2 = vrot.slane %v542_v56, 1  ;;  %v859_v32 = vsel %vm790_vm0, %v701_v28, %v702_v51  ;;  %v860_v59 = vsel %vm790_vm0, %v4718_v52, %v701_v28  ;;  %v1011_v25 = vrot.slane %v532_v20, 2 }
  0xc8   : > { %v1997_v46 = vadd.bf16 %v1933_v49, %v1860_v29  ;;  %v852_v39 = vsel %vm790_vm0, %v4727_v63, %v711_v19  ;;  %v855_v3 = vsel %vm790_vm0, %v706_v54, %v707_v50  ;;  %v856_v14 = vsel %vm790_vm0, %v4725_v58, %v706_v54 }
  0xc9   : > { %v851_v24 = vsel %vm790_vm0, %v711_v19, %v712_v2  ;;  %v1015_v51 = vrot.slane %v536_v26, 2  ;;  %v1016_v7 = vrot.slane %v537_v5, 2  ;;  %v1020_v22 = vrot.slane %v541_v31, 2  ;;  %v4954_v19 = vld [vmem:[%s4517_s28 + $0x50] sm:$0xff]  }
  0xca   : > { %v2134_v52 = vadd.bf16 %v2070_v27, %v1997_v46  ;;  %v1021_v20 = vrot.slane %v542_v56, 2  ;;  %v1166_v49 = vsel %vm1097_vm1, %v1010_v0, %v1011_v25  ;;  %v1167_v63 = vsel %vm1097_vm1, %v4752_v53, %v1010_v0  ;;  %v4963_v46 = vld [vmem:[%s4517_s28 + $0x1c8] sm:$0xff]  }
  0xcb   : > { %v1159_v28 = vsel %vm1097_vm1, %v4756_v16, %v1020_v22  ;;  %v1162_v58 = vsel %vm1097_vm1, %v1015_v51, %v1016_v7  ;;  %v1163_v27 = vsel %vm1097_vm1, %v4754_v45, %v1015_v51  ;;  %v4928_v31 = vpack.c.bf16 %v859_v32, %v860_v59 }
  0xcc   : > { %v2272_v26 = vadd.bf16 %v2208_v33, %v2134_v52  ;;  %v1158_v5 = vsel %vm1097_vm1, %v1020_v22, %v1021_v20  ;;  %v4930_v53 = vpack.c.bf16 %v855_v3, %v856_v14  ;;  %v4932_v56 = vpack.c.bf16 %v851_v24, %v852_v39 }
  0xcd   : > { %v4934_v16 = vpack.c.bf16 %v1166_v49, %v1167_v63  ;;  %v4936_v0 = vpack.c.bf16 %v1162_v58, %v1163_v27  ;;  %v4938_v29 = vpack.c.bf16 %v1158_v5, %v1159_v28  ;;  %v1480_v45 = vmul.bf16 %v4640_v36, %v4632_v17 }
  0xce   : > { %8301 = vst [vmem:[#allocation27_spill] sm:$0xff] %v4930_v53  ;;  %v2409_v7 = vadd.bf16 %v2345_v61, %v2272_v26  ;;  %v1553_v33 = vmul.bf16 %v4643_v37, %v4928_v31  ;;  %v4951_v61 = vld [vmem:[%s4517_s28 + $0x48] sm:$0xff]   ;;  %v1828_v59 = vmul.bf16 %v4649_v41, %v4670_v6  ;;  %v1965_v25 = vmul.bf16 %v4652_v42, %v4930_v53 }
  0xcf   : > { %8302 = vst [vmem:[#allocation28_spill] sm:$0xff] %v4934_v16  ;;  %8303 = vst [vmem:[#allocation29_spill] sm:$0xff] %v4936_v0  ;;  %v1690_v50 = vmul.bf16 %v4646_v38, %v4934_v16  ;;  %v2102_v3 = vmul.bf16 %v4655_v43, %v4936_v0  ;;  %v2240_v14 = vmul.bf16 %v4702_v60, %v4692_v18  ;;  %v463_v51 = vunpack.c.l.bf16 %v4951_v61 }
  0xd0   : > { %v2546_v2 = vadd.bf16 %v2482_v23, %v2409_v7  ;;  %v1617_v39 = vadd.bf16 %v1553_v33, %v1480_v45  ;;  %v2377_v23 = vmul.bf16 %v4712_v48, %v4932_v56  ;;  %v2514_v24 = vmul.bf16 %v4723_v57, %v4938_v29 }
  0xd1   : > { %v464_v52 = vunpack.c.h.bf16 %v4951_v61  ;;  %v465_v20 = vunpack.c.l.bf16 %v4954_v19  ;;  %v8304_v63 = vmul.bf16 %v4649_v41, %v4551_v11  ;;  %v543_v58 = vunpack.c.l.bf16 %v4963_v46 }
  0xd2   : > { %3670 = vmatmul.mubr.bf16.vlgmr.msra.gmra.mrb[0].mxu0 %v2546_v2  ;;  %v1754_v49 = vadd.bf16 %v1690_v50, %v1617_v39  ;;  %v633_v27 = vrot.slane %v463_v51, 1  ;;  %v942_v7 = vrot.slane %v463_v51, 2  ;;  %v4988_v50 = vld [vmem:[%s4517_s28 + $0x1d0] sm:$0xff]   ;;  %v8305_v39 = vmul.bf16 %v4652_v42, %v4622_v1 }
  0xd3   : > { %v1861_v28 = vadd.bf16 %v8304_v63, %v4695_v21  ;;  %v634_v26 = vrot.slane %v464_v52, 1  ;;  %v4981_v5 = vrot.slane %v465_v20, 1  ;;  %v943_v33 = vrot.slane %v464_v52, 2 }
  0xd4   : > { %v1892_v45 = vadd.bf16 %v1828_v59, %v1754_v49  ;;  %v4983_v2 = vrot.slane %v465_v20, 2  ;;  %v2209_v59 = vmul.bf16 %v4702_v60, %v4951_v61  ;;  %v1482_v47 = vmul.bf16 %v4640_v36, %v4670_v6 }
  0xd5   : > { %v913_v11 = vsel %vm790_vm0, %v634_v26, %v4981_v5  ;;  %v914_v21 = vsel %vm790_vm0, %v633_v27, %v634_v26  ;;  %v1998_v51 = vadd.bf16 %v8305_v39, %v1861_v28  ;;  %v1221_v49 = vsel %vm1097_vm1, %v942_v7, %v943_v33 }
  0xd6   : > { %v2029_v52 = vadd.bf16 %v1965_v25, %v1892_v45  ;;  %v1220_v20 = vsel %vm1097_vm1, %v943_v33, %v4983_v2  ;;  %v5005_v63 = vpack.c.bf16 %v913_v11, %v914_v21  ;;  %v8306_v27 = vmul.bf16 %v4655_v43, %v4629_v13  ;;  %v5031_v33 = vld [vmem:[%s4517_s28 + $0x58] ss:$24 sps:$4 sm:$0xff]  }
  0xd7   : > { %v5007_v32 = vpack.c.bf16 %v1220_v20, %v1221_v49  ;;  %v544_v28 = vunpack.c.h.bf16 %v4963_v46  ;;  %v545_v26 = vunpack.c.l.bf16 %v4988_v50  ;;  %v713_v7 = vrot.slane %v543_v58, 1 }
  0xd8   : > { %v2135_v1 = vadd.bf16 %v8306_v27, %v1998_v51  ;;  %v2166_v25 = vadd.bf16 %v2102_v3, %v2029_v52  ;;  %v2346_v39 = vmul.bf16 %v4712_v48, %v5005_v63  ;;  %v1022_v49 = vrot.slane %v543_v58, 2 }
  0xd9   : > { %v2483_v13 = vmul.bf16 %v4723_v57, %v5007_v32  ;;  %v714_v21 = vrot.slane %v544_v28, 1  ;;  %v715_v20 = vrot.slane %v545_v26, 1  ;;  %v1023_v3 = vrot.slane %v544_v28, 2 }
  0xda   : > { %v2273_v11 = vadd.bf16 %v2209_v59, %v2135_v1  ;;  %v2304_v51 = vadd.bf16 %v2240_v14, %v2166_v25  ;;  %v1024_v45 = vrot.slane %v545_v26, 2  ;;  %v1481_v1 = vmul.bf16 %v4640_v36, %v4636_v34 }
  0xdb   : > { %v850_v27 = vsel %vm790_vm0, %v713_v7, %v714_v21  ;;  %v849_v22 = vsel %vm790_vm0, %v714_v21, %v715_v20  ;;  %v1157_v59 = vsel %vm1097_vm1, %v1022_v49, %v1023_v3  ;;  %v466_v21 = vunpack.c.h.bf16 %v4954_v19 }
  0xdc   : > { %v2410_v52 = vadd.bf16 %v2346_v39, %v2273_v11  ;;  %v2441_v54 = vadd.bf16 %v2377_v23, %v2304_v51  ;;  %v1156_v58 = vsel %vm1097_vm1, %v1023_v3, %v1024_v45  ;;  %v5035_v28 = vpack.c.bf16 %v849_v22, %v850_v27 }
  0xdd   : > { %v5039_v25 = vpack.c.bf16 %v1156_v58, %v1157_v59  ;;  %v8307_v39 = vmul.bf16 %v4643_v37, %v4775_v30  ;;  %v2241_v11 = vmul.bf16 %v4702_v60, %v4963_v46  ;;  %v8308_v51 = vmul.bf16 %v4646_v38, %v4781_v62 }
  0xde   : > { %v2547_v14 = vadd.bf16 %v2483_v13, %v2410_v52  ;;  %v2578_v26 = vadd.bf16 %v2514_v24, %v2441_v54  ;;  %v2378_v22 = vmul.bf16 %v4712_v48, %v5035_v28  ;;  %v467_v54 = vunpack.c.l.bf16 %v5031_v33 }
  0xdf   : > { %v1618_v7 = vadd.bf16 %v8307_v39, %v1481_v1  ;;  %v2515_v3 = vmul.bf16 %v4723_v57, %v5039_v25  ;;  %v636_v52 = vrot.slane %v466_v21, 1  ;;  %v945_v59 = vrot.slane %v466_v21, 2 }
  0xe0   : > { %3673 = vmatprep.mubr.bf16.mxu0 %v2547_v14  ;;  %3734 = vmatmul.mubr.bf16.vlgmr.msra.gmra.mrb[0].mxu1 %v2578_v26  ;;  %v637_v27 = vrot.slane %v467_v54, 1  ;;  %v946_v1 = vrot.slane %v467_v54, 2  ;;  %v8309_v14 = vmul.bf16 %v4649_v41, %v4683_v15  ;;  %v1450_v26 = vmul.bf16 %v4640_v36, %v4548_v10  ;;  %v8310_v54 = vld [vmem:[#allocation22_spill] sm:$0xff] }
  0xe1   : > { %v1755_v49 = vadd.bf16 %v8308_v51, %v1618_v7  ;;  %v1798_v7 = vmul.bf16 %v4649_v41, %v4554_v12  ;;  %v912_v21 = vsel %vm790_vm0, %v4981_v5, %v636_v52  ;;  %v1219_v10 = vsel %vm1097_vm1, %v4983_v2, %v945_v59  ;;  %v5089_v5 = vld [vmem:[%s4517_s28 + $0x1d8] ss:$24 sps:$4 sm:$0xff]  }
  0xe2   : > { %v911_v51 = vsel %vm790_vm0, %v636_v52, %v637_v27  ;;  %v1218_v15 = vsel %vm1097_vm1, %v945_v59, %v946_v1  ;;  %v1587_v27 = vadd.bf16 %v1523_v55, %v1450_v26  ;;  %v1935_v52 = vmul.bf16 %v4652_v42, %v4861_v40 }
  0xe3   : > { %v1893_v58 = vadd.bf16 %v8309_v14, %v1755_v49  ;;  %v8311_v49 = vmul.bf16 %v4652_v42, %v8310_v54  ;;  %v5081_v39 = vpack.c.bf16 %v911_v51, %v912_v21  ;;  %v5083_v24 = vpack.c.bf16 %v1218_v15, %v1219_v10 }
  0xe4   : > { %v2072_v2 = vmul.bf16 %v4655_v43, %v4865_v9  ;;  %v2210_v59 = vmul.bf16 %v4702_v60, %v4954_v19  ;;  %v546_v1 = vunpack.c.h.bf16 %v4988_v50  ;;  %v1724_v26 = vadd.bf16 %v1660_v8, %v1587_v27 }
  0xe5   : > { %v2030_v14 = vadd.bf16 %v8311_v49, %v1893_v58  ;;  %v8312_v58 = vld [vmem:[#allocation25_spill] sm:$0xff]  ;;  %v2347_v15 = vmul.bf16 %v4712_v48, %v5081_v39  ;;  %v2484_v10 = vmul.bf16 %v4723_v57, %v5083_v24  ;;  %v547_v54 = vunpack.c.l.bf16 %v5089_v5 }
  0xe6   : > { %v8313_v51 = vmul.bf16 %v4655_v43, %v8312_v58  ;;  %v716_v49 = vrot.slane %v546_v1, 1  ;;  %v1862_v58 = vadd.bf16 %v1798_v7, %v1724_v26 }
  0xe7   : > { %v717_v35 = vrot.slane %v547_v54, 1  ;;  %v1026_v13 = vrot.slane %v547_v54, 2  ;;  %v5134_v54 = vld [vmem:[%s4517_s28 + $0x60] sm:$0xff]  }
  0xe8   : > { %v2167_v21 = vadd.bf16 %v8313_v51, %v2030_v14  ;;  %v1025_v51 = vrot.slane %v546_v1, 2  ;;  %v848_v55 = vsel %vm790_vm0, %v715_v20, %v716_v49  ;;  %v1999_v27 = vadd.bf16 %v1935_v52, %v1862_v58  ;;  %v5143_v58 = vld [vmem:[%s4517_s28 + $0x68] sm:$0xff]  }
  0xe9   : > { %v847_v7 = vsel %vm790_vm0, %v716_v49, %v717_v35  ;;  %v1555_v20 = vmul.bf16 %v4643_v37, %v4930_v53  ;;  %v1830_v35 = vmul.bf16 %v4649_v41, %v4692_v18  ;;  %v2104_v49 = vmul.bf16 %v4655_v43, %v4938_v29 }
  0xea   : > { %v2305_v14 = vadd.bf16 %v2241_v11, %v2167_v21  ;;  %v1155_v23 = vsel %vm1097_vm1, %v1024_v45, %v1025_v51  ;;  %v1154_v1 = vsel %vm1097_vm1, %v1025_v51, %v1026_v13  ;;  %v2136_v21 = vadd.bf16 %v2072_v2, %v1999_v27 }
  0xeb   : > { %v5129_v26 = vpack.c.bf16 %v847_v7, %v848_v55  ;;  %v5131_v45 = vpack.c.bf16 %v1154_v1, %v1155_v23  ;;  %v1967_v13 = vmul.bf16 %v4652_v42, %v4932_v56  ;;  %v2242_v55 = vmul.bf16 %v4702_v60, %v4988_v50 }
  0xec   : > { %v2442_v8 = vadd.bf16 %v2378_v22, %v2305_v14  ;;  %v1692_v22 = vmul.bf16 %v4646_v38, %v4936_v0  ;;  %v1619_v14 = vadd.bf16 %v1555_v20, %v1482_v47  ;;  %v468_v27 = vunpack.c.l.bf16 %v5134_v54 }
  0xed   : > { %v2379_v47 = vmul.bf16 %v4712_v48, %v5129_v26  ;;  %v469_v7 = vunpack.c.h.bf16 %v5134_v54  ;;  %v470_v1 = vunpack.c.l.bf16 %v5143_v58 }
  0xee   : > { %v2579_v52 = vadd.bf16 %v2515_v3, %v2442_v8  ;;  %v2274_v3 = vadd.bf16 %v2210_v59, %v2136_v21  ;;  %v1756_v51 = vadd.bf16 %v1692_v22, %v1619_v14  ;;  %v2516_v8 = vmul.bf16 %v4723_v57, %v5131_v45 }
  0xef   : > { %v947_v21 = vrot.slane %v468_v27, 2  ;;  %v1799_v22 = vmul.bf16 %v4649_v41, %v4951_v61  ;;  %v639_v2 = vrot.slane %v469_v7, 1  ;;  %v5160_v23 = vrot.slane %v470_v1, 1 }
  0xf0   : > { %3737 = vmatprep.mubr.bf16.mxu1 %v2579_v52  ;;  %v2411_v59 = vadd.bf16 %v2347_v15, %v2274_v3  ;;  %v1894_v20 = vadd.bf16 %v1830_v35, %v1756_v51  ;;  %v638_v52 = vrot.slane %v468_v27, 1  ;;  %v948_v11 = vrot.slane %v469_v7, 2  ;;  %v8314_v3 = vld [vmem:[#allocation19_spill] sm:$0xff] }
  0xf1   : > { %v5162_v0 = vrot.slane %v470_v1, 2  ;;  %v1863_v53 = vadd.bf16 %v1799_v22, %v8314_v3  ;;  %v5168_v35 = vld [vmem:[%s4517_s28 + $0x1e0] sm:$0xff]   ;;  %v1936_v27 = vmul.bf16 %v4652_v42, %v5005_v63  ;;  %v5187_v22 = vld [vmem:[%s4517_s28 + $0x1e8] sm:$0xff]  }
  0xf2   : > { %v2548_v14 = vadd.bf16 %v2484_v10, %v2411_v59  ;;  %v2031_v44 = vadd.bf16 %v1967_v13, %v1894_v20  ;;  %v909_v10 = vsel %vm790_vm0, %v639_v2, %v5160_v23  ;;  %v910_v51 = vsel %vm790_vm0, %v638_v52, %v639_v2 }
  0xf3   : > { %v1217_v13 = vsel %vm1097_vm1, %v947_v21, %v948_v11  ;;  %v1216_v7 = vsel %vm1097_vm1, %v948_v11, %v5162_v0  ;;  %v5182_v1 = vpack.c.bf16 %v909_v10, %v910_v51  ;;  %v2073_v20 = vmul.bf16 %v4655_v43, %v5007_v32 }
  0xf4   : > { %3674 = vmatmul.mubr.bf16.gmra.mrb[4].mxu0 %v2548_v14  ;;  %v2168_v59 = vadd.bf16 %v2104_v49, %v2031_v44  ;;  %v5189_v14 = vpack.c.bf16 %v1216_v7, %v1217_v13  ;;  %v2000_v2 = vadd.bf16 %v1936_v27, %v1863_v53  ;;  %v2211_v52 = vmul.bf16 %v4702_v60, %v5134_v54 }
  0xf5   : > { %v548_v21 = vunpack.c.l.bf16 %v5168_v35  ;;  %v2348_v11 = vmul.bf16 %v4712_v48, %v5182_v1  ;;  %v549_v3 = vunpack.c.h.bf16 %v5168_v35  ;;  %v550_v13 = vunpack.c.l.bf16 %v5187_v22 }
  0xf6   : > { %v2306_v44 = vadd.bf16 %v2242_v55, %v2168_v59  ;;  %v2137_v51 = vadd.bf16 %v2073_v20, %v2000_v2  ;;  %v2485_v53 = vmul.bf16 %v4723_v57, %v5189_v14  ;;  %v1831_v20 = vmul.bf16 %v4649_v41, %v4963_v46 }
  0xf7   : > { %v718_v7 = vrot.slane %v548_v21, 1  ;;  %v719_v55 = vrot.slane %v549_v3, 1  ;;  %v1027_v59 = vrot.slane %v548_v21, 2  ;;  %v720_v49 = vrot.slane %v550_v13, 1 }
  0xf8   : > { %v2443_v27 = vadd.bf16 %v2379_v47, %v2306_v44  ;;  %v2275_v15 = vadd.bf16 %v2211_v52, %v2137_v51  ;;  %v1028_v6 = vrot.slane %v549_v3, 2  ;;  %v5204_v62 = vrot.slane %v550_v13, 2  ;;  %v8315_v3 = vld [vmem:[#allocation26_spill] sm:$0xff] }
  0xf9   : > { %v846_v34 = vsel %vm790_vm0, %v718_v7, %v719_v55  ;;  %v845_v10 = vsel %vm790_vm0, %v719_v55, %v720_v49  ;;  %v1968_v51 = vmul.bf16 %v4652_v42, %v5035_v28  ;;  %v2105_v13 = vmul.bf16 %v4655_v43, %v5039_v25 }
  0xfa   : > { %v2580_v30 = vadd.bf16 %v2516_v8, %v2443_v27  ;;  %v2412_v2 = vadd.bf16 %v2348_v11, %v2275_v15  ;;  %v1152_v47 = vsel %vm1097_vm1, %v1028_v6, %v5204_v62  ;;  %v1153_v52 = vsel %vm1097_vm1, %v1027_v59, %v1028_v6 }
  0xfb   : > { %v5217_v21 = vpack.c.bf16 %v845_v10, %v846_v34  ;;  %v5219_v8 = vpack.c.bf16 %v1152_v47, %v1153_v52  ;;  %v1895_v15 = vadd.bf16 %v1831_v20, %v8315_v3  ;;  %v2243_v6 = vmul.bf16 %v4702_v60, %v5168_v35 }
  0xfc   : > { %3738 = vmatmul.mubr.bf16.gmra.mrb[4].mxu1 %v2580_v30  ;;  %v2549_v11 = vadd.bf16 %v2485_v53, %v2412_v2  ;;  %v471_v7 = vunpack.c.h.bf16 %v5143_v58  ;;  %v472_v55 = vunpack.c.h.bf16 %v5031_v33  ;;  %v8316_v59 = vmul.bf16 %v4640_v36, %v4554_v12 }
  0xfd   : > { %v2380_v10 = vmul.bf16 %v4712_v48, %v5217_v21  ;;  %v2517_v53 = vmul.bf16 %v4723_v57, %v5219_v8  ;;  %v2032_v27 = vadd.bf16 %v1968_v51, %v1895_v15  ;;  %v8317_v20 = vmul.bf16 %v4643_v37, %v4861_v40 }
  0xfe   : > { %3677 = vmatprep.mubr.bf16.mxu0 %v2549_v11  ;;  %v1800_v47 = vmul.bf16 %v4649_v41, %v4954_v19  ;;  %v1937_v52 = vmul.bf16 %v4652_v42, %v5081_v39  ;;  %v2074_v3 = vmul.bf16 %v4655_v43, %v5083_v24  ;;  %v641_v11 = vrot.slane %v471_v7, 1 }
  0xff   : > { %v1589_v2 = vadd.bf16 %v8317_v20, %v8316_v59  ;;  %v2169_v15 = vadd.bf16 %v2105_v13, %v2032_v27  ;;  %v642_v51 = vrot.slane %v472_v55, 1  ;;  %v950_v33 = vrot.slane %v471_v7, 2 }
 0x100   : > { %v951_v30 = vrot.slane %v472_v55, 2  ;;  %v8318_v40 = vmul.bf16 %v4646_v38, %v4865_v9  ;;  %v2212_v20 = vmul.bf16 %v4702_v60, %v5143_v58  ;;  %v908_v13 = vsel %vm790_vm0, %v5160_v23, %v641_v11 }
 0x101   : > { %v2307_v34 = vadd.bf16 %v2243_v6, %v2169_v15  ;;  %v907_v44 = vsel %vm790_vm0, %v641_v11, %v642_v51  ;;  %v1215_v27 = vsel %vm1097_vm1, %v5162_v0, %v950_v33  ;;  %v552_v51 = vunpack.c.h.bf16 %v5089_v5 }
 0x102   : > { %v1726_v59 = vadd.bf16 %v8318_v40, %v1589_v2  ;;  %v1214_v7 = vsel %vm1097_vm1, %v950_v33, %v951_v30  ;;  %v5269_v9 = vpack.c.bf16 %v907_v44, %v908_v13  ;;  %v551_v2 = vunpack.c.h.bf16 %v5187_v22 }
 0x103   : > { %v2444_v6 = vadd.bf16 %v2380_v10, %v2307_v34  ;;  %v5272_v15 = vpack.c.bf16 %v1214_v7, %v1215_v27  ;;  %v722_v30 = vrot.slane %v552_v51, 1  ;;  %v8320_v13 = vmul.bf16 %v4643_v37, %v4932_v56 }
 0x104   : > { %v1864_v55 = vadd.bf16 %v1800_v47, %v1726_v59  ;;  %v2349_v0 = vmul.bf16 %v4712_v48, %v5269_v9  ;;  %v721_v40 = vrot.slane %v551_v2, 1  ;;  %v1030_v47 = vrot.slane %v551_v2, 2  ;;  %v5305_v2 = vld [vmem:[%s4517_s28 + $0x78] sm:$0xff]  }
 0x105   : > { %v2581_v12 = vadd.bf16 %v2517_v53, %v2444_v6  ;;  %v2486_v34 = vmul.bf16 %v4723_v57, %v5272_v15  ;;  %v8319_v59 = vmul.bf16 %v4640_v36, %v4692_v18  ;;  %v8321_v56 = vmul.bf16 %v4646_v38, %v4938_v29 }
 0x106   : > { %v2001_v11 = vadd.bf16 %v1937_v52, %v1864_v55  ;;  %v844_v5 = vsel %vm790_vm0, %v720_v49, %v721_v40  ;;  %v1031_v52 = vrot.slane %v552_v51, 2  ;;  %v843_v33 = vsel %vm790_vm0, %v721_v40, %v722_v30 }
 0x107   : > { %3741 = vmatprep.mubr.bf16.mxu1 %v2581_v12  ;;  %v1832_v49 = vmul.bf16 %v4649_v41, %v4988_v50  ;;  %v1151_v7 = vsel %vm1097_vm1, %v5204_v62, %v1030_v47  ;;  %v5302_v55 = vpack.c.bf16 %v843_v33, %v844_v5  ;;  %v2106_v51 = vmul.bf16 %v4655_v43, %v5131_v45 }
 0x108   : > { %v2138_v10 = vadd.bf16 %v2074_v3, %v2001_v11  ;;  %v1621_v3 = vadd.bf16 %v8320_v13, %v8319_v59  ;;  %v1150_v12 = vsel %vm1097_vm1, %v1030_v47, %v1031_v52  ;;  %v5317_v11 = vld [vmem:[%s4517_s28 + $0x80] sm:$0xff]   ;;  %v2244_v30 = vmul.bf16 %v4702_v60, %v5187_v22 }
 0x109   : > { %v5307_v18 = vpack.c.bf16 %v1150_v12, %v1151_v7  ;;  %v473_v52 = vunpack.c.l.bf16 %v5305_v2  ;;  %v475_v59 = vunpack.c.l.bf16 %v5317_v11  ;;  %v8322_v12 = vmul.bf16 %v4640_v36, %v4951_v61 }
 0x10a   : > { %v2276_v27 = vadd.bf16 %v2212_v20, %v2138_v10  ;;  %v1758_v6 = vadd.bf16 %v8321_v56, %v1621_v3  ;;  %v1969_v20 = vmul.bf16 %v4652_v42, %v5129_v26  ;;  %v2381_v10 = vmul.bf16 %v4712_v48, %v5302_v55 }
 0x10b   : > { %v2518_v47 = vmul.bf16 %v4723_v57, %v5307_v18  ;;  %v643_v3 = vrot.slane %v473_v52, 1 }
 0x10c   : > { %v2413_v40 = vadd.bf16 %v2349_v0, %v2276_v27  ;;  %v1896_v5 = vadd.bf16 %v1832_v49, %v1758_v6  ;;  %v474_v0 = vunpack.c.h.bf16 %v5305_v2  ;;  %v952_v27 = vrot.slane %v473_v52, 2  ;;  %v5350_v52 = vld [vmem:[%s4517_s28 + $0x1f8] sm:$0xff]  }
 0x10d   : > { %v8323_v49 = vmul.bf16 %v4643_v37, %v5005_v63  ;;  %v5338_v6 = vrot.slane %v475_v59, 1  ;;  %v1801_v63 = vmul.bf16 %v4649_v41, %v5134_v54 }
 0x10e   : > { %v2550_v33 = vadd.bf16 %v2486_v34, %v2413_v40  ;;  %v2033_v13 = vadd.bf16 %v1969_v20, %v1896_v5  ;;  %v644_v56 = vrot.slane %v474_v0, 1  ;;  %v953_v34 = vrot.slane %v474_v0, 2 }
 0x10f   : > { %v1590_v7 = vadd.bf16 %v8323_v49, %v8322_v12  ;;  %v5340_v40 = vrot.slane %v475_v59, 2  ;;  %v8324_v5 = vmul.bf16 %v4646_v38, %v5007_v32  ;;  %v553_v20 = vunpack.c.l.bf16 %v5350_v52 }
 0x110   : > { %3678 = vmatmul.mubr.bf16.gmra.mrb[8].mxu0 %v2550_v33  ;;  %v2170_v29 = vadd.bf16 %v2106_v51, %v2033_v13  ;;  %v905_v33 = vsel %vm790_vm0, %v644_v56, %v5338_v6  ;;  %v906_v0 = vsel %vm790_vm0, %v643_v3, %v644_v56  ;;  %v1213_v32 = vsel %vm1097_vm1, %v952_v27, %v953_v34 }
 0x111   : > { %v1727_v61 = vadd.bf16 %v8324_v5, %v1590_v7  ;;  %v1212_v51 = vsel %vm1097_vm1, %v953_v34, %v5340_v40  ;;  %v5362_v13 = vpack.c.bf16 %v905_v33, %v906_v0  ;;  %v5367_v7 = vld [vmem:[%s4517_s28 + $0x200] sm:$0xff]   ;;  %v1938_v5 = vmul.bf16 %v4652_v42, %v5182_v1 }
 0x112   : > { %v2308_v59 = vadd.bf16 %v2244_v30, %v2170_v29  ;;  %v5364_v12 = vpack.c.bf16 %v1212_v51, %v1213_v32  ;;  %v2075_v3 = vmul.bf16 %v4655_v43, %v5189_v14  ;;  %v2213_v56 = vmul.bf16 %v4702_v60, %v5305_v2 }
 0x113   : > { %v1865_v49 = vadd.bf16 %v1801_v63, %v1727_v61  ;;  %v2350_v34 = vmul.bf16 %v4712_v48, %v5362_v13  ;;  %v554_v33 = vunpack.c.h.bf16 %v5350_v52  ;;  %v555_v0 = vunpack.c.l.bf16 %v5367_v7 }
 0x114   : > { %v2445_v27 = vadd.bf16 %v2381_v10, %v2308_v59  ;;  %v2487_v63 = vmul.bf16 %v4723_v57, %v5364_v12  ;;  %v723_v32 = vrot.slane %v553_v20, 1  ;;  %v1032_v10 = vrot.slane %v553_v20, 2 }
 0x115   : > { %v2002_v61 = vadd.bf16 %v1938_v5, %v1865_v49  ;;  %v724_v62 = vrot.slane %v554_v33, 1  ;;  %v5386_v30 = vrot.slane %v555_v0, 1  ;;  %v1033_v29 = vrot.slane %v554_v33, 2 }
 0x116   : > { %v2582_v51 = vadd.bf16 %v2518_v47, %v2445_v27  ;;  %v5388_v53 = vrot.slane %v555_v0, 2  ;;  %v8325_v5 = vmul.bf16 %v4640_v36, %v4963_v46  ;;  %v8326_v47 = vmul.bf16 %v4643_v37, %v5035_v28 }
 0x117   : > { %v2139_v59 = vadd.bf16 %v2075_v3, %v2002_v61  ;;  %v1833_v20 = vmul.bf16 %v4649_v41, %v5168_v35  ;;  %v841_v61 = vsel %vm790_vm0, %v724_v62, %v5386_v30  ;;  %v842_v33 = vsel %vm790_vm0, %v723_v32, %v724_v62 }
 0x118   : > { %3742 = vmatmul.mubr.bf16.gmra.mrb[8].mxu1 %v2582_v51  ;;  %v1622_v27 = vadd.bf16 %v8326_v47, %v8325_v5  ;;  %v1149_v0 = vsel %vm1097_vm1, %v1032_v10, %v1033_v29  ;;  %v1148_v46 = vsel %vm1097_vm1, %v1033_v29, %v5388_v53  ;;  %v5410_v28 = vpack.c.bf16 %v841_v61, %v842_v33  ;;  %v5418_v5 = vld [vmem:[%s4517_s28 + $0x88] ss:$24 sps:$4 sm:$0xff]  }
 0x119   : > { %v2277_v3 = vadd.bf16 %v2213_v56, %v2139_v59  ;;  %v8327_v51 = vmul.bf16 %v4646_v38, %v5039_v25  ;;  %v1970_v59 = vmul.bf16 %v4652_v42, %v5217_v21  ;;  %v5420_v62 = vpack.c.bf16 %v1148_v46, %v1149_v0 }
 0x11a   : > { %v2107_v32 = vmul.bf16 %v4655_v43, %v5219_v8  ;;  %v2245_v29 = vmul.bf16 %v4702_v60, %v5350_v52  ;;  %v2382_v25 = vmul.bf16 %v4712_v48, %v5410_v28  ;;  %v477_v0 = vunpack.c.l.bf16 %v5418_v5 }
 0x11b   : > { %v1759_v56 = vadd.bf16 %v8327_v51, %v1622_v27  ;;  %v2414_v47 = vadd.bf16 %v2350_v34, %v2277_v3  ;;  %v476_v27 = vunpack.c.h.bf16 %v5317_v11  ;;  %v2519_v3 = vmul.bf16 %v4723_v57, %v5420_v62 }
 0x11c   : > { %v8328_v10 = vmul.bf16 %v4640_v36, %v4954_v19  ;;  %v1802_v34 = vmul.bf16 %v4649_v41, %v5143_v58  ;;  %v5453_v19 = vld [vmem:[%s4517_s28 + $0x208] ss:$24 sps:$4 sm:$0xff]  }
 0x11d   : > { %v1897_v61 = vadd.bf16 %v1833_v20, %v1759_v56  ;;  %v2551_v33 = vadd.bf16 %v2487_v63, %v2414_v47  ;;  %v646_v51 = vrot.slane %v476_v27, 1  ;;  %v955_v49 = vrot.slane %v476_v27, 2 }
 0x11e   : > { %v647_v20 = vrot.slane %v477_v0, 1  ;;  %v956_v56 = vrot.slane %v477_v0, 2  ;;  %v8329_v63 = vmul.bf16 %v4643_v37, %v5081_v39 }
 0x11f   : > { %v2034_v46 = vadd.bf16 %v1970_v59, %v1897_v61  ;;  %3681 = vmatprep.mubr.bf16.mxu0 %v2551_v33  ;;  %v904_v59 = vsel %vm790_vm0, %v5338_v6, %v646_v51  ;;  %v1211_v61 = vsel %vm1097_vm1, %v5340_v40, %v955_v49  ;;  %v1939_v6 = vmul.bf16 %v4652_v42, %v5269_v9 }
 0x120   : > { %v1591_v47 = vadd.bf16 %v8329_v63, %v8328_v10  ;;  %v903_v39 = vsel %vm790_vm0, %v646_v51, %v647_v20  ;;  %v1210_v10 = vsel %vm1097_vm1, %v955_v49, %v956_v56  ;;  %v2076_v63 = vmul.bf16 %v4655_v43, %v5272_v15 }
 0x121   : > { %v2171_v44 = vadd.bf16 %v2107_v32, %v2034_v46  ;;  %v8330_v32 = vmul.bf16 %v4646_v38, %v5083_v24  ;;  %v5464_v40 = vpack.c.bf16 %v903_v39, %v904_v59  ;;  %v5466_v46 = vpack.c.bf16 %v1210_v10, %v1211_v61 }
 0x122   : > { %v2214_v51 = vmul.bf16 %v4702_v60, %v5317_v11  ;;  %v556_v49 = vunpack.c.h.bf16 %v5367_v7  ;;  %v557_v24 = vunpack.c.l.bf16 %v5453_v19 }
 0x123   : > { %v1728_v33 = vadd.bf16 %v8330_v32, %v1591_v47  ;;  %v2309_v0 = vadd.bf16 %v2245_v29, %v2171_v44  ;;  %v2351_v29 = vmul.bf16 %v4712_v48, %v5464_v40 }
 0x124   : > { %v726_v59 = vrot.slane %v556_v49, 1  ;;  %v727_v61 = vrot.slane %v557_v24, 1  ;;  %v1035_v10 = vrot.slane %v556_v49, 2 }
 0x125   : > { %v1866_v27 = vadd.bf16 %v1802_v34, %v1728_v33  ;;  %v2446_v20 = vadd.bf16 %v2382_v25, %v2309_v0  ;;  %v2488_v34 = vmul.bf16 %v4723_v57, %v5466_v46  ;;  %v1036_v25 = vrot.slane %v557_v24, 2 }
 0x126   : > { %v839_v33 = vsel %vm790_vm0, %v726_v59, %v727_v61  ;;  %v840_v0 = vsel %vm790_vm0, %v5386_v30, %v726_v59  ;;  %v5510_v59 = vld [vmem:[%s4517_s28 + $0x90] sm:$0xff]   ;;  %v5513_v61 = vld [vmem:[%s4517_s28 + $0x98] sm:$0xff]  }
 0x127   : > { %v2003_v47 = vadd.bf16 %v1939_v6, %v1866_v27  ;;  %v2583_v39 = vadd.bf16 %v2519_v3, %v2446_v20  ;;  %v8331_v27 = vmul.bf16 %v4640_v36, %v4988_v50  ;;  %v8332_v6 = vmul.bf16 %v4643_v37, %v5129_v26 }
 0x128   : > { %v1146_v3 = vsel %vm1097_vm1, %v1035_v10, %v1036_v25  ;;  %v5498_v49 = vpack.c.bf16 %v839_v33, %v840_v0  ;;  %v8333_v50 = vmul.bf16 %v4646_v38, %v5131_v45  ;;  %v2246_v45 = vmul.bf16 %v4702_v60, %v5367_v7 }
 0x129   : > { %v2140_v32 = vadd.bf16 %v2076_v63, %v2003_v47  ;;  %v1623_v44 = vadd.bf16 %v8332_v6, %v8331_v27  ;;  %3745 = vmatprep.mubr.bf16.mxu1 %v2583_v39  ;;  %v1147_v63 = vsel %vm1097_vm1, %v5388_v53, %v1035_v10  ;;  %v1834_v47 = vmul.bf16 %v4649_v41, %v5187_v22 }
 0x12a   : > { %v5502_v20 = vpack.c.bf16 %v1146_v3, %v1147_v63  ;;  %v1971_v39 = vmul.bf16 %v4652_v42, %v5302_v55  ;;  %v478_v0 = vunpack.c.l.bf16 %v5510_v59  ;;  %v479_v27 = vunpack.c.h.bf16 %v5510_v59 }
 0x12b   : > { %v2278_v24 = vadd.bf16 %v2214_v51, %v2140_v32  ;;  %v1760_v26 = vadd.bf16 %v8333_v50, %v1623_v44  ;;  %v2108_v51 = vmul.bf16 %v4655_v43, %v5307_v18  ;;  %v2383_v32 = vmul.bf16 %v4712_v48, %v5498_v49 }
 0x12c   : > { %v2520_v33 = vmul.bf16 %v4723_v57, %v5502_v20  ;;  %v480_v6 = vunpack.c.l.bf16 %v5513_v61  ;;  %v957_v53 = vrot.slane %v478_v0, 2  ;;  %v958_v56 = vrot.slane %v479_v27, 2 }
 0x12d   : > { %v2415_v44 = vadd.bf16 %v2351_v29, %v2278_v24  ;;  %v1898_v25 = vadd.bf16 %v1834_v47, %v1760_v26  ;;  %v8334_v29 = vmul.bf16 %v4640_v36, %v5134_v54  ;;  %v8335_v24 = vmul.bf16 %v4643_v37, %v5182_v1 }
 0x12e   : > { %v648_v26 = vrot.slane %v478_v0, 1  ;;  %v649_v47 = vrot.slane %v479_v27, 1  ;;  %v5538_v10 = vrot.slane %v480_v6, 1  ;;  %v5540_v23 = vrot.slane %v480_v6, 2 }
 0x12f   : > { %v2552_v3 = vadd.bf16 %v2488_v34, %v2415_v44  ;;  %v2035_v63 = vadd.bf16 %v1971_v39, %v1898_v25  ;;  %v1592_v50 = vadd.bf16 %v8335_v24, %v8334_v29  ;;  %v8336_v39 = vmul.bf16 %v4646_v38, %v5189_v14 }
 0x130   : > { %v901_v54 = vsel %vm790_vm0, %v649_v47, %v5538_v10  ;;  %v902_v1 = vsel %vm790_vm0, %v648_v26, %v649_v47  ;;  %v1208_v0 = vsel %vm1097_vm1, %v958_v56, %v5540_v23  ;;  %v1209_v27 = vsel %vm1097_vm1, %v957_v53, %v958_v56 }
 0x131   : > { %3682 = vmatmul.mubr.bf16.gmra.mrb[12].mxu0 %v2552_v3  ;;  %v2172_v30 = vadd.bf16 %v2108_v51, %v2035_v63  ;;  %v1729_v44 = vadd.bf16 %v8336_v39, %v1592_v50  ;;  %v1803_v51 = vmul.bf16 %v4649_v41, %v5305_v2  ;;  %v5559_v6 = vpack.c.bf16 %v901_v54, %v902_v1  ;;  %v5562_v3 = vld [vmem:[%s4517_s28 + $0x210] sm:$0xff]  }
 0x132   : > { %v5564_v63 = vpack.c.bf16 %v1208_v0, %v1209_v27  ;;  %v1940_v14 = vmul.bf16 %v4652_v42, %v5362_v13  ;;  %v2215_v56 = vmul.bf16 %v4702_v60, %v5510_v59  ;;  %v558_v1 = vunpack.c.l.bf16 %v5562_v3 }
 0x133   : > { %v2310_v25 = vadd.bf16 %v2246_v45, %v2172_v30  ;;  %v1867_v29 = vadd.bf16 %v1803_v51, %v1729_v44  ;;  %v2077_v30 = vmul.bf16 %v4655_v43, %v5364_v12  ;;  %v5571_v45 = vld [vmem:[%s4517_s28 + $0x218] sm:$0xff]   ;;  %v2352_v53 = vmul.bf16 %v4712_v48, %v5559_v6 }
 0x134   : > { %v2489_v54 = vmul.bf16 %v4723_v57, %v5564_v63  ;;  %v560_v44 = vunpack.c.l.bf16 %v5571_v45  ;;  %v1037_v0 = vrot.slane %v558_v1, 2  ;;  %v8337_v27 = vmul.bf16 %v4640_v36, %v5168_v35 }
 0x135   : > { %v2447_v24 = vadd.bf16 %v2383_v32, %v2310_v25  ;;  %v2004_v47 = vadd.bf16 %v1940_v14, %v1867_v29  ;;  %v559_v32 = vunpack.c.h.bf16 %v5562_v3  ;;  %v728_v25 = vrot.slane %v558_v1, 1 }
 0x136   : > { %v8338_v26 = vmul.bf16 %v4643_v37, %v5217_v21  ;;  %v5592_v50 = vrot.slane %v560_v44, 1  ;;  %v1835_v35 = vmul.bf16 %v4649_v41, %v5350_v52 }
 0x137   : > { %v2584_v39 = vadd.bf16 %v2520_v33, %v2447_v24  ;;  %v2141_v51 = vadd.bf16 %v2077_v30, %v2004_v47  ;;  %v729_v14 = vrot.slane %v559_v32, 1  ;;  %v1038_v34 = vrot.slane %v559_v32, 2 }
 0x138   : > { %v1624_v29 = vadd.bf16 %v8338_v26, %v8337_v27  ;;  %v5594_v33 = vrot.slane %v560_v44, 2  ;;  %v8339_v47 = vmul.bf16 %v4646_v38, %v5219_v8  ;;  %v1972_v27 = vmul.bf16 %v4652_v42, %v5410_v28 }
 0x139   : > { %3746 = vmatmul.mubr.bf16.gmra.mrb[12].mxu1 %v2584_v39  ;;  %v2279_v24 = vadd.bf16 %v2215_v56, %v2141_v51  ;;  %v837_v21 = vsel %vm790_vm0, %v729_v14, %v5592_v50  ;;  %v838_v26 = vsel %vm790_vm0, %v728_v25, %v729_v14  ;;  %v1145_v39 = vsel %vm1097_vm1, %v1037_v0, %v1038_v34 }
 0x13a   : > { %v1761_v1 = vadd.bf16 %v8339_v47, %v1624_v29  ;;  %v1144_v56 = vsel %vm1097_vm1, %v1038_v34, %v5594_v33  ;;  %v5613_v8 = vpack.c.bf16 %v837_v21, %v838_v26  ;;  %v2109_v29 = vmul.bf16 %v4655_v43, %v5420_v62 }
 0x13b   : > { %v2416_v32 = vadd.bf16 %v2352_v53, %v2279_v24  ;;  %v5615_v44 = vpack.c.bf16 %v1144_v56, %v1145_v39  ;;  %v2247_v25 = vmul.bf16 %v4702_v60, %v5562_v3  ;;  %v481_v14 = vunpack.c.h.bf16 %v5513_v61 }
 0x13c   : > { %v1899_v51 = vadd.bf16 %v1835_v35, %v1761_v1  ;;  %v2384_v0 = vmul.bf16 %v4712_v48, %v5613_v8  ;;  %v482_v35 = vunpack.c.h.bf16 %v5418_v5  ;;  %v8341_v56 = vmul.bf16 %v4643_v37, %v5269_v9 }
 0x13d   : > { %v2553_v47 = vadd.bf16 %v2489_v54, %v2416_v32  ;;  %v2521_v1 = vmul.bf16 %v4723_v57, %v5615_v44  ;;  %v651_v21 = vrot.slane %v481_v14, 1  ;;  %v960_v26 = vrot.slane %v481_v14, 2 }
 0x13e   : > { %v2036_v24 = vadd.bf16 %v1972_v27, %v1899_v51  ;;  %v8340_v54 = vmul.bf16 %v4640_v36, %v5143_v58  ;;  %v1804_v32 = vmul.bf16 %v4649_v41, %v5317_v11  ;;  %v652_v51 = vrot.slane %v482_v35, 1 }
 0x13f   : > { %3685 = vmatprep.mubr.bf16.mxu0 %v2553_v47  ;;  %v900_v27 = vsel %vm790_vm0, %v5538_v10, %v651_v21  ;;  %v961_v5 = vrot.slane %v482_v35, 2  ;;  %v1207_v14 = vsel %vm1097_vm1, %v5540_v23, %v960_v26  ;;  %v8342_v9 = vmul.bf16 %v4646_v38, %v5272_v15 }
 0x140   : > { %v1593_v39 = vadd.bf16 %v8341_v56, %v8340_v54  ;;  %v2173_v53 = vadd.bf16 %v2109_v29, %v2036_v24  ;;  %v1941_v29 = vmul.bf16 %v4652_v42, %v5464_v40  ;;  %v899_v54 = vsel %vm790_vm0, %v651_v21, %v652_v51 }
 0x141   : > { %v1206_v10 = vsel %vm1097_vm1, %v960_v26, %v961_v5  ;;  %v2078_v23 = vmul.bf16 %v4655_v43, %v5466_v46  ;;  %v5660_v35 = vpack.c.bf16 %v899_v54, %v900_v27  ;;  %v2216_v15 = vmul.bf16 %v4702_v60, %v5513_v61 }
 0x142   : > { %v1730_v47 = vadd.bf16 %v8342_v9, %v1593_v39  ;;  %v2311_v24 = vadd.bf16 %v2247_v25, %v2173_v53  ;;  %v5662_v56 = vpack.c.bf16 %v1206_v10, %v1207_v14  ;;  %v561_v25 = vunpack.c.h.bf16 %v5571_v45 }
 0x143   : > { %v562_v53 = vunpack.c.h.bf16 %v5453_v19  ;;  %v2353_v27 = vmul.bf16 %v4712_v48, %v5660_v35  ;;  %v8344_v54 = vmul.bf16 %v4643_v37, %v5302_v55  ;;  %v8345_v55 = vmul.bf16 %v4646_v38, %v5307_v18 }
 0x144   : > { %v1868_v58 = vadd.bf16 %v1804_v32, %v1730_v47  ;;  %v2448_v39 = vadd.bf16 %v2384_v0, %v2311_v24  ;;  %v2490_v32 = vmul.bf16 %v4723_v57, %v5662_v56  ;;  %v731_v0 = vrot.slane %v561_v25, 1 }
 0x145   : > { %v732_v14 = vrot.slane %v562_v53, 1  ;;  %v1040_v47 = vrot.slane %v561_v25, 2  ;;  %v1041_v19 = vrot.slane %v562_v53, 2 }
 0x146   : > { %v2005_v51 = vadd.bf16 %v1941_v29, %v1868_v58  ;;  %v2585_v5 = vadd.bf16 %v2521_v1, %v2448_v39  ;;  %v836_v1 = vsel %vm790_vm0, %v5592_v50, %v731_v0  ;;  %v8343_v29 = vmul.bf16 %v4640_v36, %v5187_v22  ;;  %v5699_v50 = vld [vmem:[%s4517_s28 + $0xa8] sm:$0xff]  }
 0x147   : > { %v835_v58 = vsel %vm790_vm0, %v731_v0, %v732_v14  ;;  %v1142_v25 = vsel %vm1097_vm1, %v1040_v47, %v1041_v19  ;;  %v1143_v53 = vsel %vm1097_vm1, %v5594_v33, %v1040_v47  ;;  %v2110_v0 = vmul.bf16 %v4655_v43, %v5502_v20  ;;  %v5711_v14 = vld [vmem:[%s4517_s28 + $0xb0] sm:$0xff]  }
 0x148   : > { %v2142_v9 = vadd.bf16 %v2078_v23, %v2005_v51  ;;  %3749 = vmatprep.mubr.bf16.mxu1 %v2585_v5  ;;  %v1625_v10 = vadd.bf16 %v8344_v54, %v8343_v29  ;;  %v1836_v23 = vmul.bf16 %v4649_v41, %v5367_v7  ;;  %v5696_v51 = vpack.c.bf16 %v835_v58, %v836_v1 }
 0x149   : > { %v5701_v22 = vpack.c.bf16 %v1142_v25, %v1143_v53  ;;  %v2248_v47 = vmul.bf16 %v4702_v60, %v5571_v45  ;;  %v483_v29 = vunpack.c.l.bf16 %v5699_v50 }
 0x14a   : > { %v2280_v39 = vadd.bf16 %v2216_v15, %v2142_v9  ;;  %v1762_v5 = vadd.bf16 %v8345_v55, %v1625_v10  ;;  %v1973_v15 = vmul.bf16 %v4652_v42, %v5498_v49  ;;  %v2385_v19 = vmul.bf16 %v4712_v48, %v5696_v51 }
 0x14b   : > { %v2522_v1 = vmul.bf16 %v4723_v57, %v5701_v22  ;;  %v485_v10 = vunpack.c.l.bf16 %v5711_v14  ;;  %v653_v25 = vrot.slane %v483_v29, 1  ;;  %v962_v53 = vrot.slane %v483_v29, 2  ;;  %v5744_v29 = vld [vmem:[%s4517_s28 + $0x228] sm:$0xff]  }
 0x14c   : > { %v2417_v9 = vadd.bf16 %v2353_v27, %v2280_v39  ;;  %v1900_v58 = vadd.bf16 %v1836_v23, %v1762_v5  ;;  %v484_v27 = vunpack.c.h.bf16 %v5699_v50  ;;  %v8346_v55 = vmul.bf16 %v4640_v36, %v5305_v2 }
 0x14d   : > { %v8347_v23 = vmul.bf16 %v4643_v37, %v5362_v13  ;;  %v5732_v33 = vrot.slane %v485_v10, 1  ;;  %v1805_v13 = vmul.bf16 %v4649_v41, %v5510_v59 }
 0x14e   : > { %v2554_v54 = vadd.bf16 %v2490_v32, %v2417_v9  ;;  %v2037_v39 = vadd.bf16 %v1973_v15, %v1900_v58  ;;  %v654_v18 = vrot.slane %v484_v27, 1  ;;  %v963_v32 = vrot.slane %v484_v27, 2 }
 0x14f   : > { %v1594_v5 = vadd.bf16 %v8347_v23, %v8346_v55  ;;  %v5734_v9 = vrot.slane %v485_v10, 2  ;;  %v8348_v58 = vmul.bf16 %v4646_v38, %v5364_v12  ;;  %v563_v15 = vunpack.c.l.bf16 %v5744_v29 }
 0x150   : > { %3686 = vmatmul.mubr.bf16.gmra.mrb[16].mxu0 %v2554_v54  ;;  %v2174_v24 = vadd.bf16 %v2110_v0, %v2037_v39  ;;  %v897_v54 = vsel %vm790_vm0, %v654_v18, %v5732_v33  ;;  %v898_v27 = vsel %vm790_vm0, %v653_v25, %v654_v18  ;;  %v1205_v12 = vsel %vm1097_vm1, %v962_v53, %v963_v32 }
 0x151   : > { %v1731_v2 = vadd.bf16 %v8348_v58, %v1594_v5  ;;  %v1204_v0 = vsel %vm1097_vm1, %v963_v32, %v5734_v9  ;;  %v5756_v39 = vpack.c.bf16 %v897_v54, %v898_v27  ;;  %v5761_v5 = vld [vmem:[%s4517_s28 + $0x230] sm:$0xff]   ;;  %v1942_v58 = vmul.bf16 %v4652_v42, %v5559_v6 }
 0x152   : > { %v2312_v10 = vadd.bf16 %v2248_v47, %v2174_v24  ;;  %v5758_v55 = vpack.c.bf16 %v1204_v0, %v1205_v12  ;;  %v2079_v18 = vmul.bf16 %v4655_v43, %v5564_v63  ;;  %v2217_v25 = vmul.bf16 %v4702_v60, %v5699_v50 }
 0x153   : > { %v1869_v23 = vadd.bf16 %v1805_v13, %v1731_v2  ;;  %v2354_v32 = vmul.bf16 %v4712_v48, %v5756_v39  ;;  %v564_v54 = vunpack.c.h.bf16 %v5744_v29  ;;  %v565_v27 = vunpack.c.l.bf16 %v5761_v5 }
 0x154   : > { %v2449_v53 = vadd.bf16 %v2385_v19, %v2312_v10  ;;  %v2491_v13 = vmul.bf16 %v4723_v57, %v5758_v55  ;;  %v733_v12 = vrot.slane %v563_v15, 1  ;;  %v1042_v19 = vrot.slane %v563_v15, 2 }
 0x155   : > { %v2006_v2 = vadd.bf16 %v1942_v58, %v1869_v23  ;;  %v734_v26 = vrot.slane %v564_v54, 1  ;;  %v5780_v24 = vrot.slane %v565_v27, 1  ;;  %v1043_v47 = vrot.slane %v564_v54, 2 }
 0x156   : > { %v2586_v0 = vadd.bf16 %v2522_v1, %v2449_v53  ;;  %v5782_v21 = vrot.slane %v565_v27, 2  ;;  %v8349_v58 = vmul.bf16 %v4640_v36, %v5350_v52  ;;  %v8350_v1 = vmul.bf16 %v4643_v37, %v5410_v28 }
 0x157   : > { %v2143_v10 = vadd.bf16 %v2079_v18, %v2006_v2  ;;  %v1837_v15 = vmul.bf16 %v4649_v41, %v5562_v3  ;;  %v833_v2 = vsel %vm790_vm0, %v734_v26, %v5780_v24  ;;  %v834_v54 = vsel %vm790_vm0, %v733_v12, %v734_v26 }
 0x158   : > { %3750 = vmatmul.mubr.bf16.gmra.mrb[16].mxu1 %v2586_v0  ;;  %v1626_v53 = vadd.bf16 %v8350_v1, %v8349_v58  ;;  %v1141_v27 = vsel %vm1097_vm1, %v1042_v19, %v1043_v47  ;;  %v1140_v52 = vsel %vm1097_vm1, %v1043_v47, %v5782_v21  ;;  %v5804_v28 = vpack.c.bf16 %v833_v2, %v834_v54  ;;  %v5812_v58 = vld [vmem:[%s4517_s28 + $0xb8] ss:$24 sps:$4 sm:$0xff]  }
 0x159   : > { %v2281_v18 = vadd.bf16 %v2217_v25, %v2143_v10  ;;  %v8351_v0 = vmul.bf16 %v4646_v38, %v5420_v62  ;;  %v1974_v10 = vmul.bf16 %v4652_v42, %v5613_v8  ;;  %v5814_v26 = vpack.c.bf16 %v1140_v52, %v1141_v27 }
 0x15a   : > { %v2111_v12 = vmul.bf16 %v4655_v43, %v5615_v44  ;;  %v2249_v47 = vmul.bf16 %v4702_v60, %v5744_v29  ;;  %v2386_v62 = vmul.bf16 %v4712_v48, %v5804_v28  ;;  %v487_v27 = vunpack.c.l.bf16 %v5812_v58 }
 0x15b   : > { %v1763_v25 = vadd.bf16 %v8351_v0, %v1626_v53  ;;  %v2418_v1 = vadd.bf16 %v2354_v32, %v2281_v18  ;;  %v486_v53 = vunpack.c.h.bf16 %v5711_v14  ;;  %v2523_v18 = vmul.bf16 %v4723_v57, %v5814_v26 }
 0x15c   : > { %v8352_v19 = vmul.bf16 %v4640_v36, %v5317_v11  ;;  %v1806_v32 = vmul.bf16 %v4649_v41, %v5513_v61  ;;  %v5847_v11 = vld [vmem:[%s4517_s28 + $0x238] ss:$24 sps:$4 sm:$0xff]  }
 0x15d   : > { %v1901_v2 = vadd.bf16 %v1837_v15, %v1763_v25  ;;  %v2555_v54 = vadd.bf16 %v2491_v13, %v2418_v1  ;;  %v656_v0 = vrot.slane %v486_v53, 1  ;;  %v965_v23 = vrot.slane %v486_v53, 2 }
 0x15e   : > { %v657_v15 = vrot.slane %v487_v27, 1  ;;  %v966_v25 = vrot.slane %v487_v27, 2  ;;  %v8353_v13 = vmul.bf16 %v4643_v37, %v5464_v40 }
 0x15f   : > { %v2038_v52 = vadd.bf16 %v1974_v10, %v1901_v2  ;;  %3689 = vmatprep.mubr.bf16.mxu0 %v2555_v54  ;;  %v896_v10 = vsel %vm790_vm0, %v5732_v33, %v656_v0  ;;  %v1203_v2 = vsel %vm1097_vm1, %v5734_v9, %v965_v23  ;;  %v1943_v33 = vmul.bf16 %v4652_v42, %v5660_v35 }
 0x160   : > { %v1595_v1 = vadd.bf16 %v8353_v13, %v8352_v19  ;;  %v895_v40 = vsel %vm790_vm0, %v656_v0, %v657_v15  ;;  %v1202_v19 = vsel %vm1097_vm1, %v965_v23, %v966_v25  ;;  %v2080_v13 = vmul.bf16 %v4655_v43, %v5662_v56 }
 0x161   : > { %v2175_v34 = vadd.bf16 %v2111_v12, %v2038_v52  ;;  %v8354_v12 = vmul.bf16 %v4646_v38, %v5466_v46  ;;  %v5858_v9 = vpack.c.bf16 %v895_v40, %v896_v10  ;;  %v5860_v52 = vpack.c.bf16 %v1202_v19, %v1203_v2 }
 0x162   : > { %v2218_v0 = vmul.bf16 %v4702_v60, %v5711_v14  ;;  %v566_v23 = vunpack.c.h.bf16 %v5761_v5  ;;  %v567_v46 = vunpack.c.l.bf16 %v5847_v11 }
 0x163   : > { %v1732_v54 = vadd.bf16 %v8354_v12, %v1595_v1  ;;  %v2313_v27 = vadd.bf16 %v2249_v47, %v2175_v34  ;;  %v2355_v47 = vmul.bf16 %v4712_v48, %v5858_v9 }
 0x164   : > { %v736_v10 = vrot.slane %v566_v23, 1  ;;  %v737_v2 = vrot.slane %v567_v46, 1  ;;  %v1045_v19 = vrot.slane %v566_v23, 2 }
 0x165   : > { %v1870_v53 = vadd.bf16 %v1806_v32, %v1732_v54  ;;  %v2450_v15 = vadd.bf16 %v2386_v62, %v2313_v27  ;;  %v2492_v32 = vmul.bf16 %v4723_v57, %v5860_v52  ;;  %v1046_v62 = vrot.slane %v567_v46, 2 }
 0x166   : > { %v831_v54 = vsel %vm790_vm0, %v736_v10, %v737_v2  ;;  %v832_v27 = vsel %vm790_vm0, %v5780_v24, %v736_v10  ;;  %v5904_v10 = vld [vmem:[%s4517_s28 + $0xc0] sm:$0xff]   ;;  %v5907_v2 = vld [vmem:[%s4517_s28 + $0xc8] sm:$0xff]  }
 0x167   : > { %v2007_v1 = vadd.bf16 %v1943_v33, %v1870_v53  ;;  %v2587_v40 = vadd.bf16 %v2523_v18, %v2450_v15  ;;  %v8355_v53 = vmul.bf16 %v4640_v36, %v5367_v7  ;;  %v8356_v33 = vmul.bf16 %v4643_v37, %v5498_v49 }
 0x168   : > { %v1138_v18 = vsel %vm1097_vm1, %v1045_v19, %v1046_v62  ;;  %v5892_v23 = vpack.c.bf16 %v831_v54, %v832_v27  ;;  %v8357_v7 = vmul.bf16 %v4646_v38, %v5502_v20  ;;  %v2250_v20 = vmul.bf16 %v4702_v60, %v5761_v5 }
 0x169   : > { %v2144_v12 = vadd.bf16 %v2080_v13, %v2007_v1  ;;  %v1627_v34 = vadd.bf16 %v8356_v33, %v8355_v53  ;;  %3753 = vmatprep.mubr.bf16.mxu1 %v2587_v40  ;;  %v1139_v13 = vsel %vm1097_vm1, %v5782_v21, %v1045_v19  ;;  %v1838_v1 = vmul.bf16 %v4649_v41, %v5571_v45 }
 0x16a   : > { %v5896_v15 = vpack.c.bf16 %v1138_v18, %v1139_v13  ;;  %v1975_v40 = vmul.bf16 %v4652_v42, %v5696_v51  ;;  %v488_v27 = vunpack.c.l.bf16 %v5904_v10  ;;  %v489_v53 = vunpack.c.h.bf16 %v5904_v10 }
 0x16b   : > { %v2282_v46 = vadd.bf16 %v2218_v0, %v2144_v12  ;;  %v1764_v49 = vadd.bf16 %v8357_v7, %v1627_v34  ;;  %v2112_v0 = vmul.bf16 %v4655_v43, %v5701_v22  ;;  %v2387_v12 = vmul.bf16 %v4712_v48, %v5892_v23 }
 0x16c   : > { %v2524_v54 = vmul.bf16 %v4723_v57, %v5896_v15  ;;  %v490_v33 = vunpack.c.l.bf16 %v5907_v2  ;;  %v967_v21 = vrot.slane %v488_v27, 2  ;;  %v968_v25 = vrot.slane %v489_v53, 2 }
 0x16d   : > { %v2419_v34 = vadd.bf16 %v2355_v47, %v2282_v46  ;;  %v1902_v62 = vadd.bf16 %v1838_v1, %v1764_v49  ;;  %v8358_v47 = vmul.bf16 %v4640_v36, %v5510_v59  ;;  %v8359_v46 = vmul.bf16 %v4643_v37, %v5559_v6 }
 0x16e   : > { %v658_v49 = vrot.slane %v488_v27, 1  ;;  %v659_v1 = vrot.slane %v489_v53, 1  ;;  %v5932_v19 = vrot.slane %v490_v33, 1  ;;  %v5934_v30 = vrot.slane %v490_v33, 2 }
 0x16f   : > { %v2556_v18 = vadd.bf16 %v2492_v32, %v2419_v34  ;;  %v2039_v13 = vadd.bf16 %v1975_v40, %v1902_v62  ;;  %v1596_v7 = vadd.bf16 %v8359_v46, %v8358_v47  ;;  %v8360_v40 = vmul.bf16 %v4646_v38, %v5564_v63 }
 0x170   : > { %v893_v59 = vsel %vm790_vm0, %v659_v1, %v5932_v19  ;;  %v894_v6 = vsel %vm790_vm0, %v658_v49, %v659_v1  ;;  %v1200_v27 = vsel %vm1097_vm1, %v968_v25, %v5934_v30  ;;  %v1201_v53 = vsel %vm1097_vm1, %v967_v21, %v968_v25 }
 0x171   : > { %3690 = vmatmul.mubr.bf16.gmra.mrb[20].mxu0 %v2556_v18  ;;  %v2176_v24 = vadd.bf16 %v2112_v0, %v2039_v13  ;;  %v1733_v34 = vadd.bf16 %v8360_v40, %v1596_v7  ;;  %v1807_v0 = vmul.bf16 %v4649_v41, %v5699_v50  ;;  %v5953_v33 = vpack.c.bf16 %v893_v59, %v894_v6  ;;  %v5956_v18 = vld [vmem:[%s4517_s28 + $0x240] sm:$0xff]  }
 0x172   : > { %v5958_v13 = vpack.c.bf16 %v1200_v27, %v1201_v53  ;;  %v1944_v63 = vmul.bf16 %v4652_v42, %v5756_v39  ;;  %v2219_v25 = vmul.bf16 %v4702_v60, %v5904_v10  ;;  %v568_v6 = vunpack.c.l.bf16 %v5956_v18 }
 0x173   : > { %v2314_v62 = vadd.bf16 %v2250_v20, %v2176_v24  ;;  %v1871_v47 = vadd.bf16 %v1807_v0, %v1733_v34  ;;  %v2081_v24 = vmul.bf16 %v4655_v43, %v5758_v55  ;;  %v5965_v20 = vld [vmem:[%s4517_s28 + $0x248] sm:$0xff]   ;;  %v2356_v21 = vmul.bf16 %v4712_v48, %v5953_v33 }
 0x174   : > { %v2493_v59 = vmul.bf16 %v4723_v57, %v5958_v13  ;;  %v570_v34 = vunpack.c.l.bf16 %v5965_v20  ;;  %v1047_v27 = vrot.slane %v568_v6, 2  ;;  %v8361_v53 = vmul.bf16 %v4640_v36, %v5562_v3 }
 0x175   : > { %v2451_v46 = vadd.bf16 %v2387_v12, %v2314_v62  ;;  %v2008_v1 = vadd.bf16 %v1944_v63, %v1871_v47  ;;  %v569_v12 = vunpack.c.h.bf16 %v5956_v18  ;;  %v738_v62 = vrot.slane %v568_v6, 1 }
 0x176   : > { %v8362_v49 = vmul.bf16 %v4643_v37, %v5613_v8  ;;  %v5986_v7 = vrot.slane %v570_v34, 1  ;;  %v1839_v3 = vmul.bf16 %v4649_v41, %v5744_v29 }
 0x177   : > { %v2588_v40 = vadd.bf16 %v2524_v54, %v2451_v46  ;;  %v2145_v0 = vadd.bf16 %v2081_v24, %v2008_v1  ;;  %v739_v63 = vrot.slane %v569_v12, 1  ;;  %v1048_v32 = vrot.slane %v569_v12, 2 }
 0x178   : > { %v1628_v47 = vadd.bf16 %v8362_v49, %v8361_v53  ;;  %v5988_v54 = vrot.slane %v570_v34, 2  ;;  %v8363_v1 = vmul.bf16 %v4646_v38, %v5615_v44  ;;  %v1976_v53 = vmul.bf16 %v4652_v42, %v5804_v28 }
 0x179   : > { %3754 = vmatmul.mubr.bf16.gmra.mrb[20].mxu1 %v2588_v40  ;;  %v2283_v46 = vadd.bf16 %v2219_v25, %v2145_v0  ;;  %v829_v8 = vsel %vm790_vm0, %v739_v63, %v5986_v7  ;;  %v830_v49 = vsel %vm790_vm0, %v738_v62, %v739_v63  ;;  %v1137_v40 = vsel %vm1097_vm1, %v1047_v27, %v1048_v32 }
 0x17a   : > { %v1765_v6 = vadd.bf16 %v8363_v1, %v1628_v47  ;;  %v1136_v25 = vsel %vm1097_vm1, %v1048_v32, %v5988_v54  ;;  %v6007_v44 = vpack.c.bf16 %v829_v8, %v830_v49  ;;  %v2113_v47 = vmul.bf16 %v4655_v43, %v5814_v26 }
 0x17b   : > { %v2420_v12 = vadd.bf16 %v2356_v21, %v2283_v46  ;;  %v6009_v34 = vpack.c.bf16 %v1136_v25, %v1137_v40  ;;  %v2251_v62 = vmul.bf16 %v4702_v60, %v5956_v18  ;;  %v491_v63 = vunpack.c.h.bf16 %v5907_v2 }
 0x17c   : > { %v1903_v0 = vadd.bf16 %v1839_v3, %v1765_v6  ;;  %v2388_v27 = vmul.bf16 %v4712_v48, %v6007_v44  ;;  %v492_v3 = vunpack.c.h.bf16 %v5812_v58  ;;  %v8365_v25 = vmul.bf16 %v4643_v37, %v5660_v35 }
 0x17d   : > { %v2557_v1 = vadd.bf16 %v2493_v59, %v2420_v12  ;;  %v2525_v6 = vmul.bf16 %v4723_v57, %v6009_v34  ;;  %v661_v8 = vrot.slane %v491_v63, 1  ;;  %v970_v49 = vrot.slane %v491_v63, 2 }
 0x17e   : > { %v2040_v46 = vadd.bf16 %v1976_v53, %v1903_v0  ;;  %v8364_v59 = vmul.bf16 %v4640_v36, %v5513_v61  ;;  %v1808_v12 = vmul.bf16 %v4649_v41, %v5711_v14  ;;  %v662_v0 = vrot.slane %v492_v3, 1 }
 0x17f   : > { %3693 = vmatprep.mubr.bf16.mxu0 %v2557_v1  ;;  %v892_v53 = vsel %vm790_vm0, %v5932_v19, %v661_v8  ;;  %v971_v58 = vrot.slane %v492_v3, 2  ;;  %v1199_v63 = vsel %vm1097_vm1, %v5934_v30, %v970_v49  ;;  %v8366_v35 = vmul.bf16 %v4646_v38, %v5662_v56 }
 0x180   : > { %v1597_v40 = vadd.bf16 %v8365_v25, %v8364_v59  ;;  %v2177_v21 = vadd.bf16 %v2113_v47, %v2040_v46  ;;  %v1945_v47 = vmul.bf16 %v4652_v42, %v5858_v9  ;;  %v891_v59 = vsel %vm790_vm0, %v661_v8, %v662_v0 }
 0x181   : > { %v1198_v19 = vsel %vm1097_vm1, %v970_v49, %v971_v58  ;;  %v2082_v30 = vmul.bf16 %v4655_v43, %v5860_v52  ;;  %v6054_v3 = vpack.c.bf16 %v891_v59, %v892_v53  ;;  %v2220_v56 = vmul.bf16 %v4702_v60, %v5907_v2 }
 0x182   : > { %v1734_v1 = vadd.bf16 %v8366_v35, %v1597_v40  ;;  %v2315_v46 = vadd.bf16 %v2251_v62, %v2177_v21  ;;  %v6056_v25 = vpack.c.bf16 %v1198_v19, %v1199_v63  ;;  %v571_v62 = vunpack.c.h.bf16 %v5965_v20 }
 0x183   : > { %v572_v21 = vunpack.c.h.bf16 %v5847_v11  ;;  %v2357_v53 = vmul.bf16 %v4712_v48, %v6054_v3  ;;  %v8368_v59 = vmul.bf16 %v4643_v37, %v5696_v51  ;;  %v8369_v51 = vmul.bf16 %v4646_v38, %v5701_v22 }
 0x184   : > { %v1872_v61 = vadd.bf16 %v1808_v12, %v1734_v1  ;;  %v2452_v40 = vadd.bf16 %v2388_v27, %v2315_v46  ;;  %v2494_v12 = vmul.bf16 %v4723_v57, %v6056_v25  ;;  %v741_v27 = vrot.slane %v571_v62, 1 }
 0x185   : > { %v742_v63 = vrot.slane %v572_v21, 1  ;;  %v1050_v1 = vrot.slane %v571_v62, 2  ;;  %v1051_v11 = vrot.slane %v572_v21, 2 }
 0x186   : > { %v2009_v0 = vadd.bf16 %v1945_v47, %v1872_v61  ;;  %v2589_v58 = vadd.bf16 %v2525_v6, %v2452_v40  ;;  %v828_v6 = vsel %vm790_vm0, %v5986_v7, %v741_v27  ;;  %v8367_v47 = vmul.bf16 %v4640_v36, %v5571_v45  ;;  %v6093_v7 = vld [vmem:[%s4517_s28 + $0xd8] sm:$0xff]  }
 0x187   : > { %v827_v61 = vsel %vm790_vm0, %v741_v27, %v742_v63  ;;  %v1134_v62 = vsel %vm1097_vm1, %v1050_v1, %v1051_v11  ;;  %v1135_v21 = vsel %vm1097_vm1, %v5988_v54, %v1050_v1  ;;  %v2114_v27 = vmul.bf16 %v4655_v43, %v5896_v15  ;;  %v6105_v63 = vld [vmem:[%s4517_s28 + $0xe0] sm:$0xff]  }
 0x188   : > { %v2146_v35 = vadd.bf16 %v2082_v30, %v2009_v0  ;;  %3757 = vmatprep.mubr.bf16.mxu1 %v2589_v58  ;;  %v1629_v19 = vadd.bf16 %v8368_v59, %v8367_v47  ;;  %v1840_v30 = vmul.bf16 %v4649_v41, %v5761_v5  ;;  %v6090_v0 = vpack.c.bf16 %v827_v61, %v828_v6 }
 0x189   : > { %v6095_v45 = vpack.c.bf16 %v1134_v62, %v1135_v21  ;;  %v2252_v1 = vmul.bf16 %v4702_v60, %v5965_v20  ;;  %v493_v47 = vunpack.c.l.bf16 %v6093_v7 }
 0x18a   : > { %v2284_v40 = vadd.bf16 %v2220_v56, %v2146_v35  ;;  %v1766_v58 = vadd.bf16 %v8369_v51, %v1629_v19  ;;  %v1977_v56 = vmul.bf16 %v4652_v42, %v5892_v23  ;;  %v2389_v11 = vmul.bf16 %v4712_v48, %v6090_v0 }
 0x18b   : > { %v2526_v6 = vmul.bf16 %v4723_v57, %v6095_v45  ;;  %v495_v19 = vunpack.c.l.bf16 %v6105_v63  ;;  %v663_v62 = vrot.slane %v493_v47, 1  ;;  %v972_v21 = vrot.slane %v493_v47, 2  ;;  %v6138_v47 = vld [vmem:[%s4517_s28 + $0x258] sm:$0xff]  }
 0x18c   : > { %v2421_v35 = vadd.bf16 %v2357_v53, %v2284_v40  ;;  %v1904_v61 = vadd.bf16 %v1840_v30, %v1766_v58  ;;  %v494_v53 = vunpack.c.h.bf16 %v6093_v7  ;;  %v8370_v51 = vmul.bf16 %v4640_v36, %v5699_v50 }
 0x18d   : > { %v8371_v30 = vmul.bf16 %v4643_v37, %v5756_v39  ;;  %v6126_v54 = vrot.slane %v495_v19, 1  ;;  %v1809_v39 = vmul.bf16 %v4649_v41, %v5904_v10 }
 0x18e   : > { %v2558_v59 = vadd.bf16 %v2494_v12, %v2421_v35  ;;  %v2041_v40 = vadd.bf16 %v1977_v56, %v1904_v61  ;;  %v664_v22 = vrot.slane %v494_v53, 1  ;;  %v973_v12 = vrot.slane %v494_v53, 2 }
 0x18f   : > { %v1598_v58 = vadd.bf16 %v8371_v30, %v8370_v51  ;;  %v6128_v35 = vrot.slane %v495_v19, 2  ;;  %v8372_v61 = vmul.bf16 %v4646_v38, %v5758_v55  ;;  %v573_v56 = vunpack.c.l.bf16 %v6138_v47 }
 0x190   : > { %3694 = vmatmul.mubr.bf16.gmra.mrb[24].mxu0 %v2558_v59  ;;  %v2178_v46 = vadd.bf16 %v2114_v27, %v2041_v40  ;;  %v889_v59 = vsel %vm790_vm0, %v664_v22, %v6126_v54  ;;  %v890_v53 = vsel %vm790_vm0, %v663_v62, %v664_v22  ;;  %v1197_v55 = vsel %vm1097_vm1, %v972_v21, %v973_v12 }
 0x191   : > { %v1735_v50 = vadd.bf16 %v8372_v61, %v1598_v58  ;;  %v1196_v27 = vsel %vm1097_vm1, %v973_v12, %v6128_v35  ;;  %v6150_v40 = vpack.c.bf16 %v889_v59, %v890_v53  ;;  %v6155_v58 = vld [vmem:[%s4517_s28 + $0x260] sm:$0xff]   ;;  %v1946_v61 = vmul.bf16 %v4652_v42, %v5953_v33 }
 0x192   : > { %v2316_v19 = vadd.bf16 %v2252_v1, %v2178_v46  ;;  %v6152_v51 = vpack.c.bf16 %v1196_v27, %v1197_v55  ;;  %v2083_v22 = vmul.bf16 %v4655_v43, %v5958_v13  ;;  %v2221_v62 = vmul.bf16 %v4702_v60, %v6093_v7 }
 0x193   : > { %v1873_v30 = vadd.bf16 %v1809_v39, %v1735_v50  ;;  %v2358_v12 = vmul.bf16 %v4712_v48, %v6150_v40  ;;  %v574_v59 = vunpack.c.h.bf16 %v6138_v47  ;;  %v575_v53 = vunpack.c.l.bf16 %v6155_v58 }
 0x194   : > { %v2453_v21 = vadd.bf16 %v2389_v11, %v2316_v19  ;;  %v2495_v39 = vmul.bf16 %v4723_v57, %v6152_v51  ;;  %v743_v55 = vrot.slane %v573_v56, 1  ;;  %v1052_v11 = vrot.slane %v573_v56, 2 }
 0x195   : > { %v2010_v50 = vadd.bf16 %v1946_v61, %v1873_v30  ;;  %v744_v49 = vrot.slane %v574_v59, 1  ;;  %v6174_v46 = vrot.slane %v575_v53, 1  ;;  %v1053_v1 = vrot.slane %v574_v59, 2 }
 0x196   : > { %v2590_v27 = vadd.bf16 %v2526_v6, %v2453_v21  ;;  %v6176_v8 = vrot.slane %v575_v53, 2  ;;  %v8373_v61 = vmul.bf16 %v4640_v36, %v5744_v29  ;;  %v8374_v6 = vmul.bf16 %v4643_v37, %v5804_v28 }
 0x197   : > { %v2147_v19 = vadd.bf16 %v2083_v22, %v2010_v50  ;;  %v1841_v56 = vmul.bf16 %v4649_v41, %v5956_v18  ;;  %v825_v50 = vsel %vm790_vm0, %v744_v49, %v6174_v46  ;;  %v826_v59 = vsel %vm790_vm0, %v743_v55, %v744_v49 }
 0x198   : > { %3758 = vmatmul.mubr.bf16.gmra.mrb[24].mxu1 %v2590_v27  ;;  %v1630_v21 = vadd.bf16 %v8374_v6, %v8373_v61  ;;  %v1133_v53 = vsel %vm1097_vm1, %v1052_v11, %v1053_v1  ;;  %v1132_v29 = vsel %vm1097_vm1, %v1053_v1, %v6176_v8  ;;  %v6198_v28 = vpack.c.bf16 %v825_v50, %v826_v59  ;;  %v6206_v61 = vld [vmem:[%s4517_s28 + $0xe8] ss:$24 sps:$4 sm:$0xff]  }
 0x199   : > { %v2285_v22 = vadd.bf16 %v2221_v62, %v2147_v19  ;;  %v8375_v27 = vmul.bf16 %v4646_v38, %v5814_v26  ;;  %v1978_v19 = vmul.bf16 %v4652_v42, %v6007_v44  ;;  %v6208_v49 = vpack.c.bf16 %v1132_v29, %v1133_v53 }
 0x19a   : > { %v2115_v55 = vmul.bf16 %v4655_v43, %v6009_v34  ;;  %v2253_v1 = vmul.bf16 %v4702_v60, %v6138_v47  ;;  %v2390_v26 = vmul.bf16 %v4712_v48, %v6198_v28  ;;  %v497_v53 = vunpack.c.l.bf16 %v6206_v61 }
 0x19b   : > { %v1767_v62 = vadd.bf16 %v8375_v27, %v1630_v21  ;;  %v2422_v6 = vadd.bf16 %v2358_v12, %v2285_v22  ;;  %v496_v21 = vunpack.c.h.bf16 %v6105_v63  ;;  %v2527_v22 = vmul.bf16 %v4723_v57, %v6208_v49 }
 0x19c   : > { %v8376_v11 = vmul.bf16 %v4640_v36, %v5711_v14  ;;  %v1810_v12 = vmul.bf16 %v4649_v41, %v5907_v2  ;;  %v6241_v14 = vld [vmem:[%s4517_s28 + $0x268] ss:$24 sps:$4 sm:$0xff]  }
 0x19d   : > { %v1905_v50 = vadd.bf16 %v1841_v56, %v1767_v62  ;;  %v2559_v59 = vadd.bf16 %v2495_v39, %v2422_v6  ;;  %v666_v27 = vrot.slane %v496_v21, 1  ;;  %v975_v30 = vrot.slane %v496_v21, 2 }
 0x19e   : > { %v667_v56 = vrot.slane %v497_v53, 1  ;;  %v976_v62 = vrot.slane %v497_v53, 2  ;;  %v8377_v39 = vmul.bf16 %v4643_v37, %v5858_v9 }
 0x19f   : > { %v2042_v29 = vadd.bf16 %v1978_v19, %v1905_v50  ;;  %3697 = vmatprep.mubr.bf16.mxu0 %v2559_v59  ;;  %v888_v19 = vsel %vm790_vm0, %v6126_v54, %v666_v27  ;;  %v1195_v50 = vsel %vm1097_vm1, %v6128_v35, %v975_v30  ;;  %v1947_v54 = vmul.bf16 %v4652_v42, %v6054_v3 }
 0x1a0   : > { %v1599_v6 = vadd.bf16 %v8377_v39, %v8376_v11  ;;  %v887_v9 = vsel %vm790_vm0, %v666_v27, %v667_v56  ;;  %v1194_v11 = vsel %vm1097_vm1, %v975_v30, %v976_v62  ;;  %v2084_v39 = vmul.bf16 %v4655_v43, %v6056_v25 }
 0x1a1   : > { %v2179_v32 = vadd.bf16 %v2115_v55, %v2042_v29  ;;  %v8378_v55 = vmul.bf16 %v4646_v38, %v5860_v52  ;;  %v6252_v35 = vpack.c.bf16 %v887_v9, %v888_v19  ;;  %v6254_v29 = vpack.c.bf16 %v1194_v11, %v1195_v50 }
 0x1a2   : > { %v2222_v27 = vmul.bf16 %v4702_v60, %v6105_v63  ;;  %v576_v30 = vunpack.c.h.bf16 %v6155_v58  ;;  %v577_v52 = vunpack.c.l.bf16 %v6241_v14 }
 0x1a3   : > { %v1736_v59 = vadd.bf16 %v8378_v55, %v1599_v6  ;;  %v2317_v53 = vadd.bf16 %v2253_v1, %v2179_v32  ;;  %v2359_v1 = vmul.bf16 %v4712_v48, %v6252_v35 }
 0x1a4   : > { %v746_v19 = vrot.slane %v576_v30, 1  ;;  %v747_v50 = vrot.slane %v577_v52, 1  ;;  %v1055_v11 = vrot.slane %v576_v30, 2 }
 0x1a5   : > { %v1874_v21 = vadd.bf16 %v1810_v12, %v1736_v59  ;;  %v2454_v56 = vadd.bf16 %v2390_v26, %v2317_v53  ;;  %v2496_v12 = vmul.bf16 %v4723_v57, %v6254_v29  ;;  %v1056_v26 = vrot.slane %v577_v52, 2 }
 0x1a6   : > { %v823_v59 = vsel %vm790_vm0, %v746_v19, %v747_v50  ;;  %v824_v53 = vsel %vm790_vm0, %v6174_v46, %v746_v19  ;;  %v6298_v19 = vld [vmem:[%s4517_s28 + $0xf0] sm:$0xff]   ;;  %v6301_v50 = vld [vmem:[%s4517_s28 + $0xf8] sm:$0xff]  }
 0x1a7   : > { %v2011_v6 = vadd.bf16 %v1947_v54, %v1874_v21  ;;  %v2591_v9 = vadd.bf16 %v2527_v22, %v2454_v56  ;;  %v8379_v21 = vmul.bf16 %v4640_v36, %v5761_v5  ;;  %v8380_v54 = vmul.bf16 %v4643_v37, %v5892_v23 }
 0x1a8   : > { %v1130_v22 = vsel %vm1097_vm1, %v1055_v11, %v1056_v26  ;;  %v6286_v30 = vpack.c.bf16 %v823_v59, %v824_v53  ;;  %v8381_v5 = vmul.bf16 %v4646_v38, %v5896_v15  ;;  %v2254_v15 = vmul.bf16 %v4702_v60, %v6155_v58 }
 0x1a9   : > { %v2148_v55 = vadd.bf16 %v2084_v39, %v2011_v6  ;;  %v1631_v32 = vadd.bf16 %v8380_v54, %v8379_v21  ;;  %3761 = vmatprep.mubr.bf16.mxu1 %v2591_v9  ;;  %v1131_v39 = vsel %vm1097_vm1, %v6176_v8, %v1055_v11  ;;  %v1842_v6 = vmul.bf16 %v4649_v41, %v5965_v20 }
 0x1aa   : > { %v6290_v56 = vpack.c.bf16 %v1130_v22, %v1131_v39  ;;  %v1979_v9 = vmul.bf16 %v4652_v42, %v6090_v0  ;;  %v498_v53 = vunpack.c.l.bf16 %v6298_v19  ;;  %v499_v21 = vunpack.c.h.bf16 %v6298_v19 }
 0x1ab   : > { %v2286_v52 = vadd.bf16 %v2222_v27, %v2148_v55  ;;  %v1768_v23 = vadd.bf16 %v8381_v5, %v1631_v32  ;;  %v2116_v27 = vmul.bf16 %v4655_v43, %v6095_v45  ;;  %v2391_v55 = vmul.bf16 %v4712_v48, %v6286_v30 }
 0x1ac   : > { %v2528_v59 = vmul.bf16 %v4723_v57, %v6290_v56  ;;  %v500_v54 = vunpack.c.l.bf16 %v6301_v50  ;;  %v977_v8 = vrot.slane %v498_v53, 2  ;;  %v978_v62 = vrot.slane %v499_v21, 2 }
 0x1ad   : > { %v2423_v32 = vadd.bf16 %v2359_v1, %v2286_v52  ;;  %v1906_v26 = vadd.bf16 %v1842_v6, %v1768_v23  ;;  %v8382_v1 = vmul.bf16 %v4640_v36, %v5904_v10  ;;  %v8383_v52 = vmul.bf16 %v4643_v37, %v5953_v33 }
 0x1ae   : > { %v668_v23 = vrot.slane %v498_v53, 1  ;;  %v669_v6 = vrot.slane %v499_v21, 1  ;;  %v6326_v11 = vrot.slane %v500_v54, 1  ;;  %v6328_v24 = vrot.slane %v500_v54, 2 }
 0x1af   : > { %v2560_v22 = vadd.bf16 %v2496_v12, %v2423_v32  ;;  %v2043_v39 = vadd.bf16 %v1979_v9, %v1906_v26  ;;  %v1600_v5 = vadd.bf16 %v8383_v52, %v8382_v1  ;;  %v8384_v9 = vmul.bf16 %v4646_v38, %v5958_v13 }
 0x1b0   : > { %v885_v10 = vsel %vm790_vm0, %v669_v6, %v6326_v11  ;;  %v886_v33 = vsel %vm790_vm0, %v668_v23, %v669_v6  ;;  %v1192_v53 = vsel %vm1097_vm1, %v978_v62, %v6328_v24  ;;  %v1193_v21 = vsel %vm1097_vm1, %v977_v8, %v978_v62 }
 0x1b1   : > { %3698 = vmatmul.mubr.bf16.gmra.mrb[28].mxu0 %v2560_v22  ;;  %v2180_v46 = vadd.bf16 %v2116_v27, %v2043_v39  ;;  %v1737_v32 = vadd.bf16 %v8384_v9, %v1600_v5  ;;  %v1811_v27 = vmul.bf16 %v4649_v41, %v6093_v7  ;;  %v6347_v54 = vpack.c.bf16 %v885_v10, %v886_v33  ;;  %v6350_v22 = vld [vmem:[%s4517_s28 + $0x270] sm:$0xff]  }
 0x1b2   : > { %v6352_v39 = vpack.c.bf16 %v1192_v53, %v1193_v21  ;;  %v1948_v13 = vmul.bf16 %v4652_v42, %v6150_v40  ;;  %v2223_v62 = vmul.bf16 %v4702_v60, %v6298_v19  ;;  %v578_v33 = vunpack.c.l.bf16 %v6350_v22 }
 0x1b3   : > { %v2318_v26 = vadd.bf16 %v2254_v15, %v2180_v46  ;;  %v1875_v1 = vadd.bf16 %v1811_v27, %v1737_v32  ;;  %v2085_v46 = vmul.bf16 %v4655_v43, %v6152_v51  ;;  %v6359_v15 = vld [vmem:[%s4517_s28 + $0x278] sm:$0xff]   ;;  %v2360_v8 = vmul.bf16 %v4712_v48, %v6347_v54 }
 0x1b4   : > { %v2497_v10 = vmul.bf16 %v4723_v57, %v6352_v39  ;;  %v580_v32 = vunpack.c.l.bf16 %v6359_v15  ;;  %v1057_v53 = vrot.slane %v578_v33, 2  ;;  %v8385_v21 = vmul.bf16 %v4640_v36, %v5956_v18 }
 0x1b5   : > { %v2455_v52 = vadd.bf16 %v2391_v55, %v2318_v26  ;;  %v2012_v6 = vadd.bf16 %v1948_v13, %v1875_v1  ;;  %v579_v55 = vunpack.c.h.bf16 %v6350_v22  ;;  %v748_v26 = vrot.slane %v578_v33, 1 }
 0x1b6   : > { %v8386_v23 = vmul.bf16 %v4643_v37, %v6007_v44  ;;  %v6380_v5 = vrot.slane %v580_v32, 1  ;;  %v1843_v18 = vmul.bf16 %v4649_v41, %v6138_v47 }
 0x1b7   : > { %v2592_v9 = vadd.bf16 %v2528_v59, %v2455_v52  ;;  %v2149_v27 = vadd.bf16 %v2085_v46, %v2012_v6  ;;  %v749_v13 = vrot.slane %v579_v55, 1  ;;  %v1058_v12 = vrot.slane %v579_v55, 2 }
 0x1b8   : > { %v1632_v1 = vadd.bf16 %v8386_v23, %v8385_v21  ;;  %v6382_v59 = vrot.slane %v580_v32, 2  ;;  %v8387_v6 = vmul.bf16 %v4646_v38, %v6009_v34  ;;  %v1980_v21 = vmul.bf16 %v4652_v42, %v6198_v28 }
 0x1b9   : > { %3762 = vmatmul.mubr.bf16.gmra.mrb[28].mxu1 %v2592_v9  ;;  %v2287_v52 = vadd.bf16 %v2223_v62, %v2149_v27  ;;  %v821_v44 = vsel %vm790_vm0, %v749_v13, %v6380_v5  ;;  %v822_v23 = vsel %vm790_vm0, %v748_v26, %v749_v13  ;;  %v1129_v9 = vsel %vm1097_vm1, %v1057_v53, %v1058_v12 }
 0x1ba   : > { %v1769_v33 = vadd.bf16 %v8387_v6, %v1632_v1  ;;  %v1128_v62 = vsel %vm1097_vm1, %v1058_v12, %v6382_v59  ;;  %v6401_v34 = vpack.c.bf16 %v821_v44, %v822_v23  ;;  %v2117_v1 = vmul.bf16 %v4655_v43, %v6208_v49 }
 0x1bb   : > { %v2424_v55 = vadd.bf16 %v2360_v8, %v2287_v52  ;;  %v6403_v32 = vpack.c.bf16 %v1128_v62, %v1129_v9  ;;  %v2255_v26 = vmul.bf16 %v4702_v60, %v6350_v22  ;;  %v501_v13 = vunpack.c.h.bf16 %v6301_v50 }
 0x1bc   : > { %v1907_v27 = vadd.bf16 %v1843_v18, %v1769_v33  ;;  %v2392_v53 = vmul.bf16 %v4712_v48, %v6401_v34  ;;  %v502_v18 = vunpack.c.h.bf16 %v6206_v61  ;;  %v8389_v62 = vmul.bf16 %v4643_v37, %v6054_v3 }
 0x1bd   : > { %v2561_v6 = vadd.bf16 %v2497_v10, %v2424_v55  ;;  %v2529_v33 = vmul.bf16 %v4723_v57, %v6403_v32  ;;  %v671_v44 = vrot.slane %v501_v13, 1  ;;  %v980_v23 = vrot.slane %v501_v13, 2 }
 0x1be   : > { %v2044_v52 = vadd.bf16 %v1980_v21, %v1907_v27  ;;  %v8388_v10 = vmul.bf16 %v4640_v36, %v5907_v2  ;;  %v1812_v55 = vmul.bf16 %v4649_v41, %v6105_v63  ;;  %v672_v27 = vrot.slane %v502_v18, 1 }
 0x1bf   : > { %3701 = vmatprep.mubr.bf16.mxu0 %v2561_v6  ;;  %v884_v21 = vsel %vm790_vm0, %v6326_v11, %v671_v44  ;;  %v981_v61 = vrot.slane %v502_v18, 2  ;;  %v1191_v13 = vsel %vm1097_vm1, %v6328_v24, %v980_v23  ;;  %v8390_v3 = vmul.bf16 %v4646_v38, %v6056_v25 }
 0x1c0   : > { %v1601_v9 = vadd.bf16 %v8389_v62, %v8388_v10  ;;  %v2181_v8 = vadd.bf16 %v2117_v1, %v2044_v52  ;;  %v1949_v1 = vmul.bf16 %v4652_v42, %v6252_v35  ;;  %v883_v10 = vsel %vm790_vm0, %v671_v44, %v672_v27 }
 0x1c1   : > { %v1190_v11 = vsel %vm1097_vm1, %v980_v23, %v981_v61  ;;  %v2086_v24 = vmul.bf16 %v4655_v43, %v6254_v29  ;;  %v6448_v18 = vpack.c.bf16 %v883_v10, %v884_v21  ;;  %v2224_v25 = vmul.bf16 %v4702_v60, %v6301_v50 }
 0x1c2   : > { %v1738_v6 = vadd.bf16 %v8390_v3, %v1601_v9  ;;  %v2319_v52 = vadd.bf16 %v2255_v26, %v2181_v8  ;;  %v6450_v62 = vpack.c.bf16 %v1190_v11, %v1191_v13  ;;  %v581_v26 = vunpack.c.h.bf16 %v6359_v15 }
 0x1c3   : > { %v582_v8 = vunpack.c.h.bf16 %v6241_v14  ;;  %v2361_v21 = vmul.bf16 %v4712_v48, %v6448_v18  ;;  %v8392_v10 = vmul.bf16 %v4643_v37, %v6090_v0  ;;  %v8393_v0 = vmul.bf16 %v4646_v38, %v6095_v45 }
 0x1c4   : > { %v1876_v2 = vadd.bf16 %v1812_v55, %v1738_v6  ;;  %v2456_v9 = vadd.bf16 %v2392_v53, %v2319_v52  ;;  %v2498_v55 = vmul.bf16 %v4723_v57, %v6450_v62  ;;  %v751_v53 = vrot.slane %v581_v26, 1 }
 0x1c5   : > { %v752_v13 = vrot.slane %v582_v8, 1  ;;  %v1060_v6 = vrot.slane %v581_v26, 2  ;;  %v1061_v14 = vrot.slane %v582_v8, 2 }
 0x1c6   : > { %v2013_v27 = vadd.bf16 %v1949_v1, %v1876_v2  ;;  %v2593_v61 = vadd.bf16 %v2529_v33, %v2456_v9  ;;  %v820_v33 = vsel %vm790_vm0, %v6380_v5, %v751_v53  ;;  %v8391_v1 = vmul.bf16 %v4640_v36, %v5965_v20  ;;  %v6487_v5 = vld [vmem:[%s4517_s28 + $0x108] sm:$0xff]  }
 0x1c7   : > { %v819_v2 = vsel %vm790_vm0, %v751_v53, %v752_v13  ;;  %v1126_v26 = vsel %vm1097_vm1, %v1060_v6, %v1061_v14  ;;  %v1127_v8 = vsel %vm1097_vm1, %v6382_v59, %v1060_v6  ;;  %v2118_v53 = vmul.bf16 %v4655_v43, %v6290_v56  ;;  %v6499_v13 = vld [vmem:[%s4517_s28 + $0x110] sm:$0xff]  }
 0x1c8   : > { %v2150_v3 = vadd.bf16 %v2086_v24, %v2013_v27  ;;  %3765 = vmatprep.mubr.bf16.mxu1 %v2593_v61  ;;  %v1633_v11 = vadd.bf16 %v8392_v10, %v8391_v1  ;;  %v1844_v24 = vmul.bf16 %v4649_v41, %v6155_v58  ;;  %v6484_v27 = vpack.c.bf16 %v819_v2, %v820_v33 }
 0x1c9   : > { %v6489_v20 = vpack.c.bf16 %v1126_v26, %v1127_v8  ;;  %v2256_v6 = vmul.bf16 %v4702_v60, %v6359_v15  ;;  %v503_v1 = vunpack.c.l.bf16 %v6487_v5 }
 0x1ca   : > { %v2288_v9 = vadd.bf16 %v2224_v25, %v2150_v3  ;;  %v1770_v61 = vadd.bf16 %v8393_v0, %v1633_v11  ;;  %v1981_v25 = vmul.bf16 %v4652_v42, %v6286_v30  ;;  %v2393_v14 = vmul.bf16 %v4712_v48, %v6484_v27 }
 0x1cb   : > { %v2530_v33 = vmul.bf16 %v4723_v57, %v6489_v20  ;;  %v505_v11 = vunpack.c.l.bf16 %v6499_v13  ;;  %v673_v26 = vrot.slane %v503_v1, 1  ;;  %v982_v8 = vrot.slane %v503_v1, 2  ;;  %v6532_v1 = vld [vmem:[%s4517_s28 + $0x288] sm:$0xff]  }
 0x1cc   : > { %v2425_v3 = vadd.bf16 %v2361_v21, %v2288_v9  ;;  %v1908_v2 = vadd.bf16 %v1844_v24, %v1770_v61  ;;  %v504_v21 = vunpack.c.h.bf16 %v6487_v5  ;;  %v8394_v0 = vmul.bf16 %v4640_v36, %v6093_v7 }
 0x1cd   : > { %v8395_v24 = vmul.bf16 %v4643_v37, %v6150_v40  ;;  %v6520_v59 = vrot.slane %v505_v11, 1  ;;  %v1813_v40 = vmul.bf16 %v4649_v41, %v6298_v19 }
 0x1ce   : > { %v2562_v10 = vadd.bf16 %v2498_v55, %v2425_v3  ;;  %v2045_v9 = vadd.bf16 %v1981_v25, %v1908_v2  ;;  %v674_v45 = vrot.slane %v504_v21, 1  ;;  %v983_v55 = vrot.slane %v504_v21, 2 }
 0x1cf   : > { %v1602_v61 = vadd.bf16 %v8395_v24, %v8394_v0  ;;  %v6522_v3 = vrot.slane %v505_v11, 2  ;;  %v8396_v2 = vmul.bf16 %v4646_v38, %v6152_v51  ;;  %v583_v25 = vunpack.c.l.bf16 %v6532_v1 }
 0x1d0   : > { %3702 = vmatmul.mubr.bf16.gmra.mrb[32].mxu0 %v2562_v10  ;;  %v2182_v52 = vadd.bf16 %v2118_v53, %v2045_v9  ;;  %v881_v10 = vsel %vm790_vm0, %v674_v45, %v6520_v59  ;;  %v882_v21 = vsel %vm790_vm0, %v673_v26, %v674_v45  ;;  %v1189_v51 = vsel %vm1097_vm1, %v982_v8, %v983_v55 }
 0x1d1   : > { %v1739_v7 = vadd.bf16 %v8396_v2, %v1602_v61  ;;  %v1188_v53 = vsel %vm1097_vm1, %v983_v55, %v6522_v3  ;;  %v6544_v9 = vpack.c.bf16 %v881_v10, %v882_v21  ;;  %v6549_v61 = vld [vmem:[%s4517_s28 + $0x290] sm:$0xff]   ;;  %v1950_v2 = vmul.bf16 %v4652_v42, %v6347_v54 }
 0x1d2   : > { %v2320_v11 = vadd.bf16 %v2256_v6, %v2182_v52  ;;  %v6546_v0 = vpack.c.bf16 %v1188_v53, %v1189_v51  ;;  %v2087_v45 = vmul.bf16 %v4655_v43, %v6352_v39  ;;  %v2225_v26 = vmul.bf16 %v4702_v60, %v6487_v5 }
 0x1d3   : > { %v1877_v24 = vadd.bf16 %v1813_v40, %v1739_v7  ;;  %v2362_v55 = vmul.bf16 %v4712_v48, %v6544_v9  ;;  %v584_v10 = vunpack.c.h.bf16 %v6532_v1  ;;  %v585_v21 = vunpack.c.l.bf16 %v6549_v61 }
 0x1d4   : > { %v2457_v8 = vadd.bf16 %v2393_v14, %v2320_v11  ;;  %v2499_v40 = vmul.bf16 %v4723_v57, %v6546_v0  ;;  %v753_v51 = vrot.slane %v583_v25, 1  ;;  %v1062_v14 = vrot.slane %v583_v25, 2 }
 0x1d5   : > { %v2014_v7 = vadd.bf16 %v1950_v2, %v1877_v24  ;;  %v754_v23 = vrot.slane %v584_v10, 1  ;;  %v6568_v52 = vrot.slane %v585_v21, 1  ;;  %v1063_v6 = vrot.slane %v584_v10, 2 }
 0x1d6   : > { %v2594_v53 = vadd.bf16 %v2530_v33, %v2457_v8  ;;  %v6570_v44 = vrot.slane %v585_v21, 2  ;;  %v8397_v2 = vmul.bf16 %v4640_v36, %v6138_v47  ;;  %v8398_v33 = vmul.bf16 %v4643_v37, %v6198_v28 }
 0x1d7   : > { %v2151_v11 = vadd.bf16 %v2087_v45, %v2014_v7  ;;  %v1845_v25 = vmul.bf16 %v4649_v41, %v6350_v22  ;;  %v817_v7 = vsel %vm790_vm0, %v754_v23, %v6568_v52  ;;  %v818_v10 = vsel %vm790_vm0, %v753_v51, %v754_v23 }
 0x1d8   : > { %3766 = vmatmul.mubr.bf16.gmra.mrb[32].mxu1 %v2594_v53  ;;  %v1634_v8 = vadd.bf16 %v8398_v33, %v8397_v2  ;;  %v1125_v21 = vsel %vm1097_vm1, %v1062_v14, %v1063_v6  ;;  %v1124_v47 = vsel %vm1097_vm1, %v1063_v6, %v6570_v44  ;;  %v6592_v28 = vpack.c.bf16 %v817_v7, %v818_v10  ;;  %v6600_v2 = vld [vmem:[%s4517_s28 + $0x118] ss:$24 sps:$4 sm:$0xff]  }
 0x1d9   : > { %v2289_v45 = vadd.bf16 %v2225_v26, %v2151_v11  ;;  %v8399_v53 = vmul.bf16 %v4646_v38, %v6208_v49  ;;  %v1982_v11 = vmul.bf16 %v4652_v42, %v6401_v34  ;;  %v6602_v23 = vpack.c.bf16 %v1124_v47, %v1125_v21 }
 0x1da   : > { %v2119_v51 = vmul.bf16 %v4655_v43, %v6403_v32  ;;  %v2257_v6 = vmul.bf16 %v4702_v60, %v6532_v1  ;;  %v2394_v49 = vmul.bf16 %v4712_v48, %v6592_v28  ;;  %v507_v21 = vunpack.c.l.bf16 %v6600_v2 }
 0x1db   : > { %v1771_v26 = vadd.bf16 %v8399_v53, %v1634_v8  ;;  %v2426_v33 = vadd.bf16 %v2362_v55, %v2289_v45  ;;  %v506_v8 = vunpack.c.h.bf16 %v6499_v13  ;;  %v2531_v45 = vmul.bf16 %v4723_v57, %v6602_v23 }
 0x1dc   : > { %v8400_v14 = vmul.bf16 %v4640_v36, %v6105_v63  ;;  %v1814_v55 = vmul.bf16 %v4649_v41, %v6301_v50  ;;  %v6635_v63 = vld [vmem:[%s4517_s28 + $0x298] ss:$24 sps:$4 sm:$0xff]  }
 0x1dd   : > { %v1909_v7 = vadd.bf16 %v1845_v25, %v1771_v26  ;;  %v2563_v10 = vadd.bf16 %v2499_v40, %v2426_v33  ;;  %v676_v53 = vrot.slane %v506_v8, 1  ;;  %v985_v24 = vrot.slane %v506_v8, 2 }
 0x1de   : > { %v677_v25 = vrot.slane %v507_v21, 1  ;;  %v986_v26 = vrot.slane %v507_v21, 2  ;;  %v8401_v40 = vmul.bf16 %v4643_v37, %v6252_v35 }
 0x1df   : > { %v2046_v47 = vadd.bf16 %v1982_v11, %v1909_v7  ;;  %3705 = vmatprep.mubr.bf16.mxu0 %v2563_v10  ;;  %v880_v11 = vsel %vm790_vm0, %v6520_v59, %v676_v53  ;;  %v1187_v7 = vsel %vm1097_vm1, %v6522_v3, %v985_v24  ;;  %v1951_v59 = vmul.bf16 %v4652_v42, %v6448_v18 }
 0x1e0   : > { %v1603_v33 = vadd.bf16 %v8401_v40, %v8400_v14  ;;  %v879_v35 = vsel %vm790_vm0, %v676_v53, %v677_v25  ;;  %v1186_v14 = vsel %vm1097_vm1, %v985_v24, %v986_v26  ;;  %v2088_v40 = vmul.bf16 %v4655_v43, %v6450_v62 }
 0x1e1   : > { %v2183_v12 = vadd.bf16 %v2119_v51, %v2046_v47  ;;  %v8402_v51 = vmul.bf16 %v4646_v38, %v6254_v29  ;;  %v6646_v3 = vpack.c.bf16 %v879_v35, %v880_v11  ;;  %v6648_v47 = vpack.c.bf16 %v1186_v14, %v1187_v7 }
 0x1e2   : > { %v2226_v53 = vmul.bf16 %v4702_v60, %v6499_v13  ;;  %v586_v24 = vunpack.c.h.bf16 %v6549_v61  ;;  %v587_v29 = vunpack.c.l.bf16 %v6635_v63 }
 0x1e3   : > { %v1740_v10 = vadd.bf16 %v8402_v51, %v1603_v33  ;;  %v2321_v21 = vadd.bf16 %v2257_v6, %v2183_v12  ;;  %v2363_v6 = vmul.bf16 %v4712_v48, %v6646_v3 }
 0x1e4   : > { %v756_v11 = vrot.slane %v586_v24, 1  ;;  %v757_v7 = vrot.slane %v587_v29, 1  ;;  %v1065_v14 = vrot.slane %v586_v24, 2 }
 0x1e5   : > { %v1878_v8 = vadd.bf16 %v1814_v55, %v1740_v10  ;;  %v2458_v25 = vadd.bf16 %v2394_v49, %v2321_v21  ;;  %v2500_v55 = vmul.bf16 %v4723_v57, %v6648_v47  ;;  %v1066_v49 = vrot.slane %v587_v29, 2 }
 0x1e6   : > { %v815_v10 = vsel %vm790_vm0, %v756_v11, %v757_v7  ;;  %v816_v21 = vsel %vm790_vm0, %v6568_v52, %v756_v11  ;;  %v6692_v11 = vld [vmem:[%s4517_s28 + $0x120] sm:$0xff]   ;;  %v6695_v7 = vld [vmem:[%s4517_s28 + $0x128] sm:$0xff]  }
 0x1e7   : > { %v2015_v33 = vadd.bf16 %v1951_v59, %v1878_v8  ;;  %v2595_v35 = vadd.bf16 %v2531_v45, %v2458_v25  ;;  %v8403_v8 = vmul.bf16 %v4640_v36, %v6155_v58  ;;  %v8404_v59 = vmul.bf16 %v4643_v37, %v6286_v30 }
 0x1e8   : > { %v1122_v45 = vsel %vm1097_vm1, %v1065_v14, %v1066_v49  ;;  %v6680_v24 = vpack.c.bf16 %v815_v10, %v816_v21  ;;  %v8405_v58 = vmul.bf16 %v4646_v38, %v6290_v56  ;;  %v2258_v56 = vmul.bf16 %v4702_v60, %v6549_v61 }
 0x1e9   : > { %v2152_v51 = vadd.bf16 %v2088_v40, %v2015_v33  ;;  %v1635_v12 = vadd.bf16 %v8404_v59, %v8403_v8  ;;  %3769 = vmatprep.mubr.bf16.mxu1 %v2595_v35  ;;  %v1123_v40 = vsel %vm1097_vm1, %v6570_v44, %v1065_v14  ;;  %v1846_v33 = vmul.bf16 %v4649_v41, %v6359_v15 }
 0x1ea   : > { %v6684_v25 = vpack.c.bf16 %v1122_v45, %v1123_v40  ;;  %v1983_v35 = vmul.bf16 %v4652_v42, %v6484_v27  ;;  %v508_v21 = vunpack.c.l.bf16 %v6692_v11  ;;  %v509_v8 = vunpack.c.h.bf16 %v6692_v11 }
 0x1eb   : > { %v2290_v29 = vadd.bf16 %v2226_v53, %v2152_v51  ;;  %v1772_v30 = vadd.bf16 %v8405_v58, %v1635_v12  ;;  %v2120_v53 = vmul.bf16 %v4655_v43, %v6489_v20  ;;  %v2395_v51 = vmul.bf16 %v4712_v48, %v6680_v24 }
 0x1ec   : > { %v2532_v10 = vmul.bf16 %v4723_v57, %v6684_v25  ;;  %v510_v59 = vunpack.c.l.bf16 %v6695_v7  ;;  %v987_v44 = vrot.slane %v508_v21, 2  ;;  %v988_v26 = vrot.slane %v509_v8, 2 }
 0x1ed   : > { %v2427_v12 = vadd.bf16 %v2363_v6, %v2290_v29  ;;  %v1910_v49 = vadd.bf16 %v1846_v33, %v1772_v30  ;;  %v8406_v6 = vmul.bf16 %v4640_v36, %v6298_v19  ;;  %v8407_v29 = vmul.bf16 %v4643_v37, %v6347_v54 }
 0x1ee   : > { %v678_v30 = vrot.slane %v508_v21, 1  ;;  %v679_v33 = vrot.slane %v509_v8, 1  ;;  %v6720_v14 = vrot.slane %v510_v59, 1  ;;  %v6722_v46 = vrot.slane %v510_v59, 2 }
 0x1ef   : > { %v2564_v45 = vadd.bf16 %v2500_v55, %v2427_v12  ;;  %v2047_v40 = vadd.bf16 %v1983_v35, %v1910_v49  ;;  %v1604_v58 = vadd.bf16 %v8407_v29, %v8406_v6  ;;  %v8408_v35 = vmul.bf16 %v4646_v38, %v6352_v39 }
 0x1f0   : > { %v877_v19 = vsel %vm790_vm0, %v679_v33, %v6720_v14  ;;  %v878_v54 = vsel %vm790_vm0, %v678_v30, %v679_v33  ;;  %v1184_v21 = vsel %vm1097_vm1, %v988_v26, %v6722_v46  ;;  %v1185_v8 = vsel %vm1097_vm1, %v987_v44, %v988_v26 }
 0x1f1   : > { %3706 = vmatmul.mubr.bf16.gmra.mrb[36].mxu0 %v2564_v45  ;;  %v2184_v52 = vadd.bf16 %v2120_v53, %v2047_v40  ;;  %v1741_v12 = vadd.bf16 %v8408_v35, %v1604_v58  ;;  %v1815_v53 = vmul.bf16 %v4649_v41, %v6487_v5  ;;  %v6741_v59 = vpack.c.bf16 %v877_v19, %v878_v54  ;;  %v6744_v45 = vld [vmem:[%s4517_s28 + $0x2a0] sm:$0xff]  }
 0x1f2   : > { %v6746_v40 = vpack.c.bf16 %v1184_v21, %v1185_v8  ;;  %v1952_v39 = vmul.bf16 %v4652_v42, %v6544_v9  ;;  %v2227_v26 = vmul.bf16 %v4702_v60, %v6692_v11  ;;  %v588_v54 = vunpack.c.l.bf16 %v6744_v45 }
 0x1f3   : > { %v2322_v49 = vadd.bf16 %v2258_v56, %v2184_v52  ;;  %v1879_v6 = vadd.bf16 %v1815_v53, %v1741_v12  ;;  %v2089_v52 = vmul.bf16 %v4655_v43, %v6546_v0  ;;  %v6753_v56 = vld [vmem:[%s4517_s28 + $0x2a8] sm:$0xff]   ;;  %v2364_v44 = vmul.bf16 %v4712_v48, %v6741_v59 }
 0x1f4   : > { %v2501_v19 = vmul.bf16 %v4723_v57, %v6746_v40  ;;  %v590_v12 = vunpack.c.l.bf16 %v6753_v56  ;;  %v1067_v21 = vrot.slane %v588_v54, 2  ;;  %v8409_v8 = vmul.bf16 %v4640_v36, %v6350_v22 }
 0x1f5   : > { %v2459_v29 = vadd.bf16 %v2395_v51, %v2322_v49  ;;  %v2016_v33 = vadd.bf16 %v1952_v39, %v1879_v6  ;;  %v589_v51 = vunpack.c.h.bf16 %v6744_v45  ;;  %v758_v49 = vrot.slane %v588_v54, 1 }
 0x1f6   : > { %v8410_v30 = vmul.bf16 %v4643_v37, %v6401_v34  ;;  %v6774_v58 = vrot.slane %v590_v12, 1  ;;  %v1847_v22 = vmul.bf16 %v4649_v41, %v6532_v1 }
 0x1f7   : > { %v2596_v35 = vadd.bf16 %v2532_v10, %v2459_v29  ;;  %v2153_v53 = vadd.bf16 %v2089_v52, %v2016_v33  ;;  %v759_v39 = vrot.slane %v589_v51, 1  ;;  %v1068_v55 = vrot.slane %v589_v51, 2 }
 0x1f8   : > { %v1636_v6 = vadd.bf16 %v8410_v30, %v8409_v8  ;;  %v6776_v10 = vrot.slane %v590_v12, 2  ;;  %v8411_v33 = vmul.bf16 %v4646_v38, %v6403_v32  ;;  %v1984_v8 = vmul.bf16 %v4652_v42, %v6592_v28 }
 0x1f9   : > { %3770 = vmatmul.mubr.bf16.gmra.mrb[36].mxu1 %v2596_v35  ;;  %v2291_v29 = vadd.bf16 %v2227_v26, %v2153_v53  ;;  %v813_v34 = vsel %vm790_vm0, %v759_v39, %v6774_v58  ;;  %v814_v30 = vsel %vm790_vm0, %v758_v49, %v759_v39  ;;  %v1121_v35 = vsel %vm1097_vm1, %v1067_v21, %v1068_v55 }
 0x1fa   : > { %v1773_v54 = vadd.bf16 %v8411_v33, %v1636_v6  ;;  %v1120_v26 = vsel %vm1097_vm1, %v1068_v55, %v6776_v10  ;;  %v6795_v32 = vpack.c.bf16 %v813_v34, %v814_v30  ;;  %v2121_v6 = vmul.bf16 %v4655_v43, %v6602_v23  ;;  %v7020_v55 = vpop.f32.mrb[0].mxu0 }
 0x1fb   : > { %v2428_v51 = vadd.bf16 %v2364_v44, %v2291_v29  ;;  %v6797_v12 = vpack.c.bf16 %v1120_v26, %v1121_v35  ;;  %v2259_v49 = vmul.bf16 %v4702_v60, %v6744_v45  ;;  %v511_v39 = vunpack.c.h.bf16 %v6695_v7  ;;  %8426 = vst [vmem:[#allocation22_spill] sm:$0xff] %v7020_v55 }
 0x1fc   : > { %v1911_v53 = vadd.bf16 %v1847_v22, %v1773_v54  ;;  %v2396_v21 = vmul.bf16 %v4712_v48, %v6795_v32  ;;  %v512_v22 = vunpack.c.h.bf16 %v6600_v2  ;;  %v8413_v26 = vmul.bf16 %v4643_v37, %v6448_v18 }
 0x1fd   : > { %v2565_v33 = vadd.bf16 %v2501_v19, %v2428_v51  ;;  %v2533_v54 = vmul.bf16 %v4723_v57, %v6797_v12  ;;  %v681_v34 = vrot.slane %v511_v39, 1  ;;  %v990_v30 = vrot.slane %v511_v39, 2 }
 0x1fe   : > { %v2048_v29 = vadd.bf16 %v1984_v8, %v1911_v53  ;;  %v8412_v19 = vmul.bf16 %v4640_v36, %v6301_v50  ;;  %v1816_v51 = vmul.bf16 %v4649_v41, %v6499_v13  ;;  %v682_v53 = vrot.slane %v512_v22, 1 }
 0x1ff   : > { %3709 = vmatprep.mubr.bf16.mxu0 %v2565_v33  ;;  %v876_v8 = vsel %vm790_vm0, %v6720_v14, %v681_v34  ;;  %v991_v2 = vrot.slane %v512_v22, 2  ;;  %v1183_v39 = vsel %vm1097_vm1, %v6722_v46, %v990_v30  ;;  %v8414_v18 = vmul.bf16 %v4646_v38, %v6450_v62 }
 0x200   : > { %v1605_v35 = vadd.bf16 %v8413_v26, %v8412_v19  ;;  %v2185_v44 = vadd.bf16 %v2121_v6, %v2048_v29  ;;  %v1953_v6 = vmul.bf16 %v4652_v42, %v6646_v3  ;;  %v875_v19 = vsel %vm790_vm0, %v681_v34, %v682_v53 }
 0x201   : > { %v1182_v14 = vsel %vm1097_vm1, %v990_v30, %v991_v2  ;;  %v2090_v46 = vmul.bf16 %v4655_v43, %v6648_v47  ;;  %v6842_v22 = vpack.c.bf16 %v875_v19, %v876_v8  ;;  %v2228_v62 = vmul.bf16 %v4702_v60, %v6695_v7 }
 0x202   : > { %v1742_v33 = vadd.bf16 %v8414_v18, %v1605_v35  ;;  %v2323_v29 = vadd.bf16 %v2259_v49, %v2185_v44  ;;  %v6844_v26 = vpack.c.bf16 %v1182_v14, %v1183_v39  ;;  %v591_v49 = vunpack.c.h.bf16 %v6753_v56 }
 0x203   : > { %v592_v44 = vunpack.c.h.bf16 %v6635_v63  ;;  %v2365_v8 = vmul.bf16 %v4712_v48, %v6842_v22  ;;  %v8416_v19 = vmul.bf16 %v4643_v37, %v6484_v27  ;;  %v8417_v27 = vmul.bf16 %v4646_v38, %v6489_v20 }
 0x204   : > { %v1880_v50 = vadd.bf16 %v1816_v51, %v1742_v33  ;;  %v2460_v35 = vadd.bf16 %v2396_v21, %v2323_v29  ;;  %v2502_v51 = vmul.bf16 %v4723_v57, %v6844_v26  ;;  %v761_v21 = vrot.slane %v591_v49, 1 }
 0x205   : > { %v762_v39 = vrot.slane %v592_v44, 1  ;;  %v1070_v33 = vrot.slane %v591_v49, 2  ;;  %v1071_v63 = vrot.slane %v592_v44, 2 }
 0x206   : > { %v2017_v53 = vadd.bf16 %v1953_v6, %v1880_v50  ;;  %v2597_v2 = vadd.bf16 %v2533_v54, %v2460_v35  ;;  %v812_v54 = vsel %vm790_vm0, %v6774_v58, %v761_v21  ;;  %v8415_v6 = vmul.bf16 %v4640_v36, %v6359_v15  ;;  %v6881_v58 = vld [vmem:[%s4517_s28 + $0x138] sm:$0xff]  }
 0x207   : > { %v811_v50 = vsel %vm790_vm0, %v761_v21, %v762_v39  ;;  %v1118_v49 = vsel %vm1097_vm1, %v1070_v33, %v1071_v63  ;;  %v1119_v44 = vsel %vm1097_vm1, %v6776_v10, %v1070_v33  ;;  %v2122_v21 = vmul.bf16 %v4655_v43, %v6684_v25  ;;  %v6893_v39 = vld [vmem:[%s4517_s28 + $0x140] sm:$0xff]  }
 0x208   : > { %v2154_v18 = vadd.bf16 %v2090_v46, %v2017_v53  ;;  %3773 = vmatprep.mubr.bf16.mxu1 %v2597_v2  ;;  %v1637_v14 = vadd.bf16 %v8416_v19, %v8415_v6  ;;  %v1848_v46 = vmul.bf16 %v4649_v41, %v6549_v61  ;;  %v6878_v53 = vpack.c.bf16 %v811_v50, %v812_v54 }
 0x209   : > { %v6883_v15 = vpack.c.bf16 %v1118_v49, %v1119_v44  ;;  %v2260_v33 = vmul.bf16 %v4702_v60, %v6753_v56  ;;  %v513_v6 = vunpack.c.l.bf16 %v6881_v58 }
 0x20a   : > { %v2292_v35 = vadd.bf16 %v2228_v62, %v2154_v18  ;;  %v1774_v2 = vadd.bf16 %v8417_v27, %v1637_v14  ;;  %v1985_v62 = vmul.bf16 %v4652_v42, %v6680_v24  ;;  %v2397_v63 = vmul.bf16 %v4712_v48, %v6878_v53 }
 0x20b   : > { %v2534_v54 = vmul.bf16 %v4723_v57, %v6883_v15  ;;  %v515_v14 = vunpack.c.l.bf16 %v6893_v39  ;;  %v683_v49 = vrot.slane %v513_v6, 1  ;;  %v992_v44 = vrot.slane %v513_v6, 2  ;;  %v6926_v6 = vld [vmem:[%s4517_s28 + $0x2b8] sm:$0xff]  }
 0x20c   : > { %v2429_v18 = vadd.bf16 %v2365_v8, %v2292_v35  ;;  %v1912_v50 = vadd.bf16 %v1848_v46, %v1774_v2  ;;  %v514_v8 = vunpack.c.h.bf16 %v6881_v58  ;;  %v8418_v27 = vmul.bf16 %v4640_v36, %v6487_v5 }
 0x20d   : > { %v8419_v46 = vmul.bf16 %v4643_v37, %v6544_v9  ;;  %v6914_v10 = vrot.slane %v515_v14, 1  ;;  %v1817_v9 = vmul.bf16 %v4649_v41, %v6692_v11 }
 0x20e   : > { %v2566_v19 = vadd.bf16 %v2502_v51, %v2429_v18  ;;  %v2049_v35 = vadd.bf16 %v1985_v62, %v1912_v50  ;;  %v684_v20 = vrot.slane %v514_v8, 1  ;;  %v993_v51 = vrot.slane %v514_v8, 2 }
 0x20f   : > { %v1606_v2 = vadd.bf16 %v8419_v46, %v8418_v27  ;;  %v6916_v18 = vrot.slane %v515_v14, 2  ;;  %v8420_v50 = vmul.bf16 %v4646_v38, %v6546_v0  ;;  %v593_v62 = vunpack.c.l.bf16 %v6926_v6 }
 0x210   : > { %3710 = vmatmul.mubr.bf16.gmra.mrb[40].mxu0 %v2566_v19  ;;  %v2186_v29 = vadd.bf16 %v2122_v21, %v2049_v35  ;;  %v873_v19 = vsel %vm790_vm0, %v684_v20, %v6914_v10  ;;  %v874_v8 = vsel %vm790_vm0, %v683_v49, %v684_v20  ;;  %v1181_v0 = vsel %vm1097_vm1, %v992_v44, %v993_v51 }
 0x211   : > { %v1743_v5 = vadd.bf16 %v8420_v50, %v1606_v2  ;;  %v1180_v21 = vsel %vm1097_vm1, %v993_v51, %v6916_v18  ;;  %v6938_v35 = vpack.c.bf16 %v873_v19, %v874_v8  ;;  %v6943_v2 = vld [vmem:[%s4517_s28 + $0x2c0] sm:$0xff]   ;;  %v1954_v50 = vmul.bf16 %v4652_v42, %v6741_v59 }
 0x212   : > { %v2324_v14 = vadd.bf16 %v2260_v33, %v2186_v29  ;;  %v6940_v27 = vpack.c.bf16 %v1180_v21, %v1181_v0  ;;  %v2091_v20 = vmul.bf16 %v4655_v43, %v6746_v40  ;;  %v2229_v49 = vmul.bf16 %v4702_v60, %v6881_v58 }
 0x213   : > { %v1881_v46 = vadd.bf16 %v1817_v9, %v1743_v5  ;;  %v2366_v51 = vmul.bf16 %v4712_v48, %v6938_v35  ;;  %v594_v19 = vunpack.c.h.bf16 %v6926_v6  ;;  %v595_v8 = vunpack.c.l.bf16 %v6943_v2 }
 0x214   : > { %v2461_v44 = vadd.bf16 %v2397_v63, %v2324_v14  ;;  %v2503_v9 = vmul.bf16 %v4723_v57, %v6940_v27  ;;  %v763_v0 = vrot.slane %v593_v62, 1  ;;  %v1072_v63 = vrot.slane %v593_v62, 2 }
 0x215   : > { %v2018_v5 = vadd.bf16 %v1954_v50, %v1881_v46  ;;  %v764_v30 = vrot.slane %v594_v19, 1  ;;  %v6962_v29 = vrot.slane %v595_v8, 1  ;;  %v1073_v33 = vrot.slane %v594_v19, 2 }
 0x216   : > { %v2598_v21 = vadd.bf16 %v2534_v54, %v2461_v44  ;;  %v6964_v34 = vrot.slane %v595_v8, 2  ;;  %v8421_v50 = vmul.bf16 %v4640_v36, %v6532_v1  ;;  %v8422_v54 = vmul.bf16 %v4643_v37, %v6592_v28 }
 0x217   : > { %v2155_v14 = vadd.bf16 %v2091_v20, %v2018_v5  ;;  %v1849_v62 = vmul.bf16 %v4649_v41, %v6744_v45  ;;  %v809_v5 = vsel %vm790_vm0, %v764_v30, %v6962_v29  ;;  %v810_v19 = vsel %vm790_vm0, %v763_v0, %v764_v30 }
 0x218   : > { %3774 = vmatmul.mubr.bf16.gmra.mrb[40].mxu1 %v2598_v21  ;;  %v1638_v44 = vadd.bf16 %v8422_v54, %v8421_v50  ;;  %v1117_v8 = vsel %vm1097_vm1, %v1072_v63, %v1073_v33  ;;  %v1116_v1 = vsel %vm1097_vm1, %v1073_v33, %v6964_v34  ;;  %v6986_v28 = vpack.c.bf16 %v809_v5, %v810_v19  ;;  %v6994_v50 = vld [vmem:[%s4517_s28 + $0x148] ss:$24 sps:$4 sm:$0xff]  }
 0x219   : > { %v2293_v20 = vadd.bf16 %v2229_v49, %v2155_v14  ;;  %v8423_v21 = vmul.bf16 %v4646_v38, %v6602_v23  ;;  %v1986_v14 = vmul.bf16 %v4652_v42, %v6795_v32  ;;  %v6996_v30 = vpack.c.bf16 %v1116_v1, %v1117_v8 }
 0x21a   : > { %v2123_v0 = vmul.bf16 %v4655_v43, %v6797_v12  ;;  %v2261_v33 = vmul.bf16 %v4702_v60, %v6926_v6  ;;  %v2398_v23 = vmul.bf16 %v4712_v48, %v6986_v28  ;;  %v517_v8 = vunpack.c.l.bf16 %v6994_v50 }
 0x21b   : > { %v1775_v49 = vadd.bf16 %v8423_v21, %v1638_v44  ;;  %v2430_v54 = vadd.bf16 %v2366_v51, %v2293_v20  ;;  %v516_v44 = vunpack.c.h.bf16 %v6893_v39  ;;  %v2535_v20 = vmul.bf16 %v4723_v57, %v6996_v30 }
 0x21c   : > { %v8424_v63 = vmul.bf16 %v4640_v36, %v6499_v13  ;;  %v1818_v51 = vmul.bf16 %v4649_v41, %v6695_v7 }
 0x21d   : > { %v1913_v5 = vadd.bf16 %v1849_v62, %v1775_v49  ;;  %v2567_v19 = vadd.bf16 %v2503_v9, %v2430_v54  ;;  %v686_v21 = vrot.slane %v516_v44, 1  ;;  %v995_v46 = vrot.slane %v516_v44, 2  ;;  %v7031_v44 = vld [vmem:[%s4517_s28 + $0x2c8] ss:$24 sps:$4 sm:$0xff]  }
 0x21e   : > { %v687_v62 = vrot.slane %v517_v8, 1  ;;  %v996_v49 = vrot.slane %v517_v8, 2  ;;  %v8425_v9 = vmul.bf16 %v4643_v37, %v6646_v3  ;;  %v7033_v3 = vpop.f32.mrb[0].mxu1 }
 0x21f   : > { %v2050_v1 = vadd.bf16 %v1986_v14, %v1913_v5  ;;  %3713 = vmatprep.mubr.bf16.mxu0 %v2567_v19  ;;  %v872_v14 = vsel %vm790_vm0, %v6914_v10, %v686_v21  ;;  %v1179_v5 = vsel %vm1097_vm1, %v6916_v18, %v995_v46  ;;  %8427 = vst [vmem:[#allocation25_spill] sm:$0xff] %v7033_v3 }
 0x220   : > { %v1607_v54 = vadd.bf16 %v8425_v9, %v8424_v63  ;;  %v7035_v63 = vpop.f32.mrb[1].mxu0  ;;  %v1178_v19 = vsel %vm1097_vm1, %v995_v46, %v996_v49  ;;  %v8429_v10 = vmul.bf16 %v4646_v38, %v6648_v47  ;;  %v1955_v18 = vmul.bf16 %v4652_v42, %v6842_v22 }
 0x221   : > { %v2187_v52 = vadd.bf16 %v2123_v0, %v2050_v1  ;;  %8428 = vst [vmem:[#allocation19_spill] sm:$0xff] %v7035_v63  ;;  %v871_v0 = vsel %vm790_vm0, %v686_v21, %v687_v62  ;;  %v7046_v1 = vpop.f32.mrb[1].mxu1  ;;  %v7048_v9 = vpop.f32.mrb[2].mxu0  ;;  %v7052_v63 = vpack.c.bf16 %v1178_v19, %v1179_v5  ;;  %v2092_v21 = vmul.bf16 %v4655_v43, %v6844_v26 }
 0x222   : > { %v1744_v8 = vadd.bf16 %v8429_v10, %v1607_v54  ;;  %8430 = vst [vmem:[#allocation26_spill] sm:$0xff] %v7046_v1  ;;  %8431 = vst [vmem:[#allocation30_spill] sm:$0xff] %v7048_v9  ;;  %v7050_v3 = vpack.c.bf16 %v871_v0, %v872_v14  ;;  %v7056_v46 = vpop.f32.mrb[2].mxu1  ;;  %v7058_v62 = vpop.f32.mrb[3].mxu0  ;;  %v2230_v49 = vmul.bf16 %v4702_v60, %v6893_v39  ;;  %v596_v54 = vunpack.c.h.bf16 %v6943_v2 }
 0x223   : > { %v2325_v13 = vadd.bf16 %v2261_v33, %v2187_v52  ;;  %8432 = vst [vmem:[#allocation31_spill] sm:$0xff] %v7056_v46  ;;  %8433 = vst [vmem:[#allocation32_spill] sm:$0xff] %v7058_v62  ;;  %v597_v10 = vunpack.c.l.bf16 %v7031_v44  ;;  %v7064_v52 = vpop.f32.mrb[3].mxu1  ;;  %v7066_v33 = vpop.f32.mrb[4].mxu0 }
 0x224   : > { %v1882_v47 = vadd.bf16 %v1818_v51, %v1744_v8  ;;  %8434 = vst [vmem:[#allocation33_spill] sm:$0xff] %v7064_v52  ;;  %8435 = vst [vmem:[#allocation34_spill] sm:$0xff] %v7066_v33  ;;  %v2367_v51 = vmul.bf16 %v4712_v48, %v7050_v3  ;;  %v7074_v19 = vpop.f32.mrb[4].mxu1  ;;  %v7076_v8 = vpop.f32.mrb[5].mxu0  ;;  %v2504_v52 = vmul.bf16 %v4723_v57, %v7052_v63  ;;  %v766_v46 = vrot.slane %v596_v54, 1 }
 0x225   : > { %v2462_v14 = vadd.bf16 %v2398_v23, %v2325_v13  ;;  %8436 = vst [vmem:[#allocation35_spill] sm:$0xff] %v7074_v19  ;;  %8437 = vst [vmem:[#allocation36_spill] sm:$0xff] %v7076_v8  ;;  %v767_v33 = vrot.slane %v597_v10, 1  ;;  %v7080_v23 = vpop.f32.mrb[5].mxu1  ;;  %v7082_v13 = vpop.f32.mrb[6].mxu0  ;;  %v1075_v9 = vrot.slane %v596_v54, 2 }
 0x226   : > { %v2019_v62 = vadd.bf16 %v1955_v18, %v1882_v47  ;;  %8438 = vst [vmem:[#allocation37_spill] sm:$0xff] %v7080_v23  ;;  %8439 = vst [vmem:[#allocation38_spill] sm:$0xff] %v7082_v13  ;;  %v1076_v0 = vrot.slane %v597_v10, 2  ;;  %v7084_v1 = vpop.f32.mrb[6].mxu1  ;;  %v7086_v55 = vpop.f32.mrb[7].mxu0  ;;  %v808_v47 = vsel %vm790_vm0, %v6962_v29, %v766_v46  ;;  %v8442_v23 = vmul.bf16 %v4640_v36, %v6549_v61 }
 0x227   : > { %v2599_v5 = vadd.bf16 %v2535_v20, %v2462_v14  ;;  %8440 = vst [vmem:[#allocation39_spill] sm:$0xff] %v7084_v1  ;;  %8441 = vst [vmem:[#allocation40_spill] sm:$0xff] %v7086_v55  ;;  %v807_v18 = vsel %vm790_vm0, %v766_v46, %v767_v33  ;;  %v8443_v20 = vmul.bf16 %v4643_v37, %v6680_v24  ;;  %v7099_v10 = vpop.f32.mrb[7].mxu1  ;;  %v7101_v14 = vpop.f32.mrb[8].mxu0 }
 0x228   : > { %v2156_v19 = vadd.bf16 %v2092_v21, %v2019_v62  ;;  %8444 = vst [vmem:[#allocation41_spill] sm:$0xff] %v7099_v10  ;;  %8445 = vst [vmem:[#allocation42_spill] sm:$0xff] %v7101_v14  ;;  %v1114_v21 = vsel %vm1097_vm1, %v1075_v9, %v1076_v0  ;;  %v1115_v29 = vsel %vm1097_vm1, %v6964_v34, %v1075_v9  ;;  %v7112_v24 = vpop.f32.mrb[8].mxu1  ;;  %v7114_v62 = vpop.f32.mrb[9].mxu0  ;;  %v7124_v34 = vld [vmem:[%s4517_s28 + $0x150] sm:$0xff]   ;;  %v7127_v9 = vld [vmem:[%s4517_s28 + $0x158] sm:$0xff]  }
 0x229   : > { %v1639_v54 = vadd.bf16 %v8443_v20, %v8442_v23  ;;  %3777 = vmatprep.mubr.bf16.mxu1 %v2599_v5  ;;  %v7108_v46 = vpack.c.bf16 %v807_v18, %v808_v47  ;;  %8446 = vst [vmem:[#allocation43_spill] sm:$0xff] %v7112_v24  ;;  %8447 = vst [vmem:[#allocation44_spill] sm:$0xff] %v7114_v62  ;;  %v7116_v23 = vpack.c.bf16 %v1114_v21, %v1115_v29  ;;  %v7129_v18 = vpop.f32.mrb[9].mxu1  ;;  %v7131_v47 = vpop.f32.mrb[10].mxu0  ;;  %v8551_v4 = vld [vmem:[#allocation19_spill] sm:$0xff] }
 0x22a   : > { %v2294_v33 = vadd.bf16 %v2230_v49, %v2156_v19  ;;  %v8448_v5 = vmul.bf16 %v4646_v38, %v6684_v25  ;;  %v1850_v20 = vmul.bf16 %v4649_v41, %v6753_v56  ;;  %8449 = vst [vmem:[#allocation45_spill] sm:$0xff] %v7129_v18  ;;  %8450 = vst [vmem:[#allocation46_spill] sm:$0xff] %v7131_v47  ;;  %v7141_v21 = vpop.f32.mrb[10].mxu1  ;;  %v7143_v29 = vpop.f32.mrb[11].mxu0  ;;  %v518_v14 = vunpack.c.l.bf16 %v7124_v34 }
 0x22b   : > { %v1987_v19 = vmul.bf16 %v4652_v42, %v6878_v53  ;;  %v2124_v25 = vmul.bf16 %v4655_v43, %v6883_v15  ;;  %8451 = vst [vmem:[#allocation47_spill] sm:$0xff] %v7141_v21  ;;  %8452 = vst [vmem:[#allocation48_spill] sm:$0xff] %v7143_v29  ;;  %v2399_v49 = vmul.bf16 %v4712_v48, %v7108_v46  ;;  %v7149_v18 = vpop.f32.mrb[11].mxu1  ;;  %v7151_v62 = vpop.f32.mrb[12].mxu0  ;;  %v519_v21 = vunpack.c.h.bf16 %v7124_v34 }
 0x22c   : > { %v1776_v0 = vadd.bf16 %v8448_v5, %v1639_v54  ;;  %v2262_v54 = vmul.bf16 %v4702_v60, %v6943_v2  ;;  %v2431_v5 = vadd.bf16 %v2367_v51, %v2294_v33  ;;  %8453 = vst [vmem:[#allocation49_spill] sm:$0xff] %v7149_v18  ;;  %8454 = vst [vmem:[#allocation50_spill] sm:$0xff] %v7151_v62  ;;  %v520_v51 = vunpack.c.l.bf16 %v7127_v9  ;;  %v7158_v33 = vpop.f32.mrb[12].mxu1  ;;  %v7160_v61 = vpop.f32.mrb[13].mxu0 }
 0x22d   : > { %v2536_v24 = vmul.bf16 %v4723_v57, %v7116_v23  ;;  %8455 = vst [vmem:[#allocation51_spill] sm:$0xff] %v7158_v33  ;;  %8456 = vst [vmem:[#allocation52_spill] sm:$0xff] %v7160_v61  ;;  %v8457_v18 = vmul.bf16 %v4640_v36, %v6692_v11  ;;  %v8458_v62 = vmul.bf16 %v4643_v37, %v6741_v59  ;;  %v7168_v10 = vpop.f32.mrb[13].mxu1  ;;  %v7170_v55 = vpop.f32.mrb[14].mxu0  ;;  %v688_v1 = vrot.slane %v518_v14, 1 }
 0x22e   : > { %v1914_v47 = vadd.bf16 %v1850_v20, %v1776_v0  ;;  %v2568_v0 = vadd.bf16 %v2504_v52, %v2431_v5  ;;  %8459 = vst [vmem:[#allocation53_spill] sm:$0xff] %v7168_v10  ;;  %8460 = vst [vmem:[#allocation54_spill] sm:$0xff] %v7170_v55  ;;  %v689_v13 = vrot.slane %v519_v21, 1  ;;  %v7172_v8 = vrot.slane %v520_v51, 1  ;;  %v7174_v16 = vpop.f32.mrb[14].mxu1  ;;  %v7176_v52 = vpop.f32.mrb[15].mxu0 }
 0x22f   : > { %v1608_v29 = vadd.bf16 %v8458_v62, %v8457_v18  ;;  %v997_v33 = vrot.slane %v518_v14, 2  ;;  %8461 = vst [vmem:[#allocation55_spill] sm:$0xff] %v7174_v16  ;;  %8462 = vst [vmem:[#allocation56_spill] sm:$0xff] %v7176_v52  ;;  %v998_v11 = vrot.slane %v519_v21, 2  ;;  %v7182_v62 = vpop.f32.mrb[15].mxu1  ;;  %v7184_v18 = vpop.f32.mrb[16].mxu0 }
 0x230   : > { %v2051_v20 = vadd.bf16 %v1987_v19, %v1914_v47  ;;  %3714 = vmatmul.mubr.bf16.gmra.mrb[44].mxu0 %v2568_v0  ;;  %v7178_v19 = vrot.slane %v520_v51, 2  ;;  %8463 = vst [vmem:[#allocation57_spill] sm:$0xff] %v7182_v62  ;;  %8464 = vst [vmem:[#allocation58_spill] sm:$0xff] %v7184_v18  ;;  %v869_v14 = vsel %vm790_vm0, %v689_v13, %v7172_v8  ;;  %v7196_v0 = vpop.f32.mrb[16].mxu1 }
 0x231   : > { %v870_v5 = vsel %vm790_vm0, %v688_v1, %v689_v13  ;;  %v1819_v51 = vmul.bf16 %v4649_v41, %v6881_v58  ;;  %8466 = vst [vmem:[#allocation59_spill] sm:$0xff] %v7196_v0  ;;  %v1177_v1 = vsel %vm1097_vm1, %v997_v33, %v998_v11 }
 0x232   : > { %v2188_v47 = vadd.bf16 %v2124_v25, %v2051_v20  ;;  %v8465_v25 = vmul.bf16 %v4646_v38, %v6746_v40  ;;  %v7198_v20 = vpop.f32.mrb[17].mxu0  ;;  %v1176_v18 = vsel %vm1097_vm1, %v998_v11, %v7178_v19  ;;  %v7205_v13 = vpack.c.bf16 %v869_v14, %v870_v5  ;;  %v7208_v40 = vld [vmem:[%s4517_s28 + $0x2d0] sm:$0xff]  }
 0x233   : > { %8467 = vst [vmem:[#allocation60_spill] sm:$0xff] %v7198_v20  ;;  %v7214_v62 = vpack.c.bf16 %v1176_v18, %v1177_v1  ;;  %v7221_v20 = vld [vmem:[%s4517_s28 + $0x2d8] sm:$0xff]   ;;  %v2231_v18 = vmul.bf16 %v4702_v60, %v7124_v34  ;;  %v599_v5 = vunpack.c.h.bf16 %v7208_v40  ;;  %v8474_v1 = vmul.bf16 %v4643_v37, %v6795_v32 }
 0x234   : > { %v1745_v21 = vadd.bf16 %v8465_v25, %v1608_v29  ;;  %v2326_v59 = vadd.bf16 %v2262_v54, %v2188_v47  ;;  %v7210_v29 = vpop.f32.mrb[17].mxu1  ;;  %v7212_v25 = vpop.f32.mrb[18].mxu0  ;;  %v1956_v54 = vmul.bf16 %v4652_v42, %v6938_v35  ;;  %v2093_v47 = vmul.bf16 %v4655_v43, %v6940_v27 }
 0x235   : > { %8468 = vst [vmem:[#allocation61_spill] sm:$0xff] %v7210_v29  ;;  %8469 = vst [vmem:[#allocation62_spill] sm:$0xff] %v7212_v25  ;;  %v7223_v33 = vpop.f32.mrb[18].mxu1  ;;  %v7225_v11 = vpop.f32.mrb[19].mxu0  ;;  %v1078_v10 = vrot.slane %v599_v5, 2 }
 0x236   : > { %v1883_v0 = vadd.bf16 %v1819_v51, %v1745_v21  ;;  %8470 = vst [vmem:[#allocation63_spill] sm:$0xff] %v7223_v33  ;;  %8471 = vst [vmem:[#allocation64_spill] sm:$0xff] %v7225_v11  ;;  %v2463_v14 = vadd.bf16 %v2399_v49, %v2326_v59  ;;  %v2368_v21 = vmul.bf16 %v4712_v48, %v7205_v13  ;;  %v7233_v51 = vpop.f32.mrb[19].mxu1  ;;  %v598_v49 = vunpack.c.l.bf16 %v7208_v40 }
 0x237   : > { %8472 = vst [vmem:[#allocation65_spill] sm:$0xff] %v7233_v51  ;;  %v2505_v33 = vmul.bf16 %v4723_v57, %v7214_v62  ;;  %v600_v11 = vunpack.c.l.bf16 %v7221_v20  ;;  %v8473_v51 = vmul.bf16 %v4640_v36, %v6744_v45  ;;  %v1851_v45 = vmul.bf16 %v4649_v41, %v6926_v6 }
 0x238   : > { %v2020_v25 = vadd.bf16 %v1956_v54, %v1883_v0  ;;  %v2600_v59 = vadd.bf16 %v2536_v24, %v2463_v14  ;;  %v768_v52 = vrot.slane %v598_v49, 1  ;;  %v1077_v16 = vrot.slane %v598_v49, 2 }
 0x239   : > { %v1640_v0 = vadd.bf16 %v8474_v1, %v8473_v51  ;;  %v769_v54 = vrot.slane %v599_v5, 1  ;;  %v7248_v55 = vrot.slane %v600_v11, 1  ;;  %v7250_v24 = vrot.slane %v600_v11, 2 }
 0x23a   : > { %v2157_v29 = vadd.bf16 %v2093_v47, %v2020_v25  ;;  %3778 = vmatmul.mubr.bf16.gmra.mrb[44].mxu1 %v2600_v59  ;;  %v8475_v47 = vmul.bf16 %v4646_v38, %v6797_v12  ;;  %v1113_v11 = vsel %vm1097_vm1, %v1077_v16, %v1078_v10  ;;  %v1988_v59 = vmul.bf16 %v4652_v42, %v6986_v28 }
 0x23b   : > { %v805_v32 = vsel %vm790_vm0, %v769_v54, %v7248_v55  ;;  %v806_v5 = vsel %vm790_vm0, %v768_v52, %v769_v54  ;;  %v2263_v52 = vmul.bf16 %v4702_v60, %v7208_v40  ;;  %v521_v54 = vunpack.c.h.bf16 %v7127_v9 }
 0x23c   : > { %v2295_v14 = vadd.bf16 %v2231_v18, %v2157_v29  ;;  %v1777_v49 = vadd.bf16 %v8475_v47, %v1640_v0  ;;  %v1112_v29 = vsel %vm1097_vm1, %v1078_v10, %v7250_v24  ;;  %v7269_v12 = vpack.c.bf16 %v805_v32, %v806_v5 }
 0x23d   : > { %v7271_v51 = vpack.c.bf16 %v1112_v29, %v1113_v11  ;;  %v2125_v0 = vmul.bf16 %v4655_v43, %v6996_v30  ;;  %v691_v32 = vrot.slane %v521_v54, 1  ;;  %v1000_v5 = vrot.slane %v521_v54, 2 }
 0x23e   : > { %v2432_v18 = vadd.bf16 %v2368_v21, %v2295_v14  ;;  %v1915_v1 = vadd.bf16 %v1851_v45, %v1777_v49  ;;  %v2400_v21 = vmul.bf16 %v4712_v48, %v7269_v12  ;;  %v522_v45 = vunpack.c.h.bf16 %v6994_v50 }
 0x23f   : > { %v2537_v49 = vmul.bf16 %v4723_v57, %v7271_v51  ;;  %v8477_v29 = vmul.bf16 %v4643_v37, %v6842_v22  ;;  %v1175_v54 = vsel %vm1097_vm1, %v7178_v19, %v1000_v5  ;;  %v8478_v22 = vmul.bf16 %v4646_v38, %v6844_v26 }
 0x240   : > { %v2569_v47 = vadd.bf16 %v2505_v33, %v2432_v18  ;;  %v2052_v14 = vadd.bf16 %v1988_v59, %v1915_v1  ;;  %v8476_v33 = vmul.bf16 %v4640_v36, %v6695_v7  ;;  %v1820_v18 = vmul.bf16 %v4649_v41, %v6893_v39 }
 0x241   : > { %v692_v1 = vrot.slane %v522_v45, 1  ;;  %v868_v59 = vsel %vm790_vm0, %v7172_v8, %v691_v32  ;;  %v1001_v50 = vrot.slane %v522_v45, 2  ;;  %v2094_v19 = vmul.bf16 %v4655_v43, %v7052_v63 }
 0x242   : > { %3717 = vmatprep.mubr.bf16.mxu0 %v2569_v47  ;;  %v1609_v11 = vadd.bf16 %v8477_v29, %v8476_v33  ;;  %v2189_v10 = vadd.bf16 %v2125_v0, %v2052_v14  ;;  %v1957_v0 = vmul.bf16 %v4652_v42, %v7050_v3  ;;  %v2232_v26 = vmul.bf16 %v4702_v60, %v7127_v9 }
 0x243   : > { %v867_v33 = vsel %vm790_vm0, %v691_v32, %v692_v1  ;;  %v1174_v8 = vsel %vm1097_vm1, %v1000_v5, %v1001_v50  ;;  %v8486_v32 = vmul.bf16 %v4640_v36, %v6881_v58  ;;  %v8517_v61 = vmul.bf16 %v4643_v37, %v7269_v12 }
 0x244   : > { %v1746_v47 = vadd.bf16 %v8478_v22, %v1609_v11  ;;  %v2327_v14 = vadd.bf16 %v2263_v52, %v2189_v10  ;;  %v7316_v45 = vpack.c.bf16 %v867_v33, %v868_v59  ;;  %v7318_v29 = vpack.c.bf16 %v1174_v8, %v1175_v54  ;;  %v7332_v22 = vpop.f32.mrb[20].mxu0 }
 0x245   : > { %v601_v52 = vunpack.c.h.bf16 %v7221_v20  ;;  %v602_v10 = vunpack.c.h.bf16 %v7031_v44  ;;  %8479 = vst [vmem:[#allocation66_spill] sm:$0xff] %v7332_v22  ;;  %v7336_v8 = vpop.f32.mrb[21].mxu0  ;;  %v8516_v22 = vmul.bf16 %v4640_v36, %v7208_v40 }
 0x246   : > { %v1884_v7 = vadd.bf16 %v1820_v18, %v1746_v47  ;;  %v2464_v11 = vadd.bf16 %v2400_v21, %v2327_v14  ;;  %v2369_v59 = vmul.bf16 %v4712_v48, %v7316_v45  ;;  %v2506_v18 = vmul.bf16 %v4723_v57, %v7318_v29  ;;  %8480 = vst [vmem:[#allocation67_spill] sm:$0xff] %v7336_v8 }
 0x247   : > { %v771_v54 = vrot.slane %v601_v52, 1  ;;  %v772_v21 = vrot.slane %v602_v10, 1  ;;  %v1080_v47 = vrot.slane %v601_v52, 2  ;;  %v1081_v14 = vrot.slane %v602_v10, 2  ;;  %v7351_v10 = vpop.f32.mrb[22].mxu0 }
 0x248   : > { %v2021_v1 = vadd.bf16 %v1957_v0, %v1884_v7  ;;  %v2601_v50 = vadd.bf16 %v2537_v49, %v2464_v11  ;;  %v8481_v0 = vmul.bf16 %v4640_v36, %v6753_v56  ;;  %v1852_v52 = vmul.bf16 %v4649_v41, %v6943_v2  ;;  %8483 = vst [vmem:[#allocation68_spill] sm:$0xff] %v7351_v10  ;;  %v7361_v56 = vld [vmem:[%s4517_s28 + $0x168] sm:$0xff]  }
 0x249   : > { %v803_v49 = vsel %vm790_vm0, %v771_v54, %v772_v21  ;;  %v804_v7 = vsel %vm790_vm0, %v7248_v55, %v771_v54  ;;  %v1111_v55 = vsel %vm1097_vm1, %v7250_v24, %v1080_v47  ;;  %v7363_v21 = vpop.f32.mrb[23].mxu0  ;;  %v2233_v10 = vmul.bf16 %v4702_v60, %v7361_v56 }
 0x24a   : > { %v2158_v44 = vadd.bf16 %v2094_v19, %v2021_v1  ;;  %3781 = vmatprep.mubr.bf16.mxu1 %v2601_v50  ;;  %v8482_v19 = vmul.bf16 %v4643_v37, %v6878_v53  ;;  %v1110_v50 = vsel %vm1097_vm1, %v1080_v47, %v1081_v14  ;;  %v7358_v54 = vpack.c.bf16 %v803_v49, %v804_v7  ;;  %v7375_v14 = vld [vmem:[%s4517_s28 + $0x170] sm:$0xff]  }
 0x24b   : > { %8484 = vst [vmem:[#allocation69_spill] sm:$0xff] %v7363_v21  ;;  %v7365_v53 = vpack.c.bf16 %v1110_v50, %v1111_v55  ;;  %v2264_v49 = vmul.bf16 %v4702_v60, %v7221_v20  ;;  %v523_v55 = vunpack.c.l.bf16 %v7361_v56 }
 0x24c   : > { %v1641_v11 = vadd.bf16 %v8482_v19, %v8481_v0  ;;  %v2296_v1 = vadd.bf16 %v2232_v26, %v2158_v44  ;;  %v8485_v0 = vmul.bf16 %v4646_v38, %v6883_v15  ;;  %v1989_v26 = vmul.bf16 %v4652_v42, %v7108_v46  ;;  %v7396_v15 = vpop.f32.mrb[20].mxu1 }
 0x24d   : > { %v2126_v44 = vmul.bf16 %v4655_v43, %v7116_v23  ;;  %v2401_v7 = vmul.bf16 %v4712_v48, %v7358_v54  ;;  %v2538_v50 = vmul.bf16 %v4723_v57, %v7365_v53  ;;  %v693_v33 = vrot.slane %v523_v55, 1  ;;  %8488 = vst [vmem:[#allocation70_spill] sm:$0xff] %v7396_v15  ;;  %v7402_v21 = vpop.f32.mrb[21].mxu1 }
 0x24e   : > { %v1778_v19 = vadd.bf16 %v8485_v0, %v1641_v11  ;;  %v2433_v24 = vadd.bf16 %v2369_v59, %v2296_v1  ;;  %v524_v59 = vunpack.c.h.bf16 %v7361_v56  ;;  %v525_v1 = vunpack.c.l.bf16 %v7375_v14  ;;  %8489 = vst [vmem:[#allocation71_spill] sm:$0xff] %v7402_v21 }
 0x24f   : > { %v1002_v5 = vrot.slane %v523_v55, 2  ;;  %v7412_v55 = vld [vmem:[%s4517_s28 + $0x2e8] sm:$0xff]  }
 0x250   : > { %v1916_v11 = vadd.bf16 %v1852_v52, %v1778_v19  ;;  %v2570_v0 = vadd.bf16 %v2506_v18, %v2433_v24  ;;  %v8487_v52 = vmul.bf16 %v4643_v37, %v6938_v35  ;;  %v694_v16 = vrot.slane %v524_v59, 1 }
 0x251   : > { %v7398_v18 = vrot.slane %v525_v1, 1  ;;  %v1003_v24 = vrot.slane %v524_v59, 2  ;;  %v7400_v25 = vrot.slane %v525_v1, 2  ;;  %v8490_v35 = vmul.bf16 %v4646_v38, %v6940_v27 }
 0x252   : > { %v2053_v47 = vadd.bf16 %v1989_v26, %v1916_v11  ;;  %v1610_v19 = vadd.bf16 %v8487_v52, %v8486_v32  ;;  %3718 = vmatmul.mubr.bf16.gmra.mrb[48].mxu0 %v2570_v0  ;;  %v1821_v11 = vmul.bf16 %v4649_v41, %v7124_v34  ;;  %v7414_v0 = vpop.f32.mrb[22].mxu1 }
 0x253   : > { %8491 = vst [vmem:[#allocation72_spill] sm:$0xff] %v7414_v0  ;;  %v865_v59 = vsel %vm790_vm0, %v694_v16, %v7398_v18  ;;  %v1173_v27 = vsel %vm1097_vm1, %v1002_v5, %v1003_v24  ;;  %v7426_v1 = vpop.f32.mrb[23].mxu1  ;;  %v7433_v0 = vld [vmem:[%s4517_s28 + $0x2f0] sm:$0xff]   ;;  %v603_v5 = vunpack.c.l.bf16 %v7412_v55 }
 0x254   : > { %v2190_v26 = vadd.bf16 %v2126_v44, %v2053_v47  ;;  %v1747_v32 = vadd.bf16 %v8490_v35, %v1610_v19  ;;  %v866_v44 = vsel %vm790_vm0, %v693_v33, %v694_v16  ;;  %v1172_v47 = vsel %vm1097_vm1, %v1003_v24, %v7400_v25  ;;  %8492 = vst [vmem:[#allocation73_spill] sm:$0xff] %v7426_v1 }
 0x255   : > { %v7428_v19 = vpack.c.bf16 %v865_v59, %v866_v44  ;;  %v7430_v35 = vpack.c.bf16 %v1172_v47, %v1173_v27  ;;  %v1958_v16 = vmul.bf16 %v4652_v42, %v7205_v13  ;;  %v2095_v33 = vmul.bf16 %v4655_v43, %v7214_v62 }
 0x256   : > { %v2328_v52 = vadd.bf16 %v2264_v49, %v2190_v26  ;;  %v1885_v58 = vadd.bf16 %v1821_v11, %v1747_v32  ;;  %v604_v44 = vunpack.c.h.bf16 %v7412_v55  ;;  %v605_v47 = vunpack.c.l.bf16 %v7433_v0 }
 0x257   : > { %8493 = vst [vmem:[#allocation74_spill] sm:$0xff] %v7430_v35  ;;  %v2370_v32 = vmul.bf16 %v4712_v48, %v7428_v19  ;;  %v2507_v59 = vmul.bf16 %v4723_v57, %v7430_v35  ;;  %v773_v1 = vrot.slane %v603_v5, 1 }
 0x258   : > { %v2465_v24 = vadd.bf16 %v2401_v7, %v2328_v52  ;;  %v2022_v11 = vadd.bf16 %v1958_v16, %v1885_v58  ;;  %v1082_v7 = vrot.slane %v603_v5, 2  ;;  %v774_v21 = vrot.slane %v604_v44, 1 }
 0x259   : > { %v7452_v49 = vrot.slane %v605_v47, 1  ;;  %v1083_v26 = vrot.slane %v604_v44, 2  ;;  %v7454_v8 = vrot.slane %v605_v47, 2  ;;  %v8494_v16 = vmul.bf16 %v4640_v36, %v6926_v6 }
 0x25a   : > { %v2602_v27 = vadd.bf16 %v2538_v50, %v2465_v24  ;;  %v2159_v52 = vadd.bf16 %v2095_v33, %v2022_v11  ;;  %v8495_v50 = vmul.bf16 %v4643_v37, %v6986_v28  ;;  %v1853_v33 = vmul.bf16 %v4649_v41, %v7208_v40 }
 0x25b   : > { %v801_v11 = vsel %vm790_vm0, %v774_v21, %v7452_v49  ;;  %v802_v44 = vsel %vm790_vm0, %v773_v1, %v774_v21  ;;  %v1109_v47 = vsel %vm1097_vm1, %v1082_v7, %v1083_v26  ;;  %v1108_v6 = vsel %vm1097_vm1, %v1083_v26, %v7454_v8 }
 0x25c   : > { %3782 = vmatmul.mubr.bf16.gmra.mrb[48].mxu1 %v2602_v27  ;;  %v1642_v24 = vadd.bf16 %v8495_v50, %v8494_v16  ;;  %v2297_v5 = vadd.bf16 %v2233_v10, %v2159_v52  ;;  %v7476_v28 = vpack.c.bf16 %v801_v11, %v802_v44  ;;  %v8496_v27 = vmul.bf16 %v4646_v38, %v6996_v30  ;;  %v7484_v16 = vld [vmem:[%s4517_s28 + $0x178] ss:$408 sps:$4 sm:$0xff]  }
 0x25d   : > { %v1990_v52 = vmul.bf16 %v4652_v42, %v7269_v12  ;;  %v7486_v21 = vpack.c.bf16 %v1108_v6, %v1109_v47  ;;  %v2127_v1 = vmul.bf16 %v4655_v43, %v7271_v51  ;;  %v2265_v26 = vmul.bf16 %v4702_v60, %v7412_v55 }
 0x25e   : > { %v1779_v10 = vadd.bf16 %v8496_v27, %v1642_v24  ;;  %v2434_v50 = vadd.bf16 %v2370_v32, %v2297_v5  ;;  %v2402_v30 = vmul.bf16 %v4712_v48, %v7476_v28  ;;  %v526_v24 = vunpack.c.h.bf16 %v7375_v14 }
 0x25f   : > { %v2539_v5 = vmul.bf16 %v4723_v57, %v7486_v21  ;;  %v527_v47 = vunpack.c.l.bf16 %v7484_v16  ;;  %v8497_v7 = vmul.bf16 %v4640_v36, %v6893_v39  ;;  %v1822_v32 = vmul.bf16 %v4649_v41, %v7127_v9  ;;  %v7519_v39 = vld [vmem:[%s4517_s28 + $0x2f8] ss:$48 sps:$4 sm:$0xff]  }
 0x260   : > { %v1917_v11 = vadd.bf16 %v1853_v33, %v1779_v10  ;;  %v2571_v44 = vadd.bf16 %v2507_v59, %v2434_v50  ;;  %v696_v27 = vrot.slane %v526_v24, 1  ;;  %v1005_v58 = vrot.slane %v526_v24, 2  ;;  %8499 = vst [vmem:[#allocation75_spill] sm:$0xff] %v7519_v39 }
 0x261   : > { %v697_v33 = vrot.slane %v527_v47, 1  ;;  %v1006_v10 = vrot.slane %v527_v47, 2  ;;  %v8498_v59 = vmul.bf16 %v4643_v37, %v7050_v3  ;;  %v1855_v40 = vmul.bf16 %v4649_v41, %v7412_v55 }
 0x262   : > { %v2054_v6 = vadd.bf16 %v1990_v52, %v1917_v11  ;;  %3721 = vmatprep.mubr.bf16.mxu0 %v2571_v44  ;;  %v864_v52 = vsel %vm790_vm0, %v7398_v18, %v696_v27  ;;  %v1171_v11 = vsel %vm1097_vm1, %v7400_v25, %v1005_v58  ;;  %v1959_v18 = vmul.bf16 %v4652_v42, %v7316_v45 }
 0x263   : > { %v1611_v50 = vadd.bf16 %v8498_v59, %v8497_v7  ;;  %v863_v3 = vsel %vm790_vm0, %v696_v27, %v697_v33  ;;  %v1170_v7 = vsel %vm1097_vm1, %v1005_v58, %v1006_v10  ;;  %v2096_v59 = vmul.bf16 %v4655_v43, %v7318_v29 }
 0x264   : > { %v2191_v15 = vadd.bf16 %v2127_v1, %v2054_v6  ;;  %v8500_v1 = vmul.bf16 %v4646_v38, %v7052_v63  ;;  %v7530_v25 = vpack.c.bf16 %v863_v3, %v864_v52  ;;  %v7532_v6 = vpack.c.bf16 %v1170_v7, %v1171_v11  ;;  %v7548_v3 = vpop.f32.mrb[24].mxu0 }
 0x265   : > { %v2234_v27 = vmul.bf16 %v4702_v60, %v7375_v14  ;;  %v606_v58 = vunpack.c.h.bf16 %v7433_v0  ;;  %v607_v63 = vunpack.c.l.bf16 %v7519_v39  ;;  %8501 = vst [vmem:[#allocation76_spill] sm:$0xff] %v7548_v3  ;;  %v8504_v10 = vmul.bf16 %v4643_v37, %v7108_v46 }
 0x266   : > { %v1748_v44 = vadd.bf16 %v8500_v1, %v1611_v50  ;;  %v2329_v47 = vadd.bf16 %v2265_v26, %v2191_v15  ;;  %v2371_v26 = vmul.bf16 %v4712_v48, %v7530_v25  ;;  %v1644_v39 = vadd.bf16 %v8517_v61, %v8516_v22 }
 0x267   : > { %v776_v52 = vrot.slane %v606_v58, 1  ;;  %v777_v11 = vrot.slane %v607_v63, 1  ;;  %v1085_v1 = vrot.slane %v606_v58, 2 }
 0x268   : > { %v1886_v24 = vadd.bf16 %v1822_v32, %v1748_v44  ;;  %v2466_v33 = vadd.bf16 %v2402_v30, %v2329_v47  ;;  %v2508_v32 = vmul.bf16 %v4723_v57, %v7532_v6  ;;  %v1086_v30 = vrot.slane %v607_v63, 2  ;;  %v7550_v44 = vpop.f32.mrb[25].mxu0 }
 0x269   : > { %8502 = vst [vmem:[#allocation77_spill] sm:$0xff] %v7550_v44  ;;  %v799_v15 = vsel %vm790_vm0, %v776_v52, %v777_v11  ;;  %v1107_v58 = vsel %vm1097_vm1, %v7454_v8, %v1085_v1  ;;  %v2128_v11 = vmul.bf16 %v4655_v43, %v7365_v53 }
 0x26a   : > { %v2023_v50 = vadd.bf16 %v1959_v18, %v1886_v24  ;;  %v2603_v7 = vadd.bf16 %v2539_v5, %v2466_v33  ;;  %v800_v24 = vsel %vm790_vm0, %v7452_v49, %v776_v52  ;;  %v8503_v18 = vmul.bf16 %v4640_v36, %v6943_v2  ;;  %v7563_v5 = vpop.f32.mrb[26].mxu0  ;;  %v8513_v2 = vld [vmem:[#allocation23_spill] sm:$0xff] }
 0x26b   : > { %8505 = vst [vmem:[#allocation78_spill] sm:$0xff] %v7563_v5  ;;  %v7570_v63 = vpack.c.bf16 %v799_v15, %v800_v24  ;;  %v7574_v49 = vpop.f32.mrb[27].mxu0  ;;  %v1854_v52 = vmul.bf16 %v4649_v41, %v7221_v20  ;;  %v1991_v15 = vmul.bf16 %v4652_v42, %v7358_v54  ;;  %v8508_v24 = vmul.bf16 %v4640_v36, %v7124_v34 }
 0x26c   : > { %v2160_v47 = vadd.bf16 %v2096_v59, %v2023_v50  ;;  %v1643_v3 = vadd.bf16 %v8504_v10, %v8503_v18  ;;  %3785 = vmatprep.mubr.bf16.mxu1 %v2603_v7  ;;  %v1106_v59 = vsel %vm1097_vm1, %v1085_v1, %v1086_v30  ;;  %8506 = vst [vmem:[#allocation79_spill] sm:$0xff] %v7574_v49  ;;  %v7596_v30 = vld [vmem:[%s4517_s28 + $0x300] sm:$0xff]  }
 0x26d   : > { %v7576_v33 = vpack.c.bf16 %v1106_v59, %v1107_v58  ;;  %v8507_v10 = vmul.bf16 %v4646_v38, %v7116_v23  ;;  %v2403_v1 = vmul.bf16 %v4712_v48, %v7570_v63  ;;  %v8509_v18 = vmul.bf16 %v4643_v37, %v7205_v13  ;;  %v8510_v23 = vld [vmem:[#allocation16_spill] sm:$0xff] }
 0x26e   : > { %v2298_v46 = vadd.bf16 %v2234_v27, %v2160_v47  ;;  %v2266_v27 = vmul.bf16 %v4702_v60, %v7433_v0  ;;  %v1960_v58 = vmul.bf16 %v4652_v42, %v7428_v19  ;;  %v2235_v34 = vmul.bf16 %v4702_v60, %v8510_v23 }
 0x26f   : > { %v1780_v50 = vadd.bf16 %v8507_v10, %v1643_v3  ;;  %v2540_v47 = vmul.bf16 %v4723_v57, %v7576_v33  ;;  %v1612_v59 = vadd.bf16 %v8509_v18, %v8508_v24  ;;  %v8511_v13 = vmul.bf16 %v4646_v38, %v7214_v62  ;;  %v8512_v18 = vld [vmem:[#allocation20_spill] sm:$0xff] }
 0x270   : > { %v2435_v7 = vadd.bf16 %v2371_v26, %v2298_v46  ;;  %v1823_v26 = vmul.bf16 %v4649_v41, %v7361_v56  ;;  %v7611_v46 = vld [vmem:[%s4517_s28 + $0x308] sm:$0xff]   ;;  %v2372_v8 = vmul.bf16 %v4712_v48, %v8512_v18  ;;  %v2509_v49 = vmul.bf16 %v4723_v57, %v8513_v2 }
 0x271   : > { %v1918_v3 = vadd.bf16 %v1854_v52, %v1780_v50  ;;  %v2097_v52 = vmul.bf16 %v4655_v43, %v7430_v35  ;;  %v1749_v24 = vadd.bf16 %v8511_v13, %v1612_v59  ;;  %v608_v5 = vunpack.c.l.bf16 %v7596_v30 }
 0x272   : > { %v2572_v10 = vadd.bf16 %v2508_v32, %v2435_v7  ;;  %v7625_v32 = vpop.f32.mrb[24].mxu1  ;;  %v609_v7 = vunpack.c.h.bf16 %v7596_v30 }
 0x273   : > { %v2055_v50 = vadd.bf16 %v1991_v15, %v1918_v3  ;;  %8514 = vst [vmem:[#allocation16_spill] sm:$0xff] %v7625_v32  ;;  %v610_v3 = vunpack.c.l.bf16 %v7611_v46  ;;  %v7629_v44 = vpop.f32.mrb[25].mxu1  ;;  %v1887_v62 = vadd.bf16 %v1823_v26, %v1749_v24  ;;  %v778_v59 = vrot.slane %v608_v5, 1 }
 0x274   : > { %3722 = vmatmul.mubr.bf16.gmra.mrb[52].mxu0 %v2572_v10  ;;  %8515 = vst [vmem:[#allocation80_spill] sm:$0xff] %v7629_v44  ;;  %v1087_v13 = vrot.slane %v608_v5, 2  ;;  %v7637_v2 = vpop.f32.mrb[26].mxu1  ;;  %v1088_v32 = vrot.slane %v609_v7, 2  ;;  %v8518_v5 = vmul.bf16 %v4646_v38, %v7271_v51  ;;  %v1857_v51 = vmul.bf16 %v4649_v41, %v7596_v30 }
 0x275   : > { %v2192_v15 = vadd.bf16 %v2128_v11, %v2055_v50  ;;  %v779_v11 = vrot.slane %v609_v7, 1  ;;  %v780_v50 = vrot.slane %v610_v3, 1  ;;  %v7639_v18 = vpop.f32.mrb[27].mxu1  ;;  %v2024_v35 = vadd.bf16 %v1960_v58, %v1887_v62 }
 0x276   : > { %v1089_v44 = vrot.slane %v610_v3, 2  ;;  %v1781_v26 = vadd.bf16 %v8518_v5, %v1644_v39  ;;  %v1105_v22 = vsel %vm1097_vm1, %v1087_v13, %v1088_v32  ;;  %v1992_v3 = vmul.bf16 %v4652_v42, %v7476_v28 }
 0x277   : > { %v2330_v10 = vadd.bf16 %v2266_v27, %v2192_v15  ;;  %v797_v61 = vsel %vm790_vm0, %v779_v11, %v780_v50  ;;  %v798_v12 = vsel %vm790_vm0, %v778_v59, %v779_v11  ;;  %v2161_v27 = vadd.bf16 %v2097_v52, %v2024_v35 }
 0x278   : > { %v1104_v58 = vsel %vm1097_vm1, %v1088_v32, %v1089_v44  ;;  %v7654_v15 = vpack.c.bf16 %v797_v61, %v798_v12  ;;  %v1919_v7 = vadd.bf16 %v1855_v40, %v1781_v26  ;;  %v2129_v35 = vmul.bf16 %v4655_v43, %v7486_v21 }
 0x279   : > { %v2467_v24 = vadd.bf16 %v2403_v1, %v2330_v10  ;;  %v7658_v1 = vpack.c.bf16 %v1104_v58, %v1105_v22  ;;  %v2299_v62 = vadd.bf16 %v2235_v34, %v2161_v27  ;;  %v2267_v52 = vmul.bf16 %v4702_v60, %v7596_v30  ;;  %v8522_v58 = vld [vmem:[#allocation28_spill] sm:$0xff] }
 0x27a   : > { %v1994_v59 = vmul.bf16 %v4652_v42, %v7654_v15  ;;  %v2056_v32 = vadd.bf16 %v1992_v3, %v1919_v7  ;;  %v2404_v13 = vmul.bf16 %v4712_v48, %v7654_v15  ;;  %v8519_v11 = vmul.bf16 %v4640_v36, %v7127_v9 }
 0x27b   : > { %v2604_v39 = vadd.bf16 %v2540_v47, %v2467_v24  ;;  %v2541_v34 = vmul.bf16 %v4723_v57, %v7658_v1  ;;  %v2436_v10 = vadd.bf16 %v2372_v8, %v2299_v62  ;;  %v8520_v5 = vmul.bf16 %v4643_v37, %v7316_v45 }
 0x27c   : > { %v1824_v40 = vmul.bf16 %v4649_v41, %v7375_v14  ;;  %v1961_v24 = vmul.bf16 %v4652_v42, %v7530_v25  ;;  %v2193_v61 = vadd.bf16 %v2129_v35, %v2056_v32  ;;  %v2098_v12 = vmul.bf16 %v4655_v43, %v7532_v6 }
 0x27d   : > { %3786 = vmatmul.mubr.bf16.gmra.mrb[52].mxu1 %v2604_v39  ;;  %v1613_v26 = vadd.bf16 %v8520_v5, %v8519_v11  ;;  %v2236_v8 = vmul.bf16 %v4702_v60, %v4632_v17  ;;  %v2373_v9 = vmul.bf16 %v4712_v48, %v4928_v31  ;;  %v2573_v22 = vadd.bf16 %v2509_v49, %v2436_v10 }
 0x27e   : > { %v8521_v45 = vmul.bf16 %v4646_v38, %v7318_v29  ;;  %v2510_v39 = vmul.bf16 %v4723_v57, %v8522_v58  ;;  %v611_v7 = vunpack.c.h.bf16 %v7611_v46  ;;  %v2331_v3 = vadd.bf16 %v2267_v52, %v2193_v61 }
 0x27f   : > { %v612_v62 = vunpack.c.h.bf16 %v7484_v16  ;;  %v8523_v35 = vmul.bf16 %v4640_v36, %v7221_v20  ;;  %v8524_v32 = vmul.bf16 %v4643_v37, %v7358_v54  ;;  %3725 = vmatprep.mubr.bf16.mxu0 %v2573_v22  ;;  %v1856_v5 = vmul.bf16 %v4649_v41, %v7433_v0 }
 0x280   : > { %v1750_v27 = vadd.bf16 %v8521_v45, %v1613_v26  ;;  %v781_v10 = vrot.slane %v611_v7, 1  ;;  %v1090_v29 = vrot.slane %v611_v7, 2  ;;  %v2468_v26 = vadd.bf16 %v2404_v13, %v2331_v3 }
 0x281   : > { %v1645_v11 = vadd.bf16 %v8524_v32, %v8523_v35  ;;  %v782_v45 = vrot.slane %v612_v62, 1  ;;  %v1091_v47 = vrot.slane %v612_v62, 2  ;;  %v8525_v16 = vmul.bf16 %v4646_v38, %v7365_v53 }
 0x282   : > { %v1888_v49 = vadd.bf16 %v1824_v40, %v1750_v27  ;;  %v796_v20 = vsel %vm790_vm0, %v780_v50, %v781_v10  ;;  %v1103_v54 = vsel %vm1097_vm1, %v1089_v44, %v1090_v29  ;;  %v1858_v40 = vmul.bf16 %v4649_v41, %v7611_v46 }
 0x283   : > { %v1782_v52 = vadd.bf16 %v8525_v16, %v1645_v11  ;;  %v2605_v22 = vadd.bf16 %v2541_v34, %v2468_v26  ;;  %v795_v13 = vsel %vm790_vm0, %v781_v10, %v782_v45  ;;  %v1102_v27 = vsel %vm1097_vm1, %v1090_v29, %v1091_v47  ;;  %v7741_v29 = vld [vmem:[%s4517_s28 + $0x318] sm:$0xff]   ;;  %v7753_v16 = vld [vmem:[%s4517_s28 + $0x320] sm:$0xff]  }
 0x284   : > { %v2025_v61 = vadd.bf16 %v1961_v24, %v1888_v49  ;;  %v7718_v24 = vpack.c.bf16 %v795_v13, %v796_v20  ;;  %v7720_v3 = vpack.c.bf16 %v1102_v27, %v1103_v54  ;;  %v1993_v44 = vmul.bf16 %v4652_v42, %v7570_v63  ;;  %v8531_v20 = vld [vmem:[#allocation23_spill] sm:$0xff] }
 0x285   : > { %v1920_v53 = vadd.bf16 %v1856_v5, %v1782_v52  ;;  %3789 = vmatprep.mubr.bf16.mxu1 %v2605_v22  ;;  %v2130_v50 = vmul.bf16 %v4655_v43, %v7576_v33  ;;  %v2268_v34 = vmul.bf16 %v4702_v60, %v7611_v46  ;;  %v8526_v47 = vmul.bf16 %v4640_v36, %v7361_v56  ;;  %v8528_v5 = vld [vmem:[#allocation74_spill] sm:$0xff]  ;;  %v8532_v22 = vld [vmem:[#allocation17_spill] sm:$0xff] }
 0x286   : > { %v2162_v7 = vadd.bf16 %v2098_v12, %v2025_v61  ;;  %v8527_v12 = vmul.bf16 %v4643_v37, %v7428_v19  ;;  %v1825_v35 = vmul.bf16 %v4649_v41, %v8510_v23  ;;  %v1995_v11 = vmul.bf16 %v4652_v42, %v7718_v24 }
 0x287   : > { %v2057_v49 = vadd.bf16 %v1993_v44, %v1920_v53  ;;  %v2405_v56 = vmul.bf16 %v4712_v48, %v7718_v24  ;;  %v2542_v19 = vmul.bf16 %v4723_v57, %v7720_v3  ;;  %v8529_v26 = vmul.bf16 %v4646_v38, %v8528_v5  ;;  %v8533_v53 = vld [vmem:[#allocation21_spill] sm:$0xff]  ;;  %v8534_v44 = vld [vmem:[#allocation24_spill] sm:$0xff] }
 0x288   : > { %v1614_v62 = vadd.bf16 %v8527_v12, %v8526_v47  ;;  %v2300_v32 = vadd.bf16 %v2236_v8, %v2162_v7  ;;  %v8530_v8 = vld [vmem:[#allocation20_spill] sm:$0xff]  ;;  %v2099_v54 = vmul.bf16 %v4655_v43, %v8531_v20  ;;  %v2237_v13 = vmul.bf16 %v4702_v60, %v8532_v22 }
 0x289   : > { %v1962_v45 = vmul.bf16 %v4652_v42, %v8530_v8  ;;  %v2194_v61 = vadd.bf16 %v2130_v50, %v2057_v49  ;;  %v2374_v7 = vmul.bf16 %v4712_v48, %v8533_v53  ;;  %v2511_v47 = vmul.bf16 %v4723_v57, %v8534_v44 }
 0x28a   : > { %v1751_v23 = vadd.bf16 %v8529_v26, %v1614_v62  ;;  %v2437_v52 = vadd.bf16 %v2373_v9, %v2300_v32  ;;  %v613_v12 = vunpack.c.l.bf16 %v7741_v29  ;;  %v7764_v62 = vpop.f32.mrb[28].mxu0  ;;  %v614_v50 = vunpack.c.h.bf16 %v7741_v29 }
 0x28b   : > { %v2332_v9 = vadd.bf16 %v2268_v34, %v2194_v61  ;;  %v615_v32 = vunpack.c.l.bf16 %v7753_v16  ;;  %v7768_v49 = vpop.f32.mrb[29].mxu0  ;;  %v8536_v61 = vmul.bf16 %v4643_v37, %v7476_v28  ;;  %v8547_v15 = vmul.bf16 %v4655_v43, %v7658_v1 }
 0x28c   : > { %v1889_v27 = vadd.bf16 %v1825_v35, %v1751_v23  ;;  %v2574_v5 = vadd.bf16 %v2510_v39, %v2437_v52  ;;  %v783_v35 = vrot.slane %v613_v12, 1  ;;  %v1092_v23 = vrot.slane %v613_v12, 2  ;;  %v7770_v8 = vpop.f32.mrb[30].mxu0 }
 0x28d   : > { %v2469_v20 = vadd.bf16 %v2405_v56, %v2332_v9  ;;  %v784_v22 = vrot.slane %v614_v50, 1  ;;  %v785_v53 = vrot.slane %v615_v32, 1  ;;  %v1093_v44 = vrot.slane %v614_v50, 2  ;;  %v7772_v10 = vpop.f32.mrb[31].mxu0 }
 0x28e   : > { %v2026_v26 = vadd.bf16 %v1962_v45, %v1889_v27  ;;  %3726 = vmatmul.mubr.bf16.gmra.mrb[56].mxu0 %v2574_v5  ;;  %v1094_v34 = vrot.slane %v615_v32, 2  ;;  %v8535_v52 = vmul.bf16 %v4640_v36, %v7412_v55  ;;  %v2269_v27 = vmul.bf16 %v4702_v60, %v7741_v29 }
 0x28f   : > { %v2606_v12 = vadd.bf16 %v2542_v19, %v2469_v20  ;;  %v793_v56 = vsel %vm790_vm0, %v784_v22, %v785_v53  ;;  %v794_v5 = vsel %vm790_vm0, %v783_v35, %v784_v22  ;;  %v8537_v50 = vmul.bf16 %v4646_v38, %v7486_v21 }
 0x290   : > { %v2163_v39 = vadd.bf16 %v2099_v54, %v2026_v26  ;;  %v1646_v45 = vadd.bf16 %v8536_v61, %v8535_v52  ;;  %v1101_v54 = vsel %vm1097_vm1, %v1092_v23, %v1093_v44  ;;  %v1100_v55 = vsel %vm1097_vm1, %v1093_v44, %v1094_v34  ;;  %v7810_v44 = vpop.f32.mrb[28].mxu1  ;;  %v8542_v52 = vld [vmem:[#allocation27_spill] sm:$0xff] }
 0x291   : > { %v1368_v28 = vpack.c.bf16 %v793_v56, %v794_v5  ;;  %3790 = vmatmul.mubr.bf16.gmra.mrb[56].mxu1 %v2606_v12  ;;  %v1436_v19 = vpack.c.bf16 %v1100_v55, %v1101_v54  ;;  %v8538_v32 = vmul.bf16 %v4640_v36, %v7375_v14  ;;  %v8539_v26 = vmul.bf16 %v4643_v37, %v7530_v25  ;;  %v7822_v61 = vpop.f32.mrb[29].mxu1  ;;  %v8543_v12 = vld [vmem:[#allocation29_spill] sm:$0xff] }
 0x292   : > { %v2301_v9 = vadd.bf16 %v2237_v13, %v2163_v39  ;;  %v1783_v29 = vadd.bf16 %v8537_v50, %v1646_v45  ;;  %v1826_v13 = vmul.bf16 %v4649_v41, %v4632_v17  ;;  %v1963_v23 = vmul.bf16 %v4652_v42, %v4928_v31  ;;  %v8541_v31 = vld [vmem:[#allocation18_spill] sm:$0xff]  ;;  %v7830_v5 = vpop.f32.mrb[30].mxu1 }
 0x293   : > { %v1615_v35 = vadd.bf16 %v8539_v26, %v8538_v32  ;;  %v2406_v22 = vmul.bf16 %v4712_v48, %v1368_v28  ;;  %v2100_v14 = vmul.bf16 %v4655_v43, %v8522_v58  ;;  %v2543_v25 = vmul.bf16 %v4723_v57, %v1436_v19  ;;  %v8548_v26 = vld [vmem:[#allocation22_spill] sm:$0xff] }
 0x294   : > { %v2438_v20 = vadd.bf16 %v2374_v7, %v2301_v9  ;;  %v1921_v21 = vadd.bf16 %v1857_v51, %v1783_v29  ;;  %v8540_v17 = vmul.bf16 %v4646_v38, %v7532_v6  ;;  %v2238_v7 = vmul.bf16 %v4702_v60, %v8541_v31  ;;  %v7820_v51 = vld [vmem:[#allocation8] ss:$0 sm:$0xff]  ;;  %v7839_v29 = vpop.f32.mrb[31].mxu1 }
 0x295   : > { %v2375_v30 = vmul.bf16 %v4712_v48, %v8542_v52  ;;  %v2512_v56 = vmul.bf16 %v4723_v57, %v8543_v12  ;;  %v616_v6 = vunpack.c.h.bf16 %v7753_v16  ;;  %v8544_v9 = vld [vmem:[#allocation75_spill] sm:$0xff]  ;;  %v8545_v28 = vmul.bf16 %v4640_v36, %v7433_v0  ;;  %v8556_v12 = vld [vmem:[#allocation32_spill] sm:$0xff] }
 0x296   : > { %v1752_v39 = vadd.bf16 %v8540_v17, %v1615_v35  ;;  %v2575_v58 = vadd.bf16 %v2511_v47, %v2438_v20  ;;  %v2058_v45 = vadd.bf16 %v1994_v59, %v1921_v21  ;;  %v617_v55 = vunpack.c.h.bf16 %v8544_v9 }
 0x297   : > { %v8546_v47 = vmul.bf16 %v4643_v37, %v7570_v63  ;;  %v786_v19 = vrot.slane %v616_v6, 1  ;;  %v1095_v32 = vrot.slane %v616_v6, 2  ;;  %v2723_v35 = vadd.f32 %v8548_v26, %v7820_v51  ;;  %v8557_v6 = vld [vmem:[#allocation33_spill] sm:$0xff] }
 0x298   : > { %v1890_v54 = vadd.bf16 %v1826_v13, %v1752_v39  ;;  %3729 = vmatprep.mubr.bf16.mxu0 %v2575_v58  ;;  %v2195_v59 = vadd.bf16 %v8547_v15, %v2058_v45  ;;  %v787_v20 = vrot.slane %v617_v55, 1  ;;  %v1096_v21 = vrot.slane %v617_v55, 2  ;;  %v8552_v58 = vld [vmem:[#allocation26_spill] sm:$0xff]  ;;  %v8560_v55 = vld [vmem:[#allocation36_spill] sm:$0xff]  ;;  %v8561_v15 = vld [vmem:[#allocation37_spill] sm:$0xff] }
 0x299   : > { %v1647_v50 = vadd.bf16 %v8546_v47, %v8545_v28  ;;  %v8549_v36 = vmul.bf16 %v4646_v38, %v7576_v33  ;;  %v792_v63 = vsel %vm790_vm0, %v785_v53, %v786_v19  ;;  %v1099_v1 = vsel %vm1097_vm1, %v1094_v34, %v1095_v32  ;;  %3227 = vst [vmem:[%s7855_s25 + $0x10] sm:$0xff] %v2723_v35  ;;  %v8553_v45 = vld [vmem:[#allocation30_spill] sm:$0xff]  ;;  %v8564_v35 = vld [vmem:[#allocation40_spill] sm:$0xff] }
 0x29a   : > { %v2027_v13 = vadd.bf16 %v1963_v23, %v1890_v54  ;;  %v2333_v0 = vadd.bf16 %v2269_v27, %v2195_v59  ;;  %v2270_v17 = vmul.bf16 %v4702_v60, %v7753_v16  ;;  %v791_v38 = vsel %vm790_vm0, %v786_v19, %v787_v20  ;;  %v8550_v27 = vld [vmem:[#allocation25_spill] sm:$0xff]  ;;  %v8559_v54 = vld [vmem:[#allocation35_spill] sm:$0xff]  ;;  %v8562_v19 = vld [vmem:[#allocation38_spill] sm:$0xff] }
 0x29b   : > { %v1784_v37 = vadd.bf16 %v8549_v36, %v1647_v50  ;;  %v1098_v33 = vsel %vm1097_vm1, %v1095_v32, %v1096_v21  ;;  %v1369_v60 = vpack.c.bf16 %v791_v38, %v792_v63  ;;  %v2979_v39 = vadd.f32 %v8550_v27, %v7820_v51  ;;  %v8565_v20 = vld [vmem:[#allocation41_spill] sm:$0xff]  ;;  %v8566_v36 = vld [vmem:[#allocation42_spill] sm:$0xff]  ;;  %v8567_v63 = vld [vmem:[#allocation43_spill] sm:$0xff] }
 0x29c   : > { %v2164_v23 = vadd.bf16 %v2100_v14, %v2027_v13  ;;  %v2470_v34 = vadd.bf16 %v2406_v22, %v2333_v0  ;;  %v1437_v16 = vpack.c.bf16 %v1098_v33, %v1099_v1  ;;  %v2715_v52 = vadd.f32 %v7820_v51, %v8551_v4  ;;  %v8569_v38 = vld [vmem:[#allocation45_spill] sm:$0xff]  ;;  %v8572_v27 = vld [vmem:[#allocation48_spill] sm:$0xff] }
 0x29d   : > { %v1922_v53 = vadd.bf16 %v1858_v40, %v1784_v37  ;;  %v2971_v41 = vadd.f32 %v7820_v51, %v8552_v58  ;;  %v2407_v40 = vmul.bf16 %v4712_v48, %v1369_v60  ;;  %3291 = vst [vmem:[%s7855_s25 + $0x210] sm:$0xff] %v2979_v39  ;;  %v8554_v24 = vmul.bf16 %v4655_v43, %v7720_v3  ;;  %v8558_v43 = vld [vmem:[#allocation34_spill] sm:$0xff]  ;;  %v8571_v60 = vld [vmem:[#allocation47_spill] sm:$0xff] }
 0x29e   : > { %v2302_v31 = vadd.bf16 %v2238_v7, %v2164_v23  ;;  %v2607_v46 = vadd.bf16 %v2543_v25, %v2470_v34  ;;  %v2544_v22 = vmul.bf16 %v4723_v57, %v1437_v16  ;;  %v2726_v7 = vadd.f32 %v8553_v45, %v7820_v51  ;;  %3225 = vst [vmem:[%s7855_s25] sm:$0xff] %v2715_v52  ;;  %v8555_v25 = vld [vmem:[#allocation31_spill] sm:$0xff]  ;;  %v8574_v52 = vld [vmem:[#allocation50_spill] sm:$0xff] }
 0x29f   : > { %v2059_v14 = vadd.bf16 %v1995_v11, %v1922_v53  ;;  %3289 = vst [vmem:[%s7855_s25 + $0x200] sm:$0xff] %v2971_v41  ;;  %v2982_v48 = vadd.f32 %v8555_v25, %v7820_v51  ;;  %v2718_v57 = vadd.f32 %v7820_v51, %v8556_v12  ;;  %v2739_v3 = vadd.f32 %v8558_v43, %v7820_v51  ;;  %v8570_v53 = vld [vmem:[#allocation46_spill] sm:$0xff]  ;;  %v8575_v41 = vld [vmem:[#allocation51_spill] sm:$0xff] }
 0x2a0   : > { %v2439_v42 = vadd.bf16 %v2375_v30, %v2302_v31  ;;  %3793 = vmatprep.mubr.bf16.mxu1 %v2607_v46  ;;  %3228 = vst [vmem:[%s7855_s25 + $0x18] sm:$0xff] %v2726_v7  ;;  %v2974_v30 = vadd.f32 %v7820_v51, %v8557_v6  ;;  %v2995_v9 = vadd.f32 %v8559_v54, %v7820_v51  ;;  %v8573_v31 = vld [vmem:[#allocation49_spill] sm:$0xff] }
 0x2a1   : > { %v2196_v11 = vadd.bf16 %v8554_v24, %v2059_v14  ;;  %v2731_v28 = vadd.f32 %v7820_v51, %v8560_v55  ;;  %3292 = vst [vmem:[%s7855_s25 + $0x218] sm:$0xff] %v2982_v48  ;;  %3226 = vst [vmem:[%s7855_s25 + $0x8] sm:$0xff] %v2718_v57  ;;  %v2987_v59 = vadd.f32 %v7820_v51, %v8561_v15  ;;  %v8580_v48 = vld [vmem:[#allocation56_spill] sm:$0xff]  ;;  %v8581_v57 = vld [vmem:[#allocation57_spill] sm:$0xff] }
 0x2a2   : > { %v2576_v47 = vadd.bf16 %v2512_v56, %v2439_v42  ;;  %v2742_v32 = vadd.f32 %v8562_v19, %v7820_v51  ;;  %3290 = vst [vmem:[%s7855_s25 + $0x208] sm:$0xff] %v2974_v30  ;;  %3231 = vst [vmem:[%s7855_s25 + $0x30] sm:$0xff] %v2739_v3  ;;  %v8563_v56 = vld [vmem:[#allocation39_spill] sm:$0xff]  ;;  %v2734_v13 = vadd.f32 %v7820_v51, %v8564_v35  ;;  %v8578_v42 = vld [vmem:[#allocation54_spill] sm:$0xff] }
 0x2a3   : > { %v2334_v50 = vadd.bf16 %v2270_v17, %v2196_v11  ;;  %3295 = vst [vmem:[%s7855_s25 + $0x230] sm:$0xff] %v2995_v9  ;;  %3229 = vst [vmem:[%s7855_s25 + $0x20] sm:$0xff] %v2731_v28  ;;  %v2998_v26 = vadd.f32 %v8563_v56, %v7820_v51  ;;  %v2990_v21 = vadd.f32 %v7820_v51, %v8565_v20  ;;  %v8568_v17 = vld [vmem:[#allocation44_spill] sm:$0xff]  ;;  %v8579_v11 = vld [vmem:[#allocation55_spill] sm:$0xff] }
 0x2a4   : > { %v2755_v37 = vadd.f32 %v8566_v36, %v7820_v51  ;;  %3730 = vmatmul.mubr.bf16.gmra.mrb[60].mxu0 %v2576_v47  ;;  %3293 = vst [vmem:[%s7855_s25 + $0x220] sm:$0xff] %v2987_v59  ;;  %3232 = vst [vmem:[%s7855_s25 + $0x38] sm:$0xff] %v2742_v32  ;;  %v3011_v1 = vadd.f32 %v8567_v63, %v7820_v51  ;;  %v2747_v23 = vadd.f32 %v7820_v51, %v8568_v17  ;;  %v8582_v30 = vld [vmem:[#allocation58_spill] sm:$0xff]  ;;  %v8583_v3 = vld [vmem:[#allocation59_spill] sm:$0xff] }
 0x2a5   : > { %v2471_v0 = vadd.bf16 %v2407_v40, %v2334_v50  ;;  %v3003_v33 = vadd.f32 %v7820_v51, %v8569_v38  ;;  %3296 = vst [vmem:[%s7855_s25 + $0x238] sm:$0xff] %v2998_v26  ;;  %3230 = vst [vmem:[%s7855_s25 + $0x28] sm:$0xff] %v2734_v13  ;;  %v2758_v34 = vadd.f32 %v8570_v53, %v7820_v51  ;;  %v8576_v40 = vld [vmem:[#allocation52_spill] sm:$0xff]  ;;  %v8585_v28 = vld [vmem:[#allocation61_spill] sm:$0xff] }
 0x2a6   : > { %3294 = vst [vmem:[%s7855_s25 + $0x228] sm:$0xff] %v2990_v21  ;;  %3235 = vst [vmem:[%s7855_s25 + $0x50] sm:$0xff] %v2755_v37  ;;  %v3014_v16 = vadd.f32 %v8571_v60, %v7820_v51  ;;  %v2750_v39 = vadd.f32 %v7820_v51, %v8572_v27  ;;  %v3006_v14 = vadd.f32 %v7820_v51, %v8573_v31  ;;  %v8584_v9 = vld [vmem:[#allocation60_spill] sm:$0xff]  ;;  %v8586_v50 = vld [vmem:[#allocation62_spill] sm:$0xff] }
 0x2a7   : > { %v2608_v4 = vadd.bf16 %v2544_v22, %v2471_v0  ;;  %3299 = vst [vmem:[%s7855_s25 + $0x250] sm:$0xff] %v3011_v1  ;;  %3233 = vst [vmem:[%s7855_s25 + $0x40] sm:$0xff] %v2747_v23  ;;  %v2771_v58 = vadd.f32 %v8574_v52, %v7820_v51  ;;  %v3027_v46 = vadd.f32 %v8575_v41, %v7820_v51  ;;  %v8577_v22 = vld [vmem:[#allocation53_spill] sm:$0xff]  ;;  %v8587_v59 = vld [vmem:[#allocation63_spill] sm:$0xff] }
 0x2a8   : > { %3297 = vst [vmem:[%s7855_s25 + $0x240] sm:$0xff] %v3003_v33  ;;  %v2763_v45 = vadd.f32 %v7820_v51, %v8576_v40  ;;  %3236 = vst [vmem:[%s7855_s25 + $0x58] sm:$0xff] %v2758_v34  ;;  %v3019_v7 = vadd.f32 %v7820_v51, %v8577_v22  ;;  %v2774_v24 = vadd.f32 %v8578_v42, %v7820_v51  ;;  %v8588_v32 = vld [vmem:[#allocation64_spill] sm:$0xff]  ;;  %v8589_v26 = vld [vmem:[#allocation65_spill] sm:$0xff] }
 0x2a9   : > { %3300 = vst [vmem:[%s7855_s25 + $0x258] sm:$0xff] %v3014_v16  ;;  %3234 = vst [vmem:[%s7855_s25 + $0x48] sm:$0xff] %v2750_v39  ;;  %v3030_v25 = vadd.f32 %v8579_v11, %v7820_v51  ;;  %v2766_v12 = vadd.f32 %v7820_v51, %v8580_v48  ;;  %3794 = vmatmul.mubr.bf16.gmra.mrb[60].mxu1 %v2608_v4  ;;  %v3022_v6 = vadd.f32 %v7820_v51, %v8581_v57  ;;  %v8590_v13 = vld [vmem:[#allocation66_spill] sm:$0xff]  ;;  %v8592_v37 = vld [vmem:[#allocation67_spill] sm:$0xff] }
 0x2aa   : > { %3298 = vst [vmem:[%s7855_s25 + $0x248] sm:$0xff] %v3006_v14  ;;  %3239 = vst [vmem:[%s7855_s25 + $0x70] sm:$0xff] %v2771_v58  ;;  %v2787_v43 = vadd.f32 %v8582_v30, %v7820_v51  ;;  %v3043_v54 = vadd.f32 %v8583_v3, %v7820_v51  ;;  %v2779_v55 = vadd.f32 %v7820_v51, %v8584_v9  ;;  %v8591_v21 = vld [vmem:[#allocation70_spill] sm:$0xff]  ;;  %v8593_v63 = vld [vmem:[#allocation71_spill] sm:$0xff]  ;;  %v3703_v58 = vpop.f32.mrb[32].mxu0 }
 0x2ab   : > { %3303 = vst [vmem:[%s7855_s25 + $0x270] sm:$0xff] %v3027_v46  ;;  %3237 = vst [vmem:[%s7855_s25 + $0x60] sm:$0xff] %v2763_v45  ;;  %v3035_v47 = vadd.f32 %v7820_v51, %v8585_v28  ;;  %v2790_v15 = vadd.f32 %v8586_v50, %v7820_v51  ;;  %v3046_v19 = vadd.f32 %v8587_v59, %v7820_v51  ;;  %v8594_v17 = vld [vmem:[#allocation68_spill] sm:$0xff]  ;;  %v8596_v53 = vld [vmem:[#allocation69_spill] sm:$0xff] }
 0x2ac   : > { %3301 = vst [vmem:[%s7855_s25 + $0x260] sm:$0xff] %v3019_v7  ;;  %3240 = vst [vmem:[%s7855_s25 + $0x78] sm:$0xff] %v2774_v24  ;;  %v2782_v56 = vadd.f32 %v7820_v51, %v8588_v32  ;;  %v3038_v35 = vadd.f32 %v7820_v51, %v8589_v26  ;;  %v2803_v20 = vadd.f32 %v8590_v13, %v7820_v51  ;;  %v8595_v38 = vld [vmem:[#allocation72_spill] sm:$0xff]  ;;  %v8597_v60 = vld [vmem:[#allocation73_spill] sm:$0xff]  ;;  %v2842_v24 = vpop.f32.mrb[33].mxu0 }
 0x2ad   : > { %3304 = vst [vmem:[%s7855_s25 + $0x278] sm:$0xff] %v3030_v25  ;;  %3238 = vst [vmem:[%s7855_s25 + $0x68] sm:$0xff] %v2766_v12  ;;  %v3059_v36 = vadd.f32 %v8591_v21, %v7820_v51  ;;  %v2795_v0 = vadd.f32 %v7820_v51, %v8592_v37  ;;  %v3051_v1 = vadd.f32 %v7820_v51, %v8593_v63  ;;  %v8598_v27 = vld [vmem:[#allocation76_spill] sm:$0xff]  ;;  %v8600_v4 = vld [vmem:[#allocation77_spill] sm:$0xff]  ;;  %v3704_v12 = vpop.f32.mrb[34].mxu0 }
 0x2ae   : > { %3302 = vst [vmem:[%s7855_s25 + $0x268] sm:$0xff] %v3022_v6  ;;  %3243 = vst [vmem:[%s7855_s25 + $0x90] sm:$0xff] %v2787_v43  ;;  %v2806_v23 = vadd.f32 %v8594_v17, %v7820_v51  ;;  %v3062_v33 = vadd.f32 %v8595_v38, %v7820_v51  ;;  %v2798_v34 = vadd.f32 %v7820_v51, %v8596_v53  ;;  %v8599_v31 = vld [vmem:[#allocation16_spill] sm:$0xff]  ;;  %v8602_v40 = vld [vmem:[#allocation78_spill] sm:$0xff]  ;;  %v2845_v57 = vpop.f32.mrb[35].mxu0 }
 0x2af   : > { %3307 = vst [vmem:[%s7855_s25 + $0x290] sm:$0xff] %v3043_v54  ;;  %3241 = vst [vmem:[%s7855_s25 + $0x80] sm:$0xff] %v2779_v55  ;;  %v3054_v16 = vadd.f32 %v7820_v51, %v8597_v60  ;;  %v2819_v39 = vadd.f32 %v8598_v27, %v7820_v51  ;;  %v3075_v14 = vadd.f32 %v8599_v31, %v7820_v51  ;;  %v8601_v41 = vld [vmem:[#allocation80_spill] sm:$0xff]  ;;  %v8603_v7 = vld [vmem:[#allocation79_spill] sm:$0xff] }
 0x2b0   : > { %3305 = vst [vmem:[%s7855_s25 + $0x280] sm:$0xff] %v3035_v47  ;;  %3244 = vst [vmem:[%s7855_s25 + $0x98] sm:$0xff] %v2790_v15  ;;  %v2811_v52 = vadd.f32 %v7820_v51, %v8600_v4  ;;  %v3067_v46 = vadd.f32 %v7820_v51, %v8601_v41  ;;  %v2822_v45 = vadd.f32 %v8602_v40, %v7820_v51 }
 0x2b1   : > { %3308 = vst [vmem:[%s7855_s25 + $0x298] sm:$0xff] %v3046_v19  ;;  %3242 = vst [vmem:[%s7855_s25 + $0x88] sm:$0xff] %v2782_v56  ;;  %v3078_v22 = vadd.f32 %v7637_v2, %v7820_v51  ;;  %v2814_v42 = vadd.f32 %v7820_v51, %v8603_v7  ;;  %v3070_v11 = vadd.f32 %v7820_v51, %v7639_v18 }
 0x2b2   : > { %3306 = vst [vmem:[%s7855_s25 + $0x288] sm:$0xff] %v3038_v35  ;;  %3247 = vst [vmem:[%s7855_s25 + $0xb0] sm:$0xff] %v2803_v20  ;;  %v2835_v25 = vadd.f32 %v7764_v62, %v7820_v51  ;;  %v3091_v2 = vadd.f32 %v7810_v44, %v7820_v51  ;;  %v2827_v48 = vadd.f32 %v7820_v51, %v7768_v49 }
 0x2b3   : > { %3311 = vst [vmem:[%s7855_s25 + $0x2b0] sm:$0xff] %v3059_v36  ;;  %3245 = vst [vmem:[%s7855_s25 + $0xa0] sm:$0xff] %v2795_v0  ;;  %v3083_v18 = vadd.f32 %v7820_v51, %v7822_v61  ;;  %v2838_v62 = vadd.f32 %v7770_v8, %v7820_v51  ;;  %v3094_v44 = vadd.f32 %v7830_v5, %v7820_v51 }
 0x2b4   : > { %3309 = vst [vmem:[%s7855_s25 + $0x2a0] sm:$0xff] %v3051_v1  ;;  %3248 = vst [vmem:[%s7855_s25 + $0xb8] sm:$0xff] %v2806_v23  ;;  %v2830_v49 = vadd.f32 %v7820_v51, %v7772_v10  ;;  %v3086_v61 = vadd.f32 %v7820_v51, %v7839_v29  ;;  %v2851_v8 = vadd.f32 %v3703_v58, %v7820_v51  ;;  %v3767_v29 = vpop.f32.mrb[32].mxu1 }
 0x2b5   : > { %3312 = vst [vmem:[%s7855_s25 + $0x2b8] sm:$0xff] %v3062_v33  ;;  %3246 = vst [vmem:[%s7855_s25 + $0xa8] sm:$0xff] %v2798_v34  ;;  %v2843_v5 = vadd.f32 %v7820_v51, %v2842_v24  ;;  %v2854_v6 = vadd.f32 %v3704_v12, %v7820_v51  ;;  %v2846_v10 = vadd.f32 %v7820_v51, %v2845_v57  ;;  %v3098_v43 = vpop.f32.mrb[33].mxu1 }
 0x2b6   : > { %3310 = vst [vmem:[%s7855_s25 + $0x2a8] sm:$0xff] %v3054_v16  ;;  %3251 = vst [vmem:[%s7855_s25 + $0xd0] sm:$0xff] %v2819_v39  ;;  %v3107_v30 = vadd.f32 %v3767_v29, %v7820_v51  ;;  %v3099_v3 = vadd.f32 %v7820_v51, %v3098_v43  ;;  %v3768_v54 = vpop.f32.mrb[34].mxu1 }
 0x2b7   : > { %3315 = vst [vmem:[%s7855_s25 + $0x2d0] sm:$0xff] %v3075_v14  ;;  %3249 = vst [vmem:[%s7855_s25 + $0xc0] sm:$0xff] %v2811_v52  ;;  %v3110_v9 = vadd.f32 %v3768_v54, %v7820_v51  ;;  %v3101_v55 = vpop.f32.mrb[35].mxu1 }
 0x2b8   : > { %3313 = vst [vmem:[%s7855_s25 + $0x2c0] sm:$0xff] %v3067_v46  ;;  %3252 = vst [vmem:[%s7855_s25 + $0xd8] sm:$0xff] %v2822_v45  ;;  %v3102_v28 = vadd.f32 %v7820_v51, %v3101_v55 }
 0x2b9   : > { %3316 = vst [vmem:[%s7855_s25 + $0x2d8] sm:$0xff] %v3078_v22  ;;  %3250 = vst [vmem:[%s7855_s25 + $0xc8] sm:$0xff] %v2814_v42 }
 0x2ba   : > { %3314 = vst [vmem:[%s7855_s25 + $0x2c8] sm:$0xff] %v3070_v11  ;;  %3255 = vst [vmem:[%s7855_s25 + $0xf0] sm:$0xff] %v2835_v25 }
 0x2bb   : > { %3319 = vst [vmem:[%s7855_s25 + $0x2f0] sm:$0xff] %v3091_v2  ;;  %3253 = vst [vmem:[%s7855_s25 + $0xe0] sm:$0xff] %v2827_v48 }
 0x2bc   : > { %3317 = vst [vmem:[%s7855_s25 + $0x2e0] sm:$0xff] %v3083_v18  ;;  %3256 = vst [vmem:[%s7855_s25 + $0xf8] sm:$0xff] %v2838_v62 }
 0x2bd   : > { %3320 = vst [vmem:[%s7855_s25 + $0x2f8] sm:$0xff] %v3094_v44  ;;  %3254 = vst [vmem:[%s7855_s25 + $0xe8] sm:$0xff] %v2830_v49 }
 0x2be   : > { %3318 = vst [vmem:[%s7855_s25 + $0x2e8] sm:$0xff] %v3086_v61  ;;  %3259 = vst [vmem:[%s7855_s25 + $0x110] sm:$0xff] %v2851_v8 }
 0x2bf   : > { %3257 = vst [vmem:[%s7855_s25 + $0x100] sm:$0xff] %v2843_v5  ;;  %3260 = vst [vmem:[%s7855_s25 + $0x118] sm:$0xff] %v2854_v6 }
 0x2c0   : > { %3258 = vst [vmem:[%s7855_s25 + $0x108] sm:$0xff] %v2846_v10  ;;  %3323 = vst [vmem:[%s7855_s25 + $0x310] sm:$0xff] %v3107_v30 }
 0x2c1   : > { %3321 = vst [vmem:[%s7855_s25 + $0x300] sm:$0xff] %v3099_v3  ;;  %3324 = vst [vmem:[%s7855_s25 + $0x318] sm:$0xff] %v3110_v9 }
 0x2c2   : > { %3322 = vst [vmem:[%s7855_s25 + $0x308] sm:$0xff] %v3102_v28 }
 0x2c4   : > { %v3707_v47 = vpop.f32.mrb[36].mxu0 }
 0x2c5   : > { %v2867_v50 = vadd.f32 %v3707_v47, %v7820_v51  ;;  %v2858_v15 = vpop.f32.mrb[37].mxu0 }
 0x2c6   : > { %v2859_v59 = vadd.f32 %v7820_v51, %v2858_v15  ;;  %v3708_v19 = vpop.f32.mrb[38].mxu0 }
 0x2c7   : > { %3263 = vst [vmem:[%s7855_s25 + $0x130] sm:$0xff] %v2867_v50  ;;  %v2870_v32 = vadd.f32 %v3708_v19, %v7820_v51  ;;  %v2861_v56 = vpop.f32.mrb[39].mxu0 }
 0x2c8   : > { %3261 = vst [vmem:[%s7855_s25 + $0x120] sm:$0xff] %v2859_v59  ;;  %v2862_v26 = vadd.f32 %v7820_v51, %v2861_v56 }
 0x2c9   : > { %3264 = vst [vmem:[%s7855_s25 + $0x138] sm:$0xff] %v2870_v32 }
 0x2ca   : > { %3262 = vst [vmem:[%s7855_s25 + $0x128] sm:$0xff] %v2862_v26 }
 0x2cc   : > { %v3771_v35 = vpop.f32.mrb[36].mxu1 }
 0x2cd   : > { %v3123_v13 = vadd.f32 %v3771_v35, %v7820_v51  ;;  %v3114_v20 = vpop.f32.mrb[37].mxu1 }
 0x2ce   : > { %v3115_v21 = vadd.f32 %v7820_v51, %v3114_v20  ;;  %v3772_v36 = vpop.f32.mrb[38].mxu1 }
 0x2cf   : > { %3327 = vst [vmem:[%s7855_s25 + $0x330] sm:$0xff] %v3123_v13  ;;  %v3126_v37 = vadd.f32 %v3772_v36, %v7820_v51  ;;  %v3117_v0 = vpop.f32.mrb[39].mxu1 }
 0x2d0   : > { %3325 = vst [vmem:[%s7855_s25 + $0x320] sm:$0xff] %v3115_v21  ;;  %v3118_v63 = vadd.f32 %v7820_v51, %v3117_v0 }
 0x2d1   : > { %3328 = vst [vmem:[%s7855_s25 + $0x338] sm:$0xff] %v3126_v37 }
 0x2d2   : > { %3326 = vst [vmem:[%s7855_s25 + $0x328] sm:$0xff] %v3118_v63 }
 0x2e3   : > { %v3711_v1 = vpop.f32.mrb[40].mxu0 }
 0x2e4   : > { %v2883_v17 = vadd.f32 %v3711_v1, %v7820_v51  ;;  %v2874_v23 = vpop.f32.mrb[41].mxu0 }
 0x2e5   : > { %v2875_v38 = vadd.f32 %v7820_v51, %v2874_v23  ;;  %v3712_v33 = vpop.f32.mrb[42].mxu0 }
 0x2e6   : > { %3267 = vst [vmem:[%s7855_s25 + $0x150] sm:$0xff] %v2883_v17  ;;  %v2886_v53 = vadd.f32 %v3712_v33, %v7820_v51  ;;  %v2877_v34 = vpop.f32.mrb[43].mxu0 }
 0x2e7   : > { %3265 = vst [vmem:[%s7855_s25 + $0x140] sm:$0xff] %v2875_v38  ;;  %v2878_v60 = vadd.f32 %v7820_v51, %v2877_v34 }
 0x2e8   : > { %3268 = vst [vmem:[%s7855_s25 + $0x158] sm:$0xff] %v2886_v53 }
 0x2e9   : > { %3266 = vst [vmem:[%s7855_s25 + $0x148] sm:$0xff] %v2878_v60 }
 0x2eb   : > { %v3775_v16 = vpop.f32.mrb[40].mxu1 }
 0x2ec   : > { %v3139_v27 = vadd.f32 %v3775_v16, %v7820_v51  ;;  %v3130_v39 = vpop.f32.mrb[41].mxu1 }
 0x2ed   : > { %v3131_v31 = vadd.f32 %v7820_v51, %v3130_v39  ;;  %v3776_v14 = vpop.f32.mrb[42].mxu1 }
 0x2ee   : > { %3331 = vst [vmem:[%s7855_s25 + $0x350] sm:$0xff] %v3139_v27  ;;  %v3142_v4 = vadd.f32 %v3776_v14, %v7820_v51  ;;  %v3133_v52 = vpop.f32.mrb[43].mxu1 }
 0x2ef   : > { %3329 = vst [vmem:[%s7855_s25 + $0x340] sm:$0xff] %v3131_v31  ;;  %v3134_v58 = vadd.f32 %v7820_v51, %v3133_v52 }
 0x2f0   : > { %3332 = vst [vmem:[%s7855_s25 + $0x358] sm:$0xff] %v3142_v4 }
 0x2f1   : > { %3330 = vst [vmem:[%s7855_s25 + $0x348] sm:$0xff] %v3134_v58 }
 0x303   : > { %v3715_v41 = vpop.f32.mrb[44].mxu0 }
 0x304   : > { %v2899_v46 = vadd.f32 %v3715_v41, %v7820_v51  ;;  %v2890_v40 = vpop.f32.mrb[45].mxu0 }
 0x305   : > { %v2891_v45 = vadd.f32 %v7820_v51, %v2890_v40  ;;  %v3716_v22 = vpop.f32.mrb[46].mxu0 }
 0x306   : > { %3271 = vst [vmem:[%s7855_s25 + $0x170] sm:$0xff] %v2899_v46  ;;  %v2902_v7 = vadd.f32 %v3716_v22, %v7820_v51  ;;  %v2893_v42 = vpop.f32.mrb[47].mxu0 }
 0x307   : > { %3269 = vst [vmem:[%s7855_s25 + $0x160] sm:$0xff] %v2891_v45  ;;  %v2894_v24 = vadd.f32 %v7820_v51, %v2893_v42 }
 0x308   : > { %3272 = vst [vmem:[%s7855_s25 + $0x178] sm:$0xff] %v2902_v7 }
 0x309   : > { %3270 = vst [vmem:[%s7855_s25 + $0x168] sm:$0xff] %v2894_v24 }
 0x30d   : > { %v3779_v11 = vpop.f32.mrb[44].mxu1 }
 0x30e   : > { %v3155_v25 = vadd.f32 %v3779_v11, %v7820_v51  ;;  %v3146_v2 = vpop.f32.mrb[45].mxu1 }
 0x30f   : > { %v3147_v48 = vadd.f32 %v7820_v51, %v3146_v2  ;;  %v3780_v12 = vpop.f32.mrb[46].mxu1 }
 0x310   : > { %3335 = vst [vmem:[%s7855_s25 + $0x370] sm:$0xff] %v3155_v25  ;;  %v3158_v18 = vadd.f32 %v3780_v12, %v7820_v51  ;;  %v3149_v62 = vpop.f32.mrb[47].mxu1 }
 0x311   : > { %3333 = vst [vmem:[%s7855_s25 + $0x360] sm:$0xff] %v3147_v48  ;;  %v3150_v44 = vadd.f32 %v7820_v51, %v3149_v62 }
 0x312   : > { %3336 = vst [vmem:[%s7855_s25 + $0x378] sm:$0xff] %v3158_v18 }
 0x313   : > { %3334 = vst [vmem:[%s7855_s25 + $0x368] sm:$0xff] %v3150_v44 }
 0x325   : > { %v3719_v49 = vpop.f32.mrb[48].mxu0 }
 0x326   : > { %v2915_v57 = vadd.f32 %v3719_v49, %v7820_v51  ;;  %v2906_v61 = vpop.f32.mrb[49].mxu0 }
 0x327   : > { %v2907_v8 = vadd.f32 %v7820_v51, %v2906_v61  ;;  %v3720_v5 = vpop.f32.mrb[50].mxu0 }
 0x328   : > { %3275 = vst [vmem:[%s7855_s25 + $0x190] sm:$0xff] %v2915_v57  ;;  %v2918_v6 = vadd.f32 %v3720_v5, %v7820_v51  ;;  %v2909_v10 = vpop.f32.mrb[51].mxu0 }
 0x329   : > { %3273 = vst [vmem:[%s7855_s25 + $0x180] sm:$0xff] %v2907_v8  ;;  %v2910_v29 = vadd.f32 %v7820_v51, %v2909_v10 }
 0x32a   : > { %3276 = vst [vmem:[%s7855_s25 + $0x198] sm:$0xff] %v2918_v6 }
 0x32b   : > { %3274 = vst [vmem:[%s7855_s25 + $0x188] sm:$0xff] %v2910_v29 }
 0x32f   : > { %v3783_v30 = vpop.f32.mrb[48].mxu1 }
 0x330   : > { %v3171_v43 = vadd.f32 %v3783_v30, %v7820_v51  ;;  %v3162_v3 = vpop.f32.mrb[49].mxu1 }
 0x331   : > { %v3163_v54 = vadd.f32 %v7820_v51, %v3162_v3  ;;  %v3784_v9 = vpop.f32.mrb[50].mxu1 }
 0x332   : > { %3339 = vst [vmem:[%s7855_s25 + $0x390] sm:$0xff] %v3171_v43  ;;  %v3174_v55 = vadd.f32 %v3784_v9, %v7820_v51  ;;  %v3165_v28 = vpop.f32.mrb[51].mxu1 }
 0x333   : > { %3337 = vst [vmem:[%s7855_s25 + $0x380] sm:$0xff] %v3163_v54  ;;  %v3166_v47 = vadd.f32 %v7820_v51, %v3165_v28 }
 0x334   : > { %3340 = vst [vmem:[%s7855_s25 + $0x398] sm:$0xff] %v3174_v55 }
 0x335   : > { %3338 = vst [vmem:[%s7855_s25 + $0x388] sm:$0xff] %v3166_v47 }
 0x347   : > { %v3723_v50 = vpop.f32.mrb[52].mxu0 }
 0x348   : > { %v2931_v15 = vadd.f32 %v3723_v50, %v7820_v51  ;;  %v2922_v59 = vpop.f32.mrb[53].mxu0 }
 0x349   : > { %v2923_v19 = vadd.f32 %v7820_v51, %v2922_v59  ;;  %v3724_v32 = vpop.f32.mrb[54].mxu0 }
 0x34a   : > { %3279 = vst [vmem:[%s7855_s25 + $0x1b0] sm:$0xff] %v2931_v15  ;;  %v2934_v56 = vadd.f32 %v3724_v32, %v7820_v51  ;;  %v2925_v26 = vpop.f32.mrb[55].mxu0 }
 0x34b   : > { %3277 = vst [vmem:[%s7855_s25 + $0x1a0] sm:$0xff] %v2923_v19  ;;  %v2926_v35 = vadd.f32 %v7820_v51, %v2925_v26 }
 0x34c   : > { %3280 = vst [vmem:[%s7855_s25 + $0x1b8] sm:$0xff] %v2934_v56 }
 0x34d   : > { %3278 = vst [vmem:[%s7855_s25 + $0x1a8] sm:$0xff] %v2926_v35 }
 0x350   : > { %v3787_v13 = vpop.f32.mrb[52].mxu1 }
 0x351   : > { %v3187_v20 = vadd.f32 %v3787_v13, %v7820_v51  ;;  %v3178_v21 = vpop.f32.mrb[53].mxu1 }
 0x352   : > { %v3179_v36 = vadd.f32 %v7820_v51, %v3178_v21  ;;  %v3788_v37 = vpop.f32.mrb[54].mxu1 }
 0x353   : > { %3343 = vst [vmem:[%s7855_s25 + $0x3b0] sm:$0xff] %v3187_v20  ;;  %v3190_v0 = vadd.f32 %v3788_v37, %v7820_v51  ;;  %v3181_v63 = vpop.f32.mrb[55].mxu1 }
 0x354   : > { %3341 = vst [vmem:[%s7855_s25 + $0x3a0] sm:$0xff] %v3179_v36  ;;  %v3182_v1 = vadd.f32 %v7820_v51, %v3181_v63 }
 0x355   : > { %3344 = vst [vmem:[%s7855_s25 + $0x3b8] sm:$0xff] %v3190_v0 }
 0x356   : > { %3342 = vst [vmem:[%s7855_s25 + $0x3a8] sm:$0xff] %v3182_v1 }
 0x361   : > { %v3727_v17 = vpop.f32.mrb[56].mxu0 }
 0x362   : > { %v2947_v23 = vadd.f32 %v3727_v17, %v7820_v51  ;;  %v2938_v38 = vpop.f32.mrb[57].mxu0 }
 0x363   : > { %v2939_v33 = vadd.f32 %v7820_v51, %v2938_v38  ;;  %v3728_v53 = vpop.f32.mrb[58].mxu0 }
 0x364   : > { %3283 = vst [vmem:[%s7855_s25 + $0x1d0] sm:$0xff] %v2947_v23  ;;  %v2950_v34 = vadd.f32 %v3728_v53, %v7820_v51  ;;  %v2941_v60 = vpop.f32.mrb[59].mxu0  ;;  %v3791_v16 = vpop.f32.mrb[56].mxu1 }
 0x365   : > { %3281 = vst [vmem:[%s7855_s25 + $0x1c0] sm:$0xff] %v2939_v33  ;;  %v2942_v27 = vadd.f32 %v7820_v51, %v2941_v60  ;;  %v3203_v39 = vadd.f32 %v3791_v16, %v7820_v51  ;;  %v3194_v31 = vpop.f32.mrb[57].mxu1 }
 0x366   : > { %3284 = vst [vmem:[%s7855_s25 + $0x1d8] sm:$0xff] %v2950_v34  ;;  %v3195_v14 = vadd.f32 %v7820_v51, %v3194_v31  ;;  %v3792_v4 = vpop.f32.mrb[58].mxu1 }
 0x367   : > { %3282 = vst [vmem:[%s7855_s25 + $0x1c8] sm:$0xff] %v2942_v27  ;;  %3347 = vst [vmem:[%s7855_s25 + $0x3d0] sm:$0xff] %v3203_v39  ;;  %v3206_v52 = vadd.f32 %v3792_v4, %v7820_v51  ;;  %v3197_v58 = vpop.f32.mrb[59].mxu1 }
 0x368   : > { %3345 = vst [vmem:[%s7855_s25 + $0x3c0] sm:$0xff] %v3195_v14  ;;  %v3198_v41 = vadd.f32 %v7820_v51, %v3197_v58 }
 0x369   : > { %3348 = vst [vmem:[%s7855_s25 + $0x3d8] sm:$0xff] %v3206_v52 }
 0x36a   : > { %3346 = vst [vmem:[%s7855_s25 + $0x3c8] sm:$0xff] %v3198_v41 }
 0x377   : > { %v3731_v46 = vpop.f32.mrb[60].mxu0 }
 0x378   : > { %v2963_v40 = vadd.f32 %v3731_v46, %v7820_v51  ;;  %v2954_v45 = vpop.f32.mrb[61].mxu0 }
 0x379   : > { %v2955_v22 = vadd.f32 %v7820_v51, %v2954_v45  ;;  %v3732_v7 = vpop.f32.mrb[62].mxu0 }
 0x37a   : > { %3287 = vst [vmem:[%s7855_s25 + $0x1f0] sm:$0xff] %v2963_v40  ;;  %v2966_v42 = vadd.f32 %v3732_v7, %v7820_v51  ;;  %v2957_v24 = vpop.f32.mrb[63].mxu0 }
 0x37b   : > { %3285 = vst [vmem:[%s7855_s25 + $0x1e0] sm:$0xff] %v2955_v22  ;;  %v2958_v25 = vadd.f32 %v7820_v51, %v2957_v24 }
 0x37c   : > { %v3795_v11 = vpop.f32.mrb[60].mxu1  ;;  %3288 = vst [vmem:[%s7855_s25 + $0x1f8] sm:$0xff] %v2966_v42 }
 0x37d   : > { %v3219_v2 = vadd.f32 %v3795_v11, %v7820_v51  ;;  %v3210_v48 = vpop.f32.mrb[61].mxu1  ;;  %3286 = vst [vmem:[%s7855_s25 + $0x1e8] sm:$0xff] %v2958_v25 }
 0x37e   : > { %v3211_v12 = vadd.f32 %v7820_v51, %v3210_v48  ;;  %v3796_v18 = vpop.f32.mrb[62].mxu1 }
 0x37f   : > { %3351 = vst [vmem:[%s7855_s25 + $0x3f0] sm:$0xff] %v3219_v2  ;;  %v3222_v62 = vadd.f32 %v3796_v18, %v7820_v51  ;;  %v3213_v44 = vpop.f32.mrb[63].mxu1 }
 0x380   : > { %3349 = vst [vmem:[%s7855_s25 + $0x3e0] sm:$0xff] %v3211_v12  ;;  %v3214_v49 = vadd.f32 %v7820_v51, %v3213_v44 }
 0x381   : > { %3352 = vst [vmem:[%s7855_s25 + $0x3f8] sm:$0xff] %v3222_v62 }
 0x382   : > { %3350 = vst [vmem:[%s7855_s25 + $0x3e8] sm:$0xff] %v3214_v49 }
 0x383   : > { %4184 = shalt.err (!%p4181_p0)
}
 0x384   : > { %s4185_s5 = scalar_lea.hbm %s8191_s18, 16384  ;;  %s4189_s22 = scalar_lea.hbm %s8250_s4, 32768 }
 0x385   : > { %p4186_p4 = scmp.ne.s32.totalorder %s8191_s18, %s4185_s5  ;;  %p4190_p12 = scmp.lt.u32.totalorder %s8191_s18, %s8250_s4 }
 0x386   : > { %p4191_p1 = scmp.lt.u32.totalorder %s4189_s22, %s4185_s5  ;;  %p4193_p13 = scmp.lt.u32.totalorder %s4185_s5, %s8191_s18 }
 0x387   : > { %p4187_p2 = pnand %p4186_p4, %p4454_p10 }
 0x388   : > { %p4192_p11 = por %p4191_p1, %p4190_p12 }
 0x389   : > { %p4188_p8 = pneg %p4187_p2 }
 0x38a   : > { %p4194_p6 = por %p4193_p13, %p4192_p11 }
 0x38c   : > { %p4195_p3 = pnand %p4194_p6, %p4188_p8 }
 0x38e   : > { %4198 = shalt.err (!%p4195_p3)
}
 0x38f   : > { %s4270_s25 = smov 128   ;;  %s4271_s27 = smov 8  }
 0x390   : > { %3830 = dma.vmem_to_hbm [thread:$0]  (%p4454_p10), %s8193_s7, 16384, %s8191_s18, %s3354_s26, %s4270_s25, %s4270_s25, %s4271_s27  }
 0x391 PF: > { %s8604_s21 = sld [smem:[#allocation15_spill]]  ;;  %s3385_s29 = sand.u32 1, %s4241_s15  }
 0x392   : > { %p8606_p7 = scmp.ge.s32.totalorder %s4261_s20, 2  ;;  %s3386_s9 = scalar_lea.sflag [#allocation4], %s3385_s29 }
 0x397   : > { %p8605_p5 = scmp.ne.s32.totalorder %s8604_s21, 0 }
 0x399   : > { %p3847_p9 = pnand %p8606_p7, %p8605_p5 }
 0x39b   : > { %4236 = dma.done.wait (!%p3847_p9), %s3386_s9, 16384  }
 0x39c   : > { %4238 = vsyncadd (!%p3847_p9), %s3386_s9, 4294950912  ;;  %s22_s20 = sadd.s32 1, %s4261_s20   ;;  %s8607_s15 = smov %s4245_s16 }
 0x39d   : > { %p19_p0 = scmp.ge.s32.totalorder %s22_s20, 4   ;;  %s8608_s16 = smov %s4249_s17 }
 0x39e   : > { %s8609_s17 = smov %s4470_s24  ;;  %s8610_s18 = smov %s4257_s19 }
 0x39f   : > { %s8611_s19 = smov %s8613_s10  ;;  %21 = sbr.rel (!%p19_p0) target bundleno = 8 (0x8), region = 96 }
 0x3a6   :  { %3391 = vsyncpa [#allocation3], 1 }
 0x3a7   :  { %3393 = vsyncpa [#allocation3 + $0x1], 1 }
 0x3a8   :  { %3394 = vsyncpa [#allocation6], 1 }
 0x3a9   :  { %3395 = vsyncpa [#allocation9], 1 }
 0x3aa   :  { %3396 = vsyncpa [#allocation4], 1 }
 0x3ab   :  { %3398 = vsyncpa [#allocation4 + $0x1], 1 }

</bundles_post_ra>
